<compile_context>
chip_gen: v6e
topology: v6e:2x2x1
jax: 0.10.0
libtpu: 0.0.40
codegen_flags: <defaults>
</compile_context>

<pallas_src>
import functools

import jax
import jax.numpy as jnp
from jax.experimental import pallas as pl
from jax.experimental.pallas import tpu as pltpu

EPS = 1e-5
_MIB = 1024 * 1024


# ----------------------------------------------------------------------------
# VMEM / tiling helpers
# ----------------------------------------------------------------------------
@functools.lru_cache(maxsize=1)
def _vmem_limit_bytes():
    """Generation-aware scoped-VMEM limit: half of physical, clamped to [32, 64] MiB."""
    try:
        cap = int(pltpu.get_tpu_info().vmem_capacity_bytes)
    except Exception:  # CPU trace / older jax: fall back to the conservative value
        cap = 64 * _MIB
    return int(min(max(cap // 2, 32 * _MIB), 64 * _MIB))


def _cparams(n_axes):
    return pltpu.CompilerParams(dimension_semantics=("parallel",) * n_axes,
                                vmem_limit_bytes=_vmem_limit_bytes())


def _pick_tile(total, target):
    """Largest divisor of `total` <= target, preferring multiples of 8 (never > target)."""
    target = max(1, min(total, int(target)))
    for t in range(target, 0, -1):
        if total % t == 0 and t % 8 == 0:
            return t
    for t in range(target, 0, -1):
        if total % t == 0:
            return t
    return 1


def _row_budget(bytes_per_row, extra_bytes=0):
    """Rows that fit comfortably in scoped VMEM (double-buffered streams + headroom)."""
    avail = max(_vmem_limit_bytes() - extra_bytes, 2 * _MIB)
    return max(8, avail // (6 * max(int(bytes_per_row), 1)))


def _pick_h_tile(H, W, Cm, vmem_limit):
    """H rows per conv2 grid step: fits VMEM, keeps the (1, th*W, Cm) output block legal
    ((th*W) % 8 == 0 or th == H), and prefers >= 2 tiles/image for pipeline depth."""
    avail = max(vmem_limit - 36 * Cm * Cm, 2 * _MIB)   # minus double-buffered 3x3 weights
    budget = max(1, avail // (3 * max(24 * W * Cm, 1)))

    def ok(t):
        return H % t == 0 and ((t * W) % 8 == 0 or t == H)

    cands = [t for t in range(1, H + 1) if ok(t) and t <= budget]
    if not cands:
        return H
    halved = [t for t in cands if t <= max(H // 2, 1)]
    return max(halved) if (halved and H > 1) else max(cands)


# ----------------------------------------------------------------------------
# Kernels
# ----------------------------------------------------------------------------
def _partial_stats(h):
    """One-pass BN partials over rows: stacked [sum; sum-of-squares] -> (2, C) f32."""
    return jnp.concatenate([jnp.sum(h, axis=0, keepdims=True),
                            jnp.sum(h * h, axis=0, keepdims=True)], axis=0)


def _conv1_kernel(x_ref, w1_ref, h1_ref, st_ref):
    # x_ref: (TM, Cin) f32 ; w1_ref: (Cin, Cm) bf16
    x = x_ref[...].astype(jnp.bfloat16)
    h = jnp.dot(x, w1_ref[...], preferred_element_type=jnp.float32)   # (TM, Cm) f32
    h1_ref[...] = h.astype(jnp.bfloat16)
    st_ref[...] = _partial_stats(h)[None]


def _conv2_kernel(top_ref, mid_ref, bot_ref, s1_ref, b1_ref, w2_ref,
                  h2_ref, st_ref, *, W):
    # mid_ref: (1, TH, W, Cm) bf16 main tile ; top/bot_ref: (1, 1, W, Cm) bf16 halo rows
    # s1/b1: (1, Cm) f32 folded BN1 ; w2_ref: (9, Cm, Cm) bf16 (k = dy*3 + dx)
    TH, Cm = mid_ref.shape[1], mid_ref.shape[3]
    s = s1_ref[...].reshape(1, 1, Cm)
    b = b1_ref[...].reshape(1, 1, Cm)

    def bn_relu(v):  # (rows, W, Cm) -> f32
        return jnp.maximum(v.astype(jnp.float32) * s + b, 0.0)

    h_idx = pl.program_id(1)
    mid = bn_relu(mid_ref[0])                                                 # (TH, W, Cm)
    top = bn_relu(top_ref[0]) * (h_idx > 0).astype(jnp.float32)               # zero pad @ top
    bot = bn_relu(bot_ref[0]) * (h_idx < pl.num_programs(1) - 1).astype(jnp.float32)
    rows = jnp.concatenate([top, mid, bot], axis=0)                           # (TH+2, W, Cm)
    zcol = jnp.zeros((TH + 2, 1, Cm), jnp.float32)
    ap = jnp.concatenate([zcol, rows, zcol], axis=1)                          # (TH+2, W+2, Cm)

    # 3x3 conv as 9 accumulated MXU dots on shifted taps (no (HW, 9*Cm) im2col buffer).
    acc = jnp.zeros((TH * W, Cm), jnp.float32)
    for k in range(9):
        dy, dx = divmod(k, 3)
        tap = ap[dy:dy + TH, dx:dx + W, :].reshape(TH * W, Cm).astype(jnp.bfloat16)
        acc = acc + jnp.dot(tap, w2_ref[k], preferred_element_type=jnp.float32)

    h2_ref[0] = acc.astype(jnp.bfloat16)
    st_ref[...] = _partial_stats(acc)[None, None]


def _conv3_kernel(h2_ref, s2_ref, b2_ref, w3_ref, h3_ref, st_ref):
    # h2_ref: (TM, Cm) bf16 ; w3_ref: (Cm, Cout) bf16
    a = h2_ref[...].astype(jnp.float32) * s2_ref[...] + b2_ref[...]
    a = jnp.maximum(a, 0.0).astype(jnp.bfloat16)
    h = jnp.dot(a, w3_ref[...], preferred_element_type=jnp.float32)   # (TM, Cout) f32
    h3_ref[...] = h.astype(jnp.bfloat16)
    st_ref[...] = _partial_stats(h)[None]


def _finalize_kernel(h3_ref, x_ref, s3_ref, b3_ref, out_ref):
    # Lane-dense layout: every operand is (TH, W*Cout) (or (1, W*Cout)); f32 residual add.
    h = h3_ref[...].astype(jnp.float32) * s3_ref[...] + b3_ref[...]
    out_ref[...] = jnp.maximum(h + x_ref[...], 0.0)


# ----------------------------------------------------------------------------
# Host-side glue
# ----------------------------------------------------------------------------
def _fold_bn(stats, gamma, beta, count):
    """Reduce per-tile (sum, sumsq) partials and fold BN into y = x*scale + bias."""
    c = gamma.size
    st = stats.reshape(-1, 2, c)
    s = jnp.sum(st[:, 0, :], axis=0)
    s2 = jnp.sum(st[:, 1, :], axis=0)
    mean = s / count
    var = jnp.maximum(s2 / count - mean * mean, 0.0)   # biased var, f32 accumulation
    scale = gamma.reshape(-1) * jax.lax.rsqrt(var + EPS)
    bias = beta.reshape(-1) - mean * scale
    return scale.reshape(1, -1), bias.reshape(1, -1)


def expansion_resblock_nhwc(x, params):
    """x: (N, H, W, Cin) NHWC. Returns (N, H, W, Cout) f32, Cout == Cin."""
    x = x.astype(jnp.float32)
    N, H, W, Cin = x.shape
    Cm = params["w1"].shape[1]
    Cout = params["w3"].shape[1]
    if Cin != Cout:
        # TODO(synk): stride>1 / projection (downsampling_layer) residual unimplemented.
        raise NotImplementedError("identity residual requires in_channels == 4*inter_channels")
    NHW, HW = N * H * W, H * W
    count = float(NHW)
    vmem = _vmem_limit_bytes()

    # TODO(synk): for peak MXU/lane efficiency Cm/Cout should be multiples of 128.
    w1 = params["w1"].astype(jnp.bfloat16)                        # (Cin, Cm)
    w2 = params["w2"].reshape(9, Cm, Cm).astype(jnp.bfloat16)     # (dy*3+dx, cin, cout)
    w3 = params["w3"].astype(jnp.bfloat16)                        # (Cm, Cout)

    # ---- stage 1: conv1 (1x1) + BN1 partial stats -----------------------------------
    x2d = x.reshape(NHW, Cin)
    tm1 = _pick_tile(NHW, min(1024, _row_budget(4 * Cin + 2 * Cm, 4 * Cin * Cm)))
    g1 = NHW // tm1
    h1, st1 = pl.pallas_call(
        _conv1_kernel,
        grid_spec=pltpu.PrefetchScalarGridSpec(
            num_scalar_prefetch=0, grid=(g1,),
            in_specs=[pl.BlockSpec((tm1, Cin), lambda i: (i, 0)),
                      pl.BlockSpec((Cin, Cm), lambda i: (0, 0))],
            out_specs=[pl.BlockSpec((tm1, Cm), lambda i: (i, 0)),
                       pl.BlockSpec((1, 2, Cm), lambda i: (i, 0, 0))]),
        out_shape=(jax.ShapeDtypeStruct((NHW, Cm), jnp.bfloat16),
                   jax.ShapeDtypeStruct((g1, 2, Cm), jnp.float32)),
        compiler_params=_cparams(1),
    )(x2d, w1)
    scale1, bias1 = _fold_bn(st1, params["g1"], params["b1"], count)

    # ---- stage 2: bn1+relu -> conv2 (3x3, pad 1) + BN2 partial stats -----------------
    th = _pick_h_tile(H, W, Cm, vmem)
    gh = H // th
    h1_img = h1.reshape(N, H, W, Cm)      # free reshape (row-major)
    h2, st2 = pl.pallas_call(
        functools.partial(_conv2_kernel, W=W),
        grid_spec=pltpu.PrefetchScalarGridSpec(
            num_scalar_prefetch=0, grid=(N, gh),
            in_specs=[
                # top halo row (clamped at image edge; zeroed in-kernel when h == 0)
                pl.BlockSpec((1, 1, W, Cm),
                             lambda n, h: (n, jnp.maximum(h * th - 1, 0), 0, 0)),
                # main tile of th rows
                pl.BlockSpec((1, th, W, Cm), lambda n, h: (n, h, 0, 0)),
                # bottom halo row (clamped; zeroed in-kernel when h == gh-1)
                pl.BlockSpec((1, 1, W, Cm),
                             lambda n, h: (n, jnp.minimum((h + 1) * th, H - 1), 0, 0)),
                pl.BlockSpec((1, Cm), lambda n, h: (0, 0)),
                pl.BlockSpec((1, Cm), lambda n, h: (0, 0)),
                pl.BlockSpec((9, Cm, Cm), lambda n, h: (0, 0, 0))],
            out_specs=[pl.BlockSpec((1, th * W, Cm), lambda n, h: (n, h, 0)),
                       pl.BlockSpec((1, 1, 2, Cm), lambda n, h: (n, h, 0, 0))]),
        out_shape=(jax.ShapeDtypeStruct((N, HW, Cm), jnp.bfloat16),
                   jax.ShapeDtypeStruct((N, gh, 2, Cm), jnp.float32)),
        compiler_params=_cparams(2),
    )(h1_img, h1_img, h1_img, scale1, bias1, w2)
    scale2, bias2 = _fold_bn(st2, params["g2"], params["b2"], count)

    # ---- stage 3: bn2+relu -> conv3 (1x1) + BN3 partial stats ------------------------
    tm3 = _pick_tile(NHW, min(1024, _row_budget(2 * Cm + 2 * Cout, 4 * Cm * Cout)))
    g3 = NHW // tm3
    h3, st3 = pl.pallas_call(
        _conv3_kernel,
        grid_spec=pltpu.PrefetchScalarGridSpec(
            num_scalar_prefetch=0, grid=(g3,),
            in_specs=[pl.BlockSpec((tm3, Cm), lambda i: (i, 0)),
                      pl.BlockSpec((1, Cm), lambda i: (0, 0)),
                      pl.BlockSpec((1, Cm), lambda i: (0, 0)),
                      pl.BlockSpec((Cm, Cout), lambda i: (0, 0))],
            out_specs=[pl.BlockSpec((tm3, Cout), lambda i: (i, 0)),
                       pl.BlockSpec((1, 2, Cout), lambda i: (i, 0, 0))]),
        out_shape=(jax.ShapeDtypeStruct((NHW, Cout), jnp.bfloat16),
                   jax.ShapeDtypeStruct((g3, 2, Cout), jnp.float32)),
        compiler_params=_cparams(1),
    )(h2.reshape(NHW, Cm), scale2, bias2, w3)
    scale3, bias3 = _fold_bn(st3, params["g3"], params["b3"], count)

    # ---- stage 4: bn3 + identity residual + relu, lane-dense (N*H, W*Cout) slab ------
    rows, lane = N * H, W * Cout
    th4 = _pick_tile(rows, min(256, _row_budget(10 * lane)))
    s3w = jnp.tile(scale3, (1, W))   # per-row pattern = channel vector repeated W times
    b3w = jnp.tile(bias3, (1, W))
    out2d = pl.pallas_call(
        _finalize_kernel,
        grid_spec=pltpu.PrefetchScalarGridSpec(
            num_scalar_prefetch=0, grid=(rows // th4,),
            in_specs=[pl.BlockSpec((th4, lane), lambda i: (i, 0)),
                      pl.BlockSpec((th4, lane), lambda i: (i, 0)),
                      pl.BlockSpec((1, lane), lambda i: (0, 0)),
                      pl.BlockSpec((1, lane), lambda i: (0, 0))],
            out_specs=pl.BlockSpec((th4, lane), lambda i: (i, 0))),
        out_shape=jax.ShapeDtypeStruct((rows, lane), jnp.float32),
        compiler_params=_cparams(1),
    )(h3.reshape(rows, lane), x.reshape(rows, W * Cin), s3w, b3w)
    return out2d.reshape(N, H, W, Cout)


# Primary entry point: NHWC end-to-end (no boundary transposes).
expansion_resblock = jax.jit(expansion_resblock_nhwc)


@jax.jit
def expansion_resblock_nchw(x_nchw, params):
    """Drop-in for the PyTorch NCHW convention (adds two boundary transposes)."""
    x = jnp.transpose(x_nchw, (0, 2, 3, 1))
    return jnp.transpose(expansion_resblock_nhwc(x, params), (0, 3, 1, 2))


# ----------------------------------------------------------------------------
# Parameters and pure-JAX reference
# ----------------------------------------------------------------------------
def make_params(key, in_channels, inter_channels):
    """conv weights in matmul/HWIO layout; BN gamma=1, beta=0 (PyTorch default init)."""
    expansion = 4
    Cm, Cout = inter_channels, inter_channels * expansion
    k1, k2, k3 = jax.random.split(key, 3)
    f32 = jnp.float32
    return {
        "w1": 0.1 * jax.random.normal(k1, (in_channels, Cm), f32),
        "g1": jnp.ones((1, Cm), f32), "b1": jnp.zeros((1, Cm), f32),
        "w2": 0.1 * jax.random.normal(k2, (3, 3, Cm, Cm), f32),        # HWIO
        "g2": jnp.ones((1, Cm), f32), "b2": jnp.zeros((1, Cm), f32),
        "w3": 0.1 * jax.random.normal(k3, (Cm, Cout), f32),
        "g3": jnp.ones((1, Cout), f32), "b3": jnp.zeros((1, Cout), f32),
    }


def reference_nhwc(x, params):
    """Pure-JAX f32 reference (lax.conv + batch-stat BN) for validation."""
    x = x.astype(jnp.float32)

    def conv(h, w_hwio, pad):
        return jax.lax.conv_general_dilated(
            h, w_hwio, window_strides=(1, 1), padding=[(pad, pad), (pad, pad)],
            dimension_numbers=("NHWC", "HWIO", "NHWC"))

    def bn(h, g, b):
        mean = jnp.mean(h, axis=(0, 1, 2), keepdims=True)
        var = jnp.mean(jnp.square(h - mean), axis=(0, 1, 2), keepdims=True)
        return (h - mean) * jax.lax.rsqrt(var + EPS) * g + b

    Cin, Cm = params["w1"].shape
    Cout = params["w3"].shape[1]
    h = jax.nn.relu(bn(conv(x, params["w1"].reshape(1, 1, Cin, Cm), 0),
                       params["g1"], params["b1"]))
    h = jax.nn.relu(bn(conv(h, params["w2"], 1), params["g2"], params["b2"]))
    h = bn(conv(h, params["w3"].reshape(1, 1, Cm, Cout), 0),
           params["g3"], params["b3"])
    return jax.nn.relu(h + x)


if __name__ == "__main__":
    # Identity residual requires in_channels == inter_channels * 4.
    batch, inter_channels, spatial = 2, 4, 16
    in_channels = inter_channels * 4  # 16

    key = jax.random.PRNGKey(0)
    kx, kp = jax.random.split(key)
    # NHWC activations end-to-end (review: drop NCHW boundary transposes).
    x = jax.random.normal(kx, (batch, spatial, spatial, in_channels), jnp.float32)
    params = make_params(kp, in_channels, inter_channels)

    out = jax.block_until_ready(expansion_resblock(x, params))
    ref = jax.block_until_ready(reference_nhwc(x, params))
    assert out.shape == (batch, spatial, spatial, in_channels), out.shape
    # bf16 MXU operands + bf16 HBM intermediates => bf16-level tolerance vs f32 ref.
    err = float(jnp.max(jnp.abs(out - ref) / (1.0 + jnp.abs(ref))))
    assert err < 7e-2, f"NHWC mismatch vs reference: {err}"

    # PyTorch-convention NCHW wrapper (same kernels + boundary transposes).
    x_nchw = jnp.transpose(x, (0, 3, 1, 2))
    out_nchw = jax.block_until_ready(expansion_resblock_nchw(x_nchw, params))
    ref_nchw = jnp.transpose(ref, (0, 3, 1, 2))
    err2 = float(jnp.max(jnp.abs(out_nchw - ref_nchw) / (1.0 + jnp.abs(ref_nchw))))
    assert err2 < 7e-2, f"NCHW mismatch vs reference: {err2}"

    print("KERNEL_OK")
</pallas_src>

<mosaic_0001>
module attributes {stable_mosaic.version = 11 : i64} {
  func.func @_conv1_kernel(%arg0: i32, %arg1: memref<512x16xf32, #tpu.memory_space<vmem>>, %arg2: memref<16x4xbf16, #tpu.memory_space<vmem>>, %arg3: memref<512x4xbf16, #tpu.memory_space<vmem>>, %arg4: memref<1x2x4xf32, #tpu.memory_space<vmem>>) attributes {dimension_semantics = [#tpu.dimension_semantics<parallel>], iteration_bounds = array<i64: 1>, scalar_prefetch = 0 : i64, scratch_operands = 0 : i64, tpu.core_type = #tpu.core_type<tc>, window_params = [{transform_indices = @transform_0, window_bounds = array<i64: 512, 16>}, {pipeline_mode = #tpu.pipeline_mode<synchronous>, transform_indices = @transform_1, window_bounds = array<i64: 16, 4>}, {transform_indices = @transform_2, window_bounds = array<i64: 512, 4>}, {transform_indices = @transform_3, window_bounds = array<i64: 1, 2, 4>}]} {
    %c0 = arith.constant 0 : index
    %c0_0 = arith.constant 0 : index
    %0 = vector.load %arg1[%c0, %c0_0] : memref<512x16xf32, #tpu.memory_space<vmem>>, vector<512x16xf32>
    %1 = arith.truncf %0 : vector<512x16xf32> to vector<512x16xbf16>
    %c0_1 = arith.constant 0 : index
    %c0_2 = arith.constant 0 : index
    %2 = vector.load %arg2[%c0_1, %c0_2] : memref<16x4xbf16, #tpu.memory_space<vmem>>, vector<16x4xbf16>
    %cst = arith.constant dense<0.000000e+00> : vector<512x4xf32>
    %3 = tpu.matmul %1, %2, %cst {dimension_numbers = #tpu.dot_dimension_numbers<[1], [0], [0], [1], [0, 0, 1, 1], [], []>} : vector<512x16xbf16>, vector<16x4xbf16>, vector<512x4xf32> -> vector<512x4xf32>
    %4 = arith.truncf %3 : vector<512x4xf32> to vector<512x4xbf16>
    %c0_3 = arith.constant 0 : index
    %c0_4 = arith.constant 0 : index
    %5 = vector.load %arg3[%c0_3, %c0_4] : memref<512x4xbf16, #tpu.memory_space<vmem>>, vector<512x4xbf16>
    tpu.vector_store %arg3[%c0_3, %c0_4], %4 {strides = array<i32>} : memref<512x4xbf16, #tpu.memory_space<vmem>>, vector<512x4xbf16>,
    %cst_5 = arith.constant dense<0.000000e+00> : vector<4xf32>
    %6 = vector.multi_reduction <add>, %3, %cst_5 [0] : vector<512x4xf32> to vector<4xf32>
    %7 = vector.shape_cast %6 : vector<4xf32> to vector<1x4xf32>
    %8 = arith.mulf %3, %3 : vector<512x4xf32>
    %cst_6 = arith.constant dense<0.000000e+00> : vector<4xf32>
    %9 = vector.multi_reduction <add>, %8, %cst_6 [0] : vector<512x4xf32> to vector<4xf32>
    %10 = vector.shape_cast %9 : vector<4xf32> to vector<1x4xf32>
    %11 = tpu.concatenate %7, %10 in 0 : vector<1x4xf32>, vector<1x4xf32> -> vector<2x4xf32>
    %12 = vector.shape_cast %11 : vector<2x4xf32> to vector<1x2x4xf32>
    %c0_7 = arith.constant 0 : index
    %c0_8 = arith.constant 0 : index
    %c0_9 = arith.constant 0 : index
    %13 = vector.load %arg4[%c0_7, %c0_8, %c0_9] : memref<1x2x4xf32, #tpu.memory_space<vmem>>, vector<1x2x4xf32>
    tpu.vector_store %arg4[%c0_7, %c0_8, %c0_9], %12 {strides = array<i32>} : memref<1x2x4xf32, #tpu.memory_space<vmem>>, vector<1x2x4xf32>,
    return
  }
  func.func @transform_0(%arg0: i32) -> (i32, i32) {
    %c0_i32 = arith.constant 0 : i32
    %c0_i32_0 = arith.constant 0 : i32
    return %arg0, %c0_i32 : i32, i32
  }
  func.func @transform_1(%arg0: i32) -> (i32, i32) {
    %c0_i32 = arith.constant 0 : i32
    %c0_i32_0 = arith.constant 0 : i32
    %c0_i32_1 = arith.constant 0 : i32
    return %c0_i32, %c0_i32_0 : i32, i32
  }
  func.func @transform_2(%arg0: i32) -> (i32, i32) {
    %c0_i32 = arith.constant 0 : i32
    %c0_i32_0 = arith.constant 0 : i32
    return %arg0, %c0_i32 : i32, i32
  }
  func.func @transform_3(%arg0: i32) -> (i32, i32, i32) {
    %c0_i32 = arith.constant 0 : i32
    %c0_i32_0 = arith.constant 0 : i32
    %c0_i32_1 = arith.constant 0 : i32
    return %arg0, %c0_i32, %c0_i32_0 : i32, i32, i32
  }
}

module attributes {stable_mosaic.version = 11 : i64} {
  func.func @_conv3_kernel(%arg0: i32, %arg1: memref<512x4xbf16, #tpu.memory_space<vmem>>, %arg2: memref<1x4xf32, #tpu.memory_space<vmem>>, %arg3: memref<1x4xf32, #tpu.memory_space<vmem>>, %arg4: memref<4x16xbf16, #tpu.memory_space<vmem>>, %arg5: memref<512x16xbf16, #tpu.memory_space<vmem>>, %arg6: memref<1x2x16xf32, #tpu.memory_space<vmem>>) attributes {dimension_semantics = [#tpu.dimension_semantics<parallel>], iteration_bounds = array<i64: 1>, scalar_prefetch = 0 : i64, scratch_operands = 0 : i64, tpu.core_type = #tpu.core_type<tc>, window_params = [{transform_indices = @transform_0, window_bounds = array<i64: 512, 4>}, {pipeline_mode = #tpu.pipeline_mode<synchronous>, transform_indices = @transform_1, window_bounds = array<i64: 1, 4>}, {pipeline_mode = #tpu.pipeline_mode<synchronous>, transform_indices = @transform_2, window_bounds = array<i64: 1, 4>}, {pipeline_mode = #tpu.pipeline_mode<synchronous>, transform_indices = @transform_3, window_bounds = array<i64: 4, 16>}, {transform_indices = @transform_4, window_bounds = array<i64: 512, 16>}, {transform_indices = @transform_5, window_bounds = array<i64: 1, 2, 16>}]} {
    %c0 = arith.constant 0 : index
    %c0_0 = arith.constant 0 : index
    %0 = vector.load %arg1[%c0, %c0_0] : memref<512x4xbf16, #tpu.memory_space<vmem>>, vector<512x4xbf16>
    %1 = arith.extf %0 : vector<512x4xbf16> to vector<512x4xf32>
    %c0_1 = arith.constant 0 : index
    %c0_2 = arith.constant 0 : index
    %2 = vector.load %arg2[%c0_1, %c0_2] : memref<1x4xf32, #tpu.memory_space<vmem>>, vector<1x4xf32>
    %3 = vector.broadcast %2 : vector<1x4xf32> to vector<512x4xf32>
    %4 = arith.mulf %1, %3 : vector<512x4xf32>
    %c0_3 = arith.constant 0 : index
    %c0_4 = arith.constant 0 : index
    %5 = vector.load %arg3[%c0_3, %c0_4] : memref<1x4xf32, #tpu.memory_space<vmem>>, vector<1x4xf32>
    %6 = vector.broadcast %5 : vector<1x4xf32> to vector<512x4xf32>
    %7 = arith.addf %4, %6 : vector<512x4xf32>
    %cst = arith.constant 0.000000e+00 : f32
    %8 = vector.broadcast %cst : f32 to vector<512x4xf32>
    %9 = arith.maximumf %7, %8 : vector<512x4xf32>
    %10 = arith.truncf %9 : vector<512x4xf32> to vector<512x4xbf16>
    %c0_5 = arith.constant 0 : index
    %c0_6 = arith.constant 0 : index
    %11 = vector.load %arg4[%c0_5, %c0_6] : memref<4x16xbf16, #tpu.memory_space<vmem>>, vector<4x16xbf16>
    %cst_7 = arith.constant dense<0.000000e+00> : vector<512x16xf32>
    %12 = tpu.matmul %10, %11, %cst_7 {dimension_numbers = #tpu.dot_dimension_numbers<[1], [0], [0], [1], [0, 0, 1, 1], [], []>} : vector<512x4xbf16>, vector<4x16xbf16>, vector<512x16xf32> -> vector<512x16xf32>
    %13 = arith.truncf %12 : vector<512x16xf32> to vector<512x16xbf16>
    %c0_8 = arith.constant 0 : index
    %c0_9 = arith.constant 0 : index
    %14 = vector.load %arg5[%c0_8, %c0_9] : memref<512x16xbf16, #tpu.memory_space<vmem>>, vector<512x16xbf16>
    tpu.vector_store %arg5[%c0_8, %c0_9], %13 {strides = array<i32>} : memref<512x16xbf16, #tpu.memory_space<vmem>>, vector<512x16xbf16>,
    %cst_10 = arith.constant dense<0.000000e+00> : vector<16xf32>
    %15 = vector.multi_reduction <add>, %12, %cst_10 [0] : vector<512x16xf32> to vector<16xf32>
    %16 = vector.shape_cast %15 : vector<16xf32> to vector<1x16xf32>
    %17 = arith.mulf %12, %12 : vector<512x16xf32>
    %cst_11 = arith.constant dense<0.000000e+00> : vector<16xf32>
    %18 = vector.multi_reduction <add>, %17, %cst_11 [0] : vector<512x16xf32> to vector<16xf32>
    %19 = vector.shape_cast %18 : vector<16xf32> to vector<1x16xf32>
    %20 = tpu.concatenate %16, %19 in 0 : vector<1x16xf32>, vector<1x16xf32> -> vector<2x16xf32>
    %21 = vector.shape_cast %20 : vector<2x16xf32> to vector<1x2x16xf32>
    %c0_12 = arith.constant 0 : index
    %c0_13 = arith.constant 0 : index
    %c0_14 = arith.constant 0 : index
    %22 = vector.load %arg6[%c0_12, %c0_13, %c0_14] : memref<1x2x16xf32, #tpu.memory_space<vmem>>, vector<1x2x16xf32>
    tpu.vector_store %arg6[%c0_12, %c0_13, %c0_14], %21 {strides = array<i32>} : memref<1x2x16xf32, #tpu.memory_space<vmem>>, vector<1x2x16xf32>,
    return
  }
  func.func @transform_0(%arg0: i32) -> (i32, i32) {
    %c0_i32 = arith.constant 0 : i32
    %c0_i32_0 = arith.constant 0 : i32
    return %arg0, %c0_i32 : i32, i32
  }
  func.func @transform_1(%arg0: i32) -> (i32, i32) {
    %c0_i32 = arith.constant 0 : i32
    %c0_i32_0 = arith.constant 0 : i32
    %c0_i32_1 = arith.constant 0 : i32
    return %c0_i32, %c0_i32_0 : i32, i32
  }
  func.func @transform_2(%arg0: i32) -> (i32, i32) {
    %c0_i32 = arith.constant 0 : i32
    %c0_i32_0 = arith.constant 0 : i32
    %c0_i32_1 = arith.constant 0 : i32
    return %c0_i32, %c0_i32_0 : i32, i32
  }
  func.func @transform_3(%arg0: i32) -> (i32, i32) {
    %c0_i32 = arith.constant 0 : i32
    %c0_i32_0 = arith.constant 0 : i32
    %c0_i32_1 = arith.constant 0 : i32
    return %c0_i32, %c0_i32_0 : i32, i32
  }
  func.func @transform_4(%arg0: i32) -> (i32, i32) {
    %c0_i32 = arith.constant 0 : i32
    %c0_i32_0 = arith.constant 0 : i32
    return %arg0, %c0_i32 : i32, i32
  }
  func.func @transform_5(%arg0: i32) -> (i32, i32, i32) {
    %c0_i32 = arith.constant 0 : i32
    %c0_i32_0 = arith.constant 0 : i32
    %c0_i32_1 = arith.constant 0 : i32
    return %arg0, %c0_i32, %c0_i32_0 : i32, i32, i32
  }
}

module attributes {stable_mosaic.version = 11 : i64} {
  func.func @_conv2_kernel(%arg0: i32, %arg1: i32, %arg2: memref<1x1x16x4xbf16, #tpu.memory_space<vmem>>, %arg3: memref<1x8x16x4xbf16, #tpu.memory_space<vmem>>, %arg4: memref<1x1x16x4xbf16, #tpu.memory_space<vmem>>, %arg5: memref<1x4xf32, #tpu.memory_space<vmem>>, %arg6: memref<1x4xf32, #tpu.memory_space<vmem>>, %arg7: memref<9x4x4xbf16, #tpu.memory_space<vmem>>, %arg8: memref<1x128x4xbf16, #tpu.memory_space<vmem>>, %arg9: memref<1x1x2x4xf32, #tpu.memory_space<vmem>>) attributes {dimension_semantics = [#tpu.dimension_semantics<parallel>, #tpu.dimension_semantics<parallel>], iteration_bounds = array<i64: 2, 2>, scalar_prefetch = 0 : i64, scratch_operands = 0 : i64, tpu.core_type = #tpu.core_type<tc>, window_params = [{transform_indices = @transform_0, window_bounds = array<i64: 1, 1, 16, 4>}, {transform_indices = @transform_1, window_bounds = array<i64: 1, 8, 16, 4>}, {transform_indices = @transform_2, window_bounds = array<i64: 1, 1, 16, 4>}, {pipeline_mode = #tpu.pipeline_mode<synchronous>, transform_indices = @transform_3, window_bounds = array<i64: 1, 4>}, {pipeline_mode = #tpu.pipeline_mode<synchronous>, transform_indices = @transform_4, window_bounds = array<i64: 1, 4>}, {pipeline_mode = #tpu.pipeline_mode<synchronous>, transform_indices = @transform_5, window_bounds = array<i64: 9, 4, 4>}, {transform_indices = @transform_6, window_bounds = array<i64: 1, 128, 4>}, {transform_indices = @transform_7, window_bounds = array<i64: 1, 1, 2, 4>}]} {
    %c0 = arith.constant 0 : index
    %c0_0 = arith.constant 0 : index
    %0 = vector.load %arg5[%c0, %c0_0] : memref<1x4xf32, #tpu.memory_space<vmem>>, vector<1x4xf32>
    %1 = vector.shape_cast %0 : vector<1x4xf32> to vector<1x1x4xf32>
    %c0_1 = arith.constant 0 : index
    %c0_2 = arith.constant 0 : index
    %2 = vector.load %arg6[%c0_1, %c0_2] : memref<1x4xf32, #tpu.memory_space<vmem>>, vector<1x4xf32>
    %3 = vector.shape_cast %2 : vector<1x4xf32> to vector<1x1x4xf32>
    %c0_3 = arith.constant 0 : index
    %c0_4 = arith.constant 0 : index
    %c0_5 = arith.constant 0 : index
    %c0_6 = arith.constant 0 : index
    %4 = vector.load %arg3[%c0_3, %c0_4, %c0_5, %c0_6] : memref<1x8x16x4xbf16, #tpu.memory_space<vmem>>, vector<1x8x16x4xbf16>
    %5 = vector.shape_cast %4 : vector<1x8x16x4xbf16> to vector<8x16x4xbf16>
    %6 = arith.extf %5 : vector<8x16x4xbf16> to vector<8x16x4xf32>
    %7 = vector.broadcast %1 : vector<1x1x4xf32> to vector<8x16x4xf32>
    %8 = arith.mulf %6, %7 : vector<8x16x4xf32>
    %9 = vector.broadcast %3 : vector<1x1x4xf32> to vector<8x16x4xf32>
    %10 = arith.addf %8, %9 : vector<8x16x4xf32>
    %cst = arith.constant 0.000000e+00 : f32
    %11 = vector.broadcast %cst : f32 to vector<8x16x4xf32>
    %12 = arith.maximumf %10, %11 : vector<8x16x4xf32>
    %c0_7 = arith.constant 0 : index
    %c0_8 = arith.constant 0 : index
    %c0_9 = arith.constant 0 : index
    %c0_10 = arith.constant 0 : index
    %13 = vector.load %arg2[%c0_7, %c0_8, %c0_9, %c0_10] : memref<1x1x16x4xbf16, #tpu.memory_space<vmem>>, vector<1x1x16x4xbf16>
    %14 = vector.shape_cast %13 : vector<1x1x16x4xbf16> to vector<1x16x4xbf16>
    %15 = arith.extf %14 : vector<1x16x4xbf16> to vector<1x16x4xf32>
    %16 = vector.broadcast %1 : vector<1x1x4xf32> to vector<1x16x4xf32>
    %17 = arith.mulf %15, %16 : vector<1x16x4xf32>
    %18 = vector.broadcast %3 : vector<1x1x4xf32> to vector<1x16x4xf32>
    %19 = arith.addf %17, %18 : vector<1x16x4xf32>
    %cst_11 = arith.constant 0.000000e+00 : f32
    %20 = vector.broadcast %cst_11 : f32 to vector<1x16x4xf32>
    %21 = arith.maximumf %19, %20 : vector<1x16x4xf32>
    %c0_i32 = arith.constant 0 : i32
    %22 = arith.cmpi sgt, %arg1, %c0_i32 : i32
    %23 = arith.extui %22 : i1 to i32
    %24 = arith.sitofp %23 : i32 to f32
    %25 = vector.broadcast %24 : f32 to vector<1x16x4xf32>
    %26 = arith.mulf %21, %25 : vector<1x16x4xf32>
    %c0_12 = arith.constant 0 : index
    %c0_13 = arith.constant 0 : index
    %c0_14 = arith.constant 0 : index
    %c0_15 = arith.constant 0 : index
    %27 = vector.load %arg4[%c0_12, %c0_13, %c0_14, %c0_15] : memref<1x1x16x4xbf16, #tpu.memory_space<vmem>>, vector<1x1x16x4xbf16>
    %28 = vector.shape_cast %27 : vector<1x1x16x4xbf16> to vector<1x16x4xbf16>
    %29 = arith.extf %28 : vector<1x16x4xbf16> to vector<1x16x4xf32>
    %30 = vector.broadcast %1 : vector<1x1x4xf32> to vector<1x16x4xf32>
    %31 = arith.mulf %29, %30 : vector<1x16x4xf32>
    %32 = vector.broadcast %3 : vector<1x1x4xf32> to vector<1x16x4xf32>
    %33 = arith.addf %31, %32 : vector<1x16x4xf32>
    %cst_16 = arith.constant 0.000000e+00 : f32
    %34 = vector.broadcast %cst_16 : f32 to vector<1x16x4xf32>
    %35 = arith.maximumf %33, %34 : vector<1x16x4xf32>
    %c1_i32 = arith.constant 1 : i32
    %36 = arith.cmpi slt, %arg1, %c1_i32 : i32
    %37 = arith.extui %36 : i1 to i32
    %38 = arith.sitofp %37 : i32 to f32
    %39 = vector.broadcast %38 : f32 to vector<1x16x4xf32>
    %40 = arith.mulf %35, %39 : vector<1x16x4xf32>
    %41 = tpu.concatenate %26, %12, %40 in 0 : vector<1x16x4xf32>, vector<8x16x4xf32>, vector<1x16x4xf32> -> vector<10x16x4xf32>
    %cst_17 = arith.constant 0.000000e+00 : f32
    %42 = vector.broadcast %cst_17 : f32 to vector<10x1x4xf32>
    %43 = tpu.concatenate %42, %41, %42 in 1 : vector<10x1x4xf32>, vector<10x16x4xf32>, vector<10x1x4xf32> -> vector<10x18x4xf32>
    %cst_18 = arith.constant 0.000000e+00 : f32
    %44 = vector.broadcast %cst_18 : f32 to vector<128x4xf32>
    %45 = vector.extract_strided_slice %43 {offsets = [0, 0, 0], sizes = [8, 16, 4], strides = [1, 1, 1]} : vector<10x18x4xf32> to vector<8x16x4xf32>
    %46 = vector.shape_cast %45 : vector<8x16x4xf32> to vector<128x4xf32>
    %47 = arith.truncf %46 : vector<128x4xf32> to vector<128x4xbf16>
    %c0_19 = arith.constant 0 : index
    %c0_20 = arith.constant 0 : index
    %c0_21 = arith.constant 0 : index
    %48 = vector.load %arg7[%c0_19, %c0_20, %c0_21] : memref<9x4x4xbf16, #tpu.memory_space<vmem>>, vector<1x4x4xbf16>
    %49 = vector.shape_cast %48 : vector<1x4x4xbf16> to vector<4x4xbf16>
    %cst_22 = arith.constant dense<0.000000e+00> : vector<128x4xf32>
    %50 = tpu.matmul %47, %49, %cst_22 {dimension_numbers = #tpu.dot_dimension_numbers<[1], [0], [0], [1], [0, 0, 1, 1], [], []>} : vector<128x4xbf16>, vector<4x4xbf16>, vector<128x4xf32> -> vector<128x4xf32>
    %51 = arith.addf %44, %50 : vector<128x4xf32>
    %52 = vector.extract_strided_slice %43 {offsets = [0, 1, 0], sizes = [8, 16, 4], strides = [1, 1, 1]} : vector<10x18x4xf32> to vector<8x16x4xf32>
    %53 = vector.shape_cast %52 : vector<8x16x4xf32> to vector<128x4xf32>
    %54 = arith.truncf %53 : vector<128x4xf32> to vector<128x4xbf16>
    %c1 = arith.constant 1 : index
    %c0_23 = arith.constant 0 : index
    %c0_24 = arith.constant 0 : index
    %55 = vector.load %arg7[%c1, %c0_23, %c0_24] : memref<9x4x4xbf16, #tpu.memory_space<vmem>>, vector<1x4x4xbf16>
    %56 = vector.shape_cast %55 : vector<1x4x4xbf16> to vector<4x4xbf16>
    %cst_25 = arith.constant dense<0.000000e+00> : vector<128x4xf32>
    %57 = tpu.matmul %54, %56, %cst_25 {dimension_numbers = #tpu.dot_dimension_numbers<[1], [0], [0], [1], [0, 0, 1, 1], [], []>} : vector<128x4xbf16>, vector<4x4xbf16>, vector<128x4xf32> -> vector<128x4xf32>
    %58 = arith.addf %51, %57 : vector<128x4xf32>
    %59 = vector.extract_strided_slice %43 {offsets = [0, 2, 0], sizes = [8, 16, 4], strides = [1, 1, 1]} : vector<10x18x4xf32> to vector<8x16x4xf32>
    %60 = vector.shape_cast %59 : vector<8x16x4xf32> to vector<128x4xf32>
    %61 = arith.truncf %60 : vector<128x4xf32> to vector<128x4xbf16>
    %c2 = arith.constant 2 : index
    %c0_26 = arith.constant 0 : index
    %c0_27 = arith.constant 0 : index
    %62 = vector.load %arg7[%c2, %c0_26, %c0_27] : memref<9x4x4xbf16, #tpu.memory_space<vmem>>, vector<1x4x4xbf16>
    %63 = vector.shape_cast %62 : vector<1x4x4xbf16> to vector<4x4xbf16>
    %cst_28 = arith.constant dense<0.000000e+00> : vector<128x4xf32>
    %64 = tpu.matmul %61, %63, %cst_28 {dimension_numbers = #tpu.dot_dimension_numbers<[1], [0], [0], [1], [0, 0, 1, 1], [], []>} : vector<128x4xbf16>, vector<4x4xbf16>, vector<128x4xf32> -> vector<128x4xf32>
    %65 = arith.addf %58, %64 : vector<128x4xf32>
    %66 = vector.extract_strided_slice %43 {offsets = [1, 0, 0], sizes = [8, 16, 4], strides = [1, 1, 1]} : vector<10x18x4xf32> to vector<8x16x4xf32>
    %67 = vector.shape_cast %66 : vector<8x16x4xf32> to vector<128x4xf32>
    %68 = arith.truncf %67 : vector<128x4xf32> to vector<128x4xbf16>
    %c3 = arith.constant 3 : index
    %c0_29 = arith.constant 0 : index
    %c0_30 = arith.constant 0 : index
    %69 = vector.load %arg7[%c3, %c0_29, %c0_30] : memref<9x4x4xbf16, #tpu.memory_space<vmem>>, vector<1x4x4xbf16>
    %70 = vector.shape_cast %69 : vector<1x4x4xbf16> to vector<4x4xbf16>
    %cst_31 = arith.constant dense<0.000000e+00> : vector<128x4xf32>
    %71 = tpu.matmul %68, %70, %cst_31 {dimension_numbers = #tpu.dot_dimension_numbers<[1], [0], [0], [1], [0, 0, 1, 1], [], []>} : vector<128x4xbf16>, vector<4x4xbf16>, vector<128x4xf32> -> vector<128x4xf32>
    %72 = arith.addf %65, %71 : vector<128x4xf32>
    %73 = vector.extract_strided_slice %43 {offsets = [1, 1, 0], sizes = [8, 16, 4], strides = [1, 1, 1]} : vector<10x18x4xf32> to vector<8x16x4xf32>
    %74 = vector.shape_cast %73 : vector<8x16x4xf32> to vector<128x4xf32>
    %75 = arith.truncf %74 : vector<128x4xf32> to vector<128x4xbf16>
    %c4 = arith.constant 4 : index
    %c0_32 = arith.constant 0 : index
    %c0_33 = arith.constant 0 : index
    %76 = vector.load %arg7[%c4, %c0_32, %c0_33] : memref<9x4x4xbf16, #tpu.memory_space<vmem>>, vector<1x4x4xbf16>
    %77 = vector.shape_cast %76 : vector<1x4x4xbf16> to vector<4x4xbf16>
    %cst_34 = arith.constant dense<0.000000e+00> : vector<128x4xf32>
    %78 = tpu.matmul %75, %77, %cst_34 {dimension_numbers = #tpu.dot_dimension_numbers<[1], [0], [0], [1], [0, 0, 1, 1], [], []>} : vector<128x4xbf16>, vector<4x4xbf16>, vector<128x4xf32> -> vector<128x4xf32>
    %79 = arith.addf %72, %78 : vector<128x4xf32>
    %80 = vector.extract_strided_slice %43 {offsets = [1, 2, 0], sizes = [8, 16, 4], strides = [1, 1, 1]} : vector<10x18x4xf32> to vector<8x16x4xf32>
    %81 = vector.shape_cast %80 : vector<8x16x4xf32> to vector<128x4xf32>
    %82 = arith.truncf %81 : vector<128x4xf32> to vector<128x4xbf16>
    %c5 = arith.constant 5 : index
    %c0_35 = arith.constant 0 : index
    %c0_36 = arith.constant 0 : index
    %83 = vector.load %arg7[%c5, %c0_35, %c0_36] : memref<9x4x4xbf16, #tpu.memory_space<vmem>>, vector<1x4x4xbf16>
    %84 = vector.shape_cast %83 : vector<1x4x4xbf16> to vector<4x4xbf16>
    %cst_37 = arith.constant dense<0.000000e+00> : vector<128x4xf32>
    %85 = tpu.matmul %82, %84, %cst_37 {dimension_numbers = #tpu.dot_dimension_numbers<[1], [0], [0], [1], [0, 0, 1, 1], [], []>} : vector<128x4xbf16>, vector<4x4xbf16>, vector<128x4xf32> -> vector<128x4xf32>
    %86 = arith.addf %79, %85 : vector<128x4xf32>
    %87 = vector.extract_strided_slice %43 {offsets = [2, 0, 0], sizes = [8, 16, 4], strides = [1, 1, 1]} : vector<10x18x4xf32> to vector<8x16x4xf32>
    %88 = vector.shape_cast %87 : vector<8x16x4xf32> to vector<128x4xf32>
    %89 = arith.truncf %88 : vector<128x4xf32> to vector<128x4xbf16>
    %c6 = arith.constant 6 : index
    %c0_38 = arith.constant 0 : index
    %c0_39 = arith.constant 0 : index
    %90 = vector.load %arg7[%c6, %c0_38, %c0_39] : memref<9x4x4xbf16, #tpu.memory_space<vmem>>, vector<1x4x4xbf16>
    %91 = vector.shape_cast %90 : vector<1x4x4xbf16> to vector<4x4xbf16>
    %cst_40 = arith.constant dense<0.000000e+00> : vector<128x4xf32>
    %92 = tpu.matmul %89, %91, %cst_40 {dimension_numbers = #tpu.dot_dimension_numbers<[1], [0], [0], [1], [0, 0, 1, 1], [], []>} : vector<128x4xbf16>, vector<4x4xbf16>, vector<128x4xf32> -> vector<128x4xf32>
    %93 = arith.addf %86, %92 : vector<128x4xf32>
    %94 = vector.extract_strided_slice %43 {offsets = [2, 1, 0], sizes = [8, 16, 4], strides = [1, 1, 1]} : vector<10x18x4xf32> to vector<8x16x4xf32>
    %95 = vector.shape_cast %94 : vector<8x16x4xf32> to vector<128x4xf32>
    %96 = arith.truncf %95 : vector<128x4xf32> to vector<128x4xbf16>
    %c7 = arith.constant 7 : index
    %c0_41 = arith.constant 0 : index
    %c0_42 = arith.constant 0 : index
    %97 = vector.load %arg7[%c7, %c0_41, %c0_42] : memref<9x4x4xbf16, #tpu.memory_space<vmem>>, vector<1x4x4xbf16>
    %98 = vector.shape_cast %97 : vector<1x4x4xbf16> to vector<4x4xbf16>
    %cst_43 = arith.constant dense<0.000000e+00> : vector<128x4xf32>
    %99 = tpu.matmul %96, %98, %cst_43 {dimension_numbers = #tpu.dot_dimension_numbers<[1], [0], [0], [1], [0, 0, 1, 1], [], []>} : vector<128x4xbf16>, vector<4x4xbf16>, vector<128x4xf32> -> vector<128x4xf32>
    %100 = arith.addf %93, %99 : vector<128x4xf32>
    %101 = vector.extract_strided_slice %43 {offsets = [2, 2, 0], sizes = [8, 16, 4], strides = [1, 1, 1]} : vector<10x18x4xf32> to vector<8x16x4xf32>
    %102 = vector.shape_cast %101 : vector<8x16x4xf32> to vector<128x4xf32>
    %103 = arith.truncf %102 : vector<128x4xf32> to vector<128x4xbf16>
    %c8 = arith.constant 8 : index
    %c0_44 = arith.constant 0 : index
    %c0_45 = arith.constant 0 : index
    %104 = vector.load %arg7[%c8, %c0_44, %c0_45] : memref<9x4x4xbf16, #tpu.memory_space<vmem>>, vector<1x4x4xbf16>
    %105 = vector.shape_cast %104 : vector<1x4x4xbf16> to vector<4x4xbf16>
    %cst_46 = arith.constant dense<0.000000e+00> : vector<128x4xf32>
    %106 = tpu.matmul %103, %105, %cst_46 {dimension_numbers = #tpu.dot_dimension_numbers<[1], [0], [0], [1], [0, 0, 1, 1], [], []>} : vector<128x4xbf16>, vector<4x4xbf16>, vector<128x4xf32> -> vector<128x4xf32>
    %107 = arith.addf %100, %106 : vector<128x4xf32>
    %108 = arith.truncf %107 : vector<128x4xf32> to vector<128x4xbf16>
    %c0_47 = arith.constant 0 : index
    %c0_48 = arith.constant 0 : index
    %c0_49 = arith.constant 0 : index
    %109 = vector.load %arg8[%c0_47, %c0_48, %c0_49] : memref<1x128x4xbf16, #tpu.memory_space<vmem>>, vector<1x128x4xbf16>
    %110 = vector.shape_cast %109 : vector<1x128x4xbf16> to vector<128x4xbf16>
    %111 = vector.shape_cast %108 : vector<128x4xbf16> to vector<1x128x4xbf16>
    tpu.vector_store %arg8[%c0_47, %c0_48, %c0_49], %111 {strides = array<i32>} : memref<1x128x4xbf16, #tpu.memory_space<vmem>>, vector<1x128x4xbf16>,
    %cst_50 = arith.constant dense<0.000000e+00> : vector<4xf32>
    %112 = vector.multi_reduction <add>, %107, %cst_50 [0] : vector<128x4xf32> to vector<4xf32>
    %113 = vector.shape_cast %112 : vector<4xf32> to vector<1x4xf32>
    %114 = arith.mulf %107, %107 : vector<128x4xf32>
    %cst_51 = arith.constant dense<0.000000e+00> : vector<4xf32>
    %115 = vector.multi_reduction <add>, %114, %cst_51 [0] : vector<128x4xf32> to vector<4xf32>
    %116 = vector.shape_cast %115 : vector<4xf32> to vector<1x4xf32>
    %117 = tpu.concatenate %113, %116 in 0 : vector<1x4xf32>, vector<1x4xf32> -> vector<2x4xf32>
    %118 = vector.shape_cast %117 : vector<2x4xf32> to vector<1x1x2x4xf32>
    %c0_52 = arith.constant 0 : index
    %c0_53 = arith.constant 0 : index
    %c0_54 = arith.constant 0 : index
    %c0_55 = arith.constant 0 : index
    %119 = vector.load %arg9[%c0_52, %c0_53, %c0_54, %c0_55] : memref<1x1x2x4xf32, #tpu.memory_space<vmem>>, vector<1x1x2x4xf32>
    tpu.vector_store %arg9[%c0_52, %c0_53, %c0_54, %c0_55], %118 {strides = array<i32>} : memref<1x1x2x4xf32, #tpu.memory_space<vmem>>, vector<1x1x2x4xf32>,
    return
  }
  func.func @transform_0(%arg0: i32, %arg1: i32) -> (i32, i32, i32, i32) {
    %c8_i32 = arith.constant 8 : i32
    %0 = arith.muli %arg1, %c8_i32 : i32
    %c1_i32 = arith.constant 1 : i32
    %1 = arith.subi %0, %c1_i32 : i32
    %c0_i32 = arith.constant 0 : i32
    %2 = arith.maxsi %1, %c0_i32 : i32
    %c0_i32_0 = arith.constant 0 : i32
    %c0_i32_1 = arith.constant 0 : i32
    %c0_i32_2 = arith.constant 0 : i32
    return %arg0, %2, %c0_i32_0, %c0_i32_1 : i32, i32, i32, i32
  }
  func.func @transform_1(%arg0: i32, %arg1: i32) -> (i32, i32, i32, i32) {
    %c0_i32 = arith.constant 0 : i32
    %c0_i32_0 = arith.constant 0 : i32
    %c0_i32_1 = arith.constant 0 : i32
    return %arg0, %arg1, %c0_i32, %c0_i32_0 : i32, i32, i32, i32
  }
  func.func @transform_2(%arg0: i32, %arg1: i32) -> (i32, i32, i32, i32) {
    %c1_i32 = arith.constant 1 : i32
    %0 = arith.addi %arg1, %c1_i32 : i32
    %c8_i32 = arith.constant 8 : i32
    %1 = arith.muli %0, %c8_i32 : i32
    %c15_i32 = arith.constant 15 : i32
    %2 = arith.minsi %1, %c15_i32 : i32
    %c0_i32 = arith.constant 0 : i32
    %c0_i32_0 = arith.constant 0 : i32
    %c0_i32_1 = arith.constant 0 : i32
    return %arg0, %2, %c0_i32, %c0_i32_0 : i32, i32, i32, i32
  }
  func.func @transform_3(%arg0: i32, %arg1: i32) -> (i32, i32) {
    %c0_i32 = arith.constant 0 : i32
    %c0_i32_0 = arith.constant 0 : i32
    %c0_i32_1 = arith.constant 0 : i32
    return %c0_i32, %c0_i32_0 : i32, i32
  }
  func.func @transform_4(%arg0: i32, %arg1: i32) -> (i32, i32) {
    %c0_i32 = arith.constant 0 : i32
    %c0_i32_0 = arith.constant 0 : i32
    %c0_i32_1 = arith.constant 0 : i32
    return %c0_i32, %c0_i32_0 : i32, i32
  }
  func.func @transform_5(%arg0: i32, %arg1: i32) -> (i32, i32, i32) {
    %c0_i32 = arith.constant 0 : i32
    %c0_i32_0 = arith.constant 0 : i32
    %c0_i32_1 = arith.constant 0 : i32
    %c0_i32_2 = arith.constant 0 : i32
    return %c0_i32, %c0_i32_0, %c0_i32_1 : i32, i32, i32
  }
  func.func @transform_6(%arg0: i32, %arg1: i32) -> (i32, i32, i32) {
    %c0_i32 = arith.constant 0 : i32
    %c0_i32_0 = arith.constant 0 : i32
    return %arg0, %arg1, %c0_i32 : i32, i32, i32
  }
  func.func @transform_7(%arg0: i32, %arg1: i32) -> (i32, i32, i32, i32) {
    %c0_i32 = arith.constant 0 : i32
    %c0_i32_0 = arith.constant 0 : i32
    %c0_i32_1 = arith.constant 0 : i32
    return %arg0, %arg1, %c0_i32, %c0_i32_0 : i32, i32, i32, i32
  }
}

module attributes {stable_mosaic.version = 11 : i64} {
  func.func @_finalize_kernel(%arg0: i32, %arg1: memref<32x256xbf16, #tpu.memory_space<vmem>>, %arg2: memref<32x256xf32, #tpu.memory_space<vmem>>, %arg3: memref<1x256xf32, #tpu.memory_space<vmem>>, %arg4: memref<1x256xf32, #tpu.memory_space<vmem>>, %arg5: memref<32x256xf32, #tpu.memory_space<vmem>>) attributes {dimension_semantics = [#tpu.dimension_semantics<parallel>], iteration_bounds = array<i64: 1>, scalar_prefetch = 0 : i64, scratch_operands = 0 : i64, tpu.core_type = #tpu.core_type<tc>, window_params = [{transform_indices = @transform_0, window_bounds = array<i64: 32, 256>}, {transform_indices = @transform_1, window_bounds = array<i64: 32, 256>}, {pipeline_mode = #tpu.pipeline_mode<synchronous>, transform_indices = @transform_2, window_bounds = array<i64: 1, 256>}, {pipeline_mode = #tpu.pipeline_mode<synchronous>, transform_indices = @transform_3, window_bounds = array<i64: 1, 256>}, {transform_indices = @transform_4, window_bounds = array<i64: 32, 256>}]} {
    %c0 = arith.constant 0 : index
    %c0_0 = arith.constant 0 : index
    %0 = vector.load %arg1[%c0, %c0_0] : memref<32x256xbf16, #tpu.memory_space<vmem>>, vector<32x256xbf16>
    %1 = arith.extf %0 : vector<32x256xbf16> to vector<32x256xf32>
    %c0_1 = arith.constant 0 : index
    %c0_2 = arith.constant 0 : index
    %2 = vector.load %arg3[%c0_1, %c0_2] : memref<1x256xf32, #tpu.memory_space<vmem>>, vector<1x256xf32>
    %3 = vector.broadcast %2 : vector<1x256xf32> to vector<32x256xf32>
    %4 = arith.mulf %1, %3 : vector<32x256xf32>
    %c0_3 = arith.constant 0 : index
    %c0_4 = arith.constant 0 : index
    %5 = vector.load %arg4[%c0_3, %c0_4] : memref<1x256xf32, #tpu.memory_space<vmem>>, vector<1x256xf32>
    %6 = vector.broadcast %5 : vector<1x256xf32> to vector<32x256xf32>
    %7 = arith.addf %4, %6 : vector<32x256xf32>
    %c0_5 = arith.constant 0 : index
    %c0_6 = arith.constant 0 : index
    %8 = vector.load %arg2[%c0_5, %c0_6] : memref<32x256xf32, #tpu.memory_space<vmem>>, vector<32x256xf32>
    %9 = arith.addf %7, %8 : vector<32x256xf32>
    %cst = arith.constant 0.000000e+00 : f32
    %10 = vector.broadcast %cst : f32 to vector<32x256xf32>
    %11 = arith.maximumf %9, %10 : vector<32x256xf32>
    %c0_7 = arith.constant 0 : index
    %c0_8 = arith.constant 0 : index
    %12 = vector.load %arg5[%c0_7, %c0_8] : memref<32x256xf32, #tpu.memory_space<vmem>>, vector<32x256xf32>
    tpu.vector_store %arg5[%c0_7, %c0_8], %11 {strides = array<i32>} : memref<32x256xf32, #tpu.memory_space<vmem>>, vector<32x256xf32>,
    return
  }
  func.func @transform_0(%arg0: i32) -> (i32, i32) {
    %c0_i32 = arith.constant 0 : i32
    %c0_i32_0 = arith.constant 0 : i32
    return %arg0, %c0_i32 : i32, i32
  }
  func.func @transform_1(%arg0: i32) -> (i32, i32) {
    %c0_i32 = arith.constant 0 : i32
    %c0_i32_0 = arith.constant 0 : i32
    return %arg0, %c0_i32 : i32, i32
  }
  func.func @transform_2(%arg0: i32) -> (i32, i32) {
    %c0_i32 = arith.constant 0 : i32
    %c0_i32_0 = arith.constant 0 : i32
    %c0_i32_1 = arith.constant 0 : i32
    return %c0_i32, %c0_i32_0 : i32, i32
  }
  func.func @transform_3(%arg0: i32) -> (i32, i32) {
    %c0_i32 = arith.constant 0 : i32
    %c0_i32_0 = arith.constant 0 : i32
    %c0_i32_1 = arith.constant 0 : i32
    return %c0_i32, %c0_i32_0 : i32, i32
  }
  func.func @transform_4(%arg0: i32) -> (i32, i32) {
    %c0_i32 = arith.constant 0 : i32
    %c0_i32_0 = arith.constant 0 : i32
    return %arg0, %c0_i32 : i32, i32
  }
}

</mosaic_0001>

<bundles_post_ra>
// kernel: expansion_resblock_nhwc.4
= control target key start
LH: loop header
LB: loop body
LE: loop exit
PB: predicated region body
PF: predicated region fallthrough
CT: control target
= control target key end

     0   :  { %9 = vsyncpa [#allocation3], 0  ;;  %s1471_s12 = smov [#allocation2]   ;;  %s2143_s0 = inlined_call_operand.hbm [shape: f32[512,16], index: 0, kind: input, shape index: {}]   ;;  %s2144_s1 = inlined_call_operand.vmem [shape: bf16[16,4], index: 1, kind: input, shape index: {}]   ;;  %s2145_s2 = inlined_call_operand.vmem [shape: bf16[512,4], index: 2, kind: output, shape index: {0}]   ;;  %s2146_s3 = inlined_call_operand.vmem [shape: f32[1,2,4], index: 3, kind: output, shape index: {1}]  }
   0x1   :  { %s15_s13 = sshll.u32 %s1471_s12, 4  ;;  %s16_s13 = int_to_ptr.vmem [resolvable:$true] %s15_s13 }
   0x2   :  { %s1457_s14 = scalar_lea.vmem %s16_s13, 8192  ;;  %p1462_p1 = scmp.lt.s32.totalorder %s16_s13, %s16_s13 }
   0x3   :  { %p1458_p0 = scmp.ne.s32.totalorder %s16_s13, %s1457_s14  ;;  %p1463_p2 = scmp.lt.s32.totalorder %s1457_s14, %s1457_s14 }
   0x5   :  { %p1464_p3 = por %p1463_p2, %p1462_p1 }
   0x7   :  { %p1465_p4 = pnand %p1464_p3, %p1458_p0 }
   0x9   :  { %1468 = shalt.err (!%p1465_p4)
}
   0xa   :  { %s1472_s15 = smov 128   ;;  %s1473_s16 = smov 8  }
   0xb   :  { %21 = dma.hbm_to_vmem [thread:$0]  %s2143_s0, 8192, %s16_s13, [#allocation3], %s1472_s15, %s1472_s15, %s1473_s16  }
   0xc   :  { %1469 = dma.done.wait [#allocation3], 8192  }
   0xd   :  { %1470 = vsyncadd [#allocation3], 4294959104  ;;  %v1448_v0 = vld [vmem:[%s2144_s1] sm:$0xff]   ;;  %v29_v2 = vld [vmem:[#allocation2 + $0x8] sm:$0xff]  ;;  %vm132_vm0 = vcmask 130048   ;;  %vm774_vm1 = vcmask 27648  }
   0xe   :  { %v28_v1 = vld [vmem:[#allocation2] sm:$0xff]  ;;  %v30_v3 = vld [vmem:[#allocation2 + $0x10] sm:$0xff]  ;;  %1377 = vmatprep.subr.bf16.mxu0 %v1448_v0  ;;  %v31_v5 = vld [vmem:[#allocation2 + $0x18] sm:$0xff]  ;;  %1443 = vmatprep.subr.bf16.mxu1 %v1448_v0  ;;  %vm839_vm2 = vcmask 31744   ;;  %vm1170_vm3 = vcmask 1040384   ;;  %vm1172_vm4 = vcmask 25600  }
   0xf   :  { %v92_v4 = vpack.c.bf16 %v29_v2, %v28_v1  ;;  %v32_v6 = vld [vmem:[#allocation2 + $0x20] sm:$0xff]  ;;  %v33_v7 = vld [vmem:[#allocation2 + $0x28] sm:$0xff]  ;;  %1378 = vmatpush3.bf16.msra.mxu0 %v1448_v0  ;;  %v93_v8 = vpack.c.bf16 %v31_v5, %v30_v3  ;;  %1444 = vmatpush3.bf16.msra.mxu1 %v1448_v0  ;;  %v34_v10 = vld [vmem:[#allocation2 + $0x30] sm:$0xff] }
  0x10   :  { %v94_v9 = vpack.c.bf16 %v33_v7, %v32_v6  ;;  %v35_v11 = vld [vmem:[#allocation2 + $0x38] sm:$0xff]  ;;  %v36_v12 = vld [vmem:[#allocation2 + $0x40] sm:$0xff]  ;;  %v37_v13 = vld [vmem:[#allocation2 + $0x48] sm:$0xff] }
  0x11   :  { %1379 = vmatprep.mubr.msk.bf16.mxu0 %vm132_vm0, %v92_v4  ;;  %v95_v14 = vpack.c.bf16 %v35_v11, %v34_v10  ;;  %v96_v15 = vpack.c.bf16 %v37_v13, %v36_v12  ;;  %v60_v16 = vld [vmem:[#allocation2 + $0x100] sm:$0xff]  ;;  %v61_v17 = vld [vmem:[#allocation2 + $0x108] sm:$0xff]  ;;  %v62_v18 = vld [vmem:[#allocation2 + $0x110] sm:$0xff] }
  0x12   :  { %1380 = vmatmul.mubr.msk.bf16.vlgmr.msra.gmra.mxu0 %vm132_vm0, %v93_v8  ;;  %v63_v19 = vld [vmem:[#allocation2 + $0x118] sm:$0xff]  ;;  %v108_v20 = vpack.c.bf16 %v61_v17, %v60_v16  ;;  %v64_v22 = vld [vmem:[#allocation2 + $0x120] sm:$0xff]  ;;  %v65_v23 = vld [vmem:[#allocation2 + $0x128] sm:$0xff] }
  0x13   :  { %1383 = vmatprep.mubr.msk.bf16.mxu0 %vm132_vm0, %v94_v9  ;;  %v109_v21 = vpack.c.bf16 %v63_v19, %v62_v18  ;;  %v110_v24 = vpack.c.bf16 %v65_v23, %v64_v22  ;;  %v38_v25 = vld [vmem:[#allocation2 + $0x50] sm:$0xff]  ;;  %v39_v26 = vld [vmem:[#allocation2 + $0x58] sm:$0xff]  ;;  %v40_v27 = vld [vmem:[#allocation2 + $0x60] sm:$0xff] }
  0x14   :  { %1411 = vmatprep.mubr.msk.bf16.mxu1 %vm132_vm0, %v108_v20  ;;  %v41_v28 = vld [vmem:[#allocation2 + $0x68] sm:$0xff]  ;;  %v66_v29 = vld [vmem:[#allocation2 + $0x130] sm:$0xff]  ;;  %v67_v30 = vld [vmem:[#allocation2 + $0x138] sm:$0xff]  ;;  %v97_v31 = vpack.c.bf16 %v39_v26, %v38_v25 }
  0x15   :  { %1412 = vmatmul.mubr.msk.bf16.vlgmr.msra.gmra.mxu1 %vm132_vm0, %v109_v21  ;;  %v68_v32 = vld [vmem:[#allocation2 + $0x140] sm:$0xff]  ;;  %v69_v33 = vld [vmem:[#allocation2 + $0x148] sm:$0xff]  ;;  %v98_v34 = vpack.c.bf16 %v41_v28, %v40_v27  ;;  %v111_v35 = vpack.c.bf16 %v67_v30, %v66_v29  ;;  %v42_v37 = vld [vmem:[#allocation2 + $0x70] sm:$0xff] }
  0x16   :  { %1415 = vmatprep.mubr.msk.bf16.mxu1 %vm132_vm0, %v110_v24  ;;  %v112_v36 = vpack.c.bf16 %v69_v33, %v68_v32  ;;  %v43_v38 = vld [vmem:[#allocation2 + $0x78] sm:$0xff]  ;;  %v44_v39 = vld [vmem:[#allocation2 + $0x80] sm:$0xff]  ;;  %v45_v40 = vld [vmem:[#allocation2 + $0x88] sm:$0xff] }
  0x17   :  { %v70_v41 = vld [vmem:[#allocation2 + $0x150] sm:$0xff]  ;;  %v71_v42 = vld [vmem:[#allocation2 + $0x158] sm:$0xff]  ;;  %v99_v43 = vpack.c.bf16 %v43_v38, %v42_v37  ;;  %v72_v44 = vld [vmem:[#allocation2 + $0x160] sm:$0xff]  ;;  %v100_v46 = vpack.c.bf16 %v45_v40, %v44_v39 }
  0x18   :  { %v73_v45 = vld [vmem:[#allocation2 + $0x168] sm:$0xff]  ;;  %v113_v47 = vpack.c.bf16 %v71_v42, %v70_v41  ;;  %v46_v49 = vld [vmem:[#allocation2 + $0x90] sm:$0xff]  ;;  %v47_v50 = vld [vmem:[#allocation2 + $0x98] sm:$0xff] }
  0x19   :  { %v114_v48 = vpack.c.bf16 %v73_v45, %v72_v44  ;;  %v48_v51 = vld [vmem:[#allocation2 + $0xa0] sm:$0xff]  ;;  %v49_v52 = vld [vmem:[#allocation2 + $0xa8] sm:$0xff]  ;;  %v74_v53 = vld [vmem:[#allocation2 + $0x170] sm:$0xff]  ;;  %v101_v55 = vpack.c.bf16 %v47_v50, %v46_v49 }
  0x1a   :  { %1384 = vmatmul.mubr.msk.bf16.gmra.mxu0 %vm132_vm0, %v95_v14  ;;  %v75_v54 = vld [vmem:[#allocation2 + $0x178] sm:$0xff]  ;;  %v76_v56 = vld [vmem:[#allocation2 + $0x180] sm:$0xff]  ;;  %v77_v57 = vld [vmem:[#allocation2 + $0x188] sm:$0xff]  ;;  %v102_v58 = vpack.c.bf16 %v49_v52, %v48_v51 }
  0x1b   :  { %1387 = vmatprep.mubr.msk.bf16.mxu0 %vm132_vm0, %v96_v15  ;;  %v115_v59 = vpack.c.bf16 %v75_v54, %v74_v53  ;;  %v116_v60 = vpack.c.bf16 %v77_v57, %v76_v56  ;;  %v50_v61 = vld [vmem:[#allocation2 + $0xb0] sm:$0xff]  ;;  %v51_v62 = vld [vmem:[#allocation2 + $0xb8] sm:$0xff]  ;;  %v52_v63 = vld [vmem:[#allocation2 + $0xc0] sm:$0xff] }
  0x1c   :  { %v53_v0 = vld [vmem:[#allocation2 + $0xc8] sm:$0xff]  ;;  %v78_v1 = vld [vmem:[#allocation2 + $0x190] sm:$0xff]  ;;  %v79_v2 = vld [vmem:[#allocation2 + $0x198] sm:$0xff]  ;;  %v103_v3 = vpack.c.bf16 %v51_v62, %v50_v61 }
  0x1d   :  { %1416 = vmatmul.mubr.msk.bf16.gmra.mxu1 %vm132_vm0, %v111_v35  ;;  %v80_v4 = vld [vmem:[#allocation2 + $0x1a0] sm:$0xff]  ;;  %v81_v5 = vld [vmem:[#allocation2 + $0x1a8] sm:$0xff]  ;;  %v104_v6 = vpack.c.bf16 %v53_v0, %v52_v63  ;;  %v117_v7 = vpack.c.bf16 %v79_v2, %v78_v1  ;;  %v54_v9 = vld [vmem:[#allocation2 + $0xd0] sm:$0xff] }
  0x1e   :  { %1419 = vmatprep.mubr.msk.bf16.mxu1 %vm132_vm0, %v112_v36  ;;  %v118_v8 = vpack.c.bf16 %v81_v5, %v80_v4  ;;  %v55_v10 = vld [vmem:[#allocation2 + $0xd8] sm:$0xff]  ;;  %v56_v11 = vld [vmem:[#allocation2 + $0xe0] sm:$0xff]  ;;  %v57_v12 = vld [vmem:[#allocation2 + $0xe8] sm:$0xff] }
  0x1f   :  { %v82_v13 = vld [vmem:[#allocation2 + $0x1b0] sm:$0xff]  ;;  %v83_v14 = vld [vmem:[#allocation2 + $0x1b8] sm:$0xff]  ;;  %v105_v15 = vpack.c.bf16 %v55_v10, %v54_v9  ;;  %v84_v16 = vld [vmem:[#allocation2 + $0x1c0] sm:$0xff]  ;;  %v106_v18 = vpack.c.bf16 %v57_v12, %v56_v11 }
  0x20   :  { %v85_v17 = vld [vmem:[#allocation2 + $0x1c8] sm:$0xff]  ;;  %v119_v19 = vpack.c.bf16 %v83_v14, %v82_v13  ;;  %v58_v21 = vld [vmem:[#allocation2 + $0xf0] sm:$0xff]  ;;  %v59_v22 = vld [vmem:[#allocation2 + $0xf8] sm:$0xff] }
  0x21   :  { %v120_v20 = vpack.c.bf16 %v85_v17, %v84_v16  ;;  %v86_v23 = vld [vmem:[#allocation2 + $0x1d0] sm:$0xff]  ;;  %v87_v24 = vld [vmem:[#allocation2 + $0x1d8] sm:$0xff]  ;;  %v107_v25 = vpack.c.bf16 %v59_v22, %v58_v21  ;;  %v88_v26 = vld [vmem:[#allocation2 + $0x1e0] sm:$0xff] }
  0x22   :  { %1388 = vmatmul.mubr.msk.bf16.gmra.mxu0 %vm132_vm0, %v97_v31  ;;  %v89_v27 = vld [vmem:[#allocation2 + $0x1e8] sm:$0xff]  ;;  %v121_v28 = vpack.c.bf16 %v87_v24, %v86_v23  ;;  %v90_v30 = vld [vmem:[#allocation2 + $0x1f0] sm:$0xff]  ;;  %v91_v31 = vld [vmem:[#allocation2 + $0x1f8] sm:$0xff] }
  0x23   :  { %1391 = vmatprep.mubr.msk.bf16.mxu0 %vm132_vm0, %v98_v34  ;;  %v122_v29 = vpack.c.bf16 %v89_v27, %v88_v26  ;;  %v123_v32 = vpack.c.bf16 %v91_v31, %v90_v30 }
  0x25   :  { %1420 = vmatmul.mubr.msk.bf16.gmra.mxu1 %vm132_vm0, %v113_v47 }
  0x26   :  { %1423 = vmatprep.mubr.msk.bf16.mxu1 %vm132_vm0, %v114_v48 }
  0x2a   :  { %1392 = vmatmul.mubr.msk.bf16.gmra.mxu0 %vm132_vm0, %v99_v43 }
  0x2b   :  { %1395 = vmatprep.mubr.msk.bf16.mxu0 %vm132_vm0, %v100_v46 }
  0x2d   :  { %1424 = vmatmul.mubr.msk.bf16.gmra.mxu1 %vm132_vm0, %v115_v59 }
  0x2e   :  { %1427 = vmatprep.mubr.msk.bf16.mxu1 %vm132_vm0, %v116_v60 }
  0x32   :  { %1396 = vmatmul.mubr.msk.bf16.gmra.mxu0 %vm132_vm0, %v101_v55 }
  0x33   :  { %1399 = vmatprep.mubr.msk.bf16.mxu0 %vm132_vm0, %v102_v58 }
  0x35   :  { %1428 = vmatmul.mubr.msk.bf16.gmra.mxu1 %vm132_vm0, %v117_v7 }
  0x36   :  { %1431 = vmatprep.mubr.msk.bf16.mxu1 %vm132_vm0, %v118_v8 }
  0x3a   :  { %1400 = vmatmul.mubr.msk.bf16.gmra.mxu0 %vm132_vm0, %v103_v3 }
  0x3b   :  { %1403 = vmatprep.mubr.msk.bf16.mxu0 %vm132_vm0, %v104_v6 }
  0x3d   :  { %1432 = vmatmul.mubr.msk.bf16.gmra.mxu1 %vm132_vm0, %v119_v19 }
  0x3e   :  { %1435 = vmatprep.mubr.msk.bf16.mxu1 %vm132_vm0, %v120_v20 }
  0x42   :  { %1404 = vmatmul.mubr.msk.bf16.gmra.mxu0 %vm132_vm0, %v105_v15 }
  0x43   :  { %1407 = vmatprep.mubr.msk.bf16.mxu0 %vm132_vm0, %v106_v18 }
  0x45   :  { %1436 = vmatmul.mubr.msk.bf16.gmra.mxu1 %vm132_vm0, %v121_v28 }
  0x46   :  { %1439 = vmatprep.mubr.msk.bf16.mxu1 %vm132_vm0, %v122_v29 }
  0x4a   :  { %1408 = vmatmul.mubr.msk.bf16.gmra.mxu0 %vm132_vm0, %v107_v25 }
  0x4d   :  { %1440 = vmatmul.mubr.msk.bf16.gmra.mxu1 %vm132_vm0, %v123_v32 }
  0xd2   :  { %v1381_v33 = vpop.f32.mrf.mxu0 }
  0xd3   :  { %v1282_v34 = vpack.c.bf16 %v1381_v33, %v1381_v33  ;;  %v975_v40 = vmul.f32 %v1381_v33, %v1381_v33  ;;  %v843_v46 = vsel %vm839_vm2, %v1381_v33, 0.0 }
  0xd4   :  { %v263_v35 = vpop.f32.mrf.mxu0 }
  0xd5   :  { %777 = vst.msk [vmem:[%s2145_s2 + $0x8] sm:$0xf] %vm774_vm1, %v1282_v34  ;;  %v1280_v36 = vpack.c.bf16 %v263_v35, %v263_v35  ;;  %v973_v38 = vmul.f32 %v263_v35, %v263_v35  ;;  %v840_v42 = vsel %vm839_vm2, %v263_v35, 0.0  ;;  %v1553_v56 = vpop.f32.mrf.mxu1  ;;  %v1040_v57 = vsel %vm839_vm2, %v975_v40, 0.0 }
  0xd6   :  { %v1382_v37 = vpop.f32.mrf.mxu0  ;;  %v1314_v0 = vpack.c.bf16 %v1553_v56, %v1553_v56 }
  0xd7   :  { %775 = vst.msk [vmem:[%s2145_s2] sm:$0xf] %vm774_vm1, %v1280_v36  ;;  %v1283_v39 = vpack.c.bf16 %v1382_v37, %v1382_v37  ;;  %v1037_v49 = vsel %vm839_vm2, %v973_v38, 0.0  ;;  %v976_v50 = vmul.f32 %v1382_v37, %v1382_v37  ;;  %v845_v58 = vsel %vm839_vm2, %v1382_v37, 0.0  ;;  %v1563_v1 = vpop.f32.mrf.mxu1 }
  0xd8   :  { %v266_v41 = vpop.f32.mrf.mxu0  ;;  %809 = vst.msk [vmem:[%s2145_s2 + $0x88] sm:$0xf] %vm774_vm1, %v1314_v0  ;;  %v1312_v9 = vpack.c.bf16 %v1563_v1, %v1563_v1 }
  0xd9   :  { %778 = vst.msk [vmem:[%s2145_s2 + $0xc] sm:$0xf] %vm774_vm1, %v1283_v39  ;;  %v1281_v43 = vpack.c.bf16 %v266_v41, %v266_v41  ;;  %v841_v44 = vsel %vm839_vm2, %v266_v41, 0.0  ;;  %v974_v45 = vmul.f32 %v266_v41, %v266_v41  ;;  %v1042_v2 = vsel %vm839_vm2, %v976_v50, 0.0  ;;  %v1577_v10 = vpop.f32.mrf.mxu1 }
  0xda   :  { %v842_v47 = vadd.f32 %v841_v44, %v840_v42  ;;  %v1385_v48 = vpop.f32.mrf.mxu0  ;;  %807 = vst.msk [vmem:[%s2145_s2 + $0x80] sm:$0xf] %vm774_vm1, %v1312_v9  ;;  %v1315_v26 = vpack.c.bf16 %v1577_v10, %v1577_v10 }
  0xdb   :  { %776 = vst.msk [vmem:[%s2145_s2 + $0x4] sm:$0xf] %vm774_vm1, %v1281_v43  ;;  %v1038_v51 = vsel %vm839_vm2, %v974_v45, 0.0  ;;  %v1286_v52 = vpack.c.bf16 %v1385_v48, %v1385_v48  ;;  %v979_v5 = vmul.f32 %v1385_v48, %v1385_v48  ;;  %v1589_v18 = vpop.f32.mrf.mxu1  ;;  %v851_v19 = vsel %vm839_vm2, %v1385_v48, 0.0 }
  0xdc   :  { %v844_v53 = vadd.f32 %v843_v46, %v842_v47  ;;  %v1039_v54 = vadd.f32 %v1038_v51, %v1037_v49  ;;  %v279_v55 = vpop.f32.mrf.mxu0  ;;  %810 = vst.msk [vmem:[%s2145_s2 + $0x8c] sm:$0xf] %vm774_vm1, %v1315_v26  ;;  %v1313_v43 = vpack.c.bf16 %v1589_v18, %v1589_v18 }
  0xdd   :  { %781 = vst.msk [vmem:[%s2145_s2 + $0x18] sm:$0xf] %vm774_vm1, %v1286_v52  ;;  %v1284_v59 = vpack.c.bf16 %v279_v55, %v279_v55  ;;  %v977_v60 = vmul.f32 %v279_v55, %v279_v55  ;;  %v847_v3 = vsel %vm839_vm2, %v279_v55, 0.0  ;;  %v1599_v27 = vpop.f32.mrf.mxu1  ;;  %v1048_v28 = vsel %vm839_vm2, %v979_v5, 0.0 }
  0xde   :  { %v1041_v61 = vadd.f32 %v1040_v57, %v1039_v54  ;;  %v846_v62 = vadd.f32 %v845_v58, %v844_v53  ;;  %v1386_v63 = vpop.f32.mrf.mxu0  ;;  %808 = vst.msk [vmem:[%s2145_s2 + $0x84] sm:$0xf] %vm774_vm1, %v1313_v43 }
  0xdf   :  { %779 = vst.msk [vmem:[%s2145_s2 + $0x10] sm:$0xf] %vm774_vm1, %v1284_v59  ;;  %v1287_v4 = vpack.c.bf16 %v1386_v63, %v1386_v63  ;;  %v1044_v11 = vsel %vm839_vm2, %v977_v60, 0.0  ;;  %v980_v20 = vmul.f32 %v1386_v63, %v1386_v63  ;;  %v853_v29 = vsel %vm839_vm2, %v1386_v63, 0.0  ;;  %v1611_v35 = vpop.f32.mrf.mxu1 }
  0xe0   :  { %v848_v6 = vadd.f32 %v847_v3, %v846_v62  ;;  %v1043_v7 = vadd.f32 %v1042_v2, %v1041_v61  ;;  %v282_v8 = vpop.f32.mrf.mxu0  ;;  %v1318_v61 = vpack.c.bf16 %v1599_v27, %v1599_v27 }
  0xe1   :  { %782 = vst.msk [vmem:[%s2145_s2 + $0x1c] sm:$0xf] %vm774_vm1, %v1287_v4  ;;  %v1285_v12 = vpack.c.bf16 %v282_v8, %v282_v8  ;;  %v849_v13 = vsel %vm839_vm2, %v282_v8, 0.0  ;;  %v978_v14 = vmul.f32 %v282_v8, %v282_v8  ;;  %v1050_v36 = vsel %vm839_vm2, %v980_v20, 0.0  ;;  %v1621_v44 = vpop.f32.mrf.mxu1 }
  0xe2   :  { %v1045_v15 = vadd.f32 %v1044_v11, %v1043_v7  ;;  %v850_v16 = vadd.f32 %v849_v13, %v848_v6  ;;  %v1389_v17 = vpop.f32.mrf.mxu0  ;;  %813 = vst.msk [vmem:[%s2145_s2 + $0x98] sm:$0xf] %vm774_vm1, %v1318_v61 }
  0xe3   :  { %780 = vst.msk [vmem:[%s2145_s2 + $0x14] sm:$0xf] %vm774_vm1, %v1285_v12  ;;  %v1046_v21 = vsel %vm839_vm2, %v978_v14, 0.0  ;;  %v1290_v22 = vpack.c.bf16 %v1389_v17, %v1389_v17  ;;  %v983_v39 = vmul.f32 %v1389_v17, %v1389_v17  ;;  %v1633_v52 = vpop.f32.mrf.mxu1  ;;  %v859_v53 = vsel %vm839_vm2, %v1389_v17, 0.0 }
  0xe4   :  { %v852_v23 = vadd.f32 %v851_v19, %v850_v16  ;;  %v1047_v24 = vadd.f32 %v1046_v21, %v1045_v15  ;;  %v295_v25 = vpop.f32.mrf.mxu0  ;;  %v1316_v16 = vpack.c.bf16 %v1611_v35, %v1611_v35 }
  0xe5   :  { %785 = vst.msk [vmem:[%s2145_s2 + $0x28] sm:$0xf] %vm774_vm1, %v1290_v22  ;;  %v1288_v30 = vpack.c.bf16 %v295_v25, %v295_v25  ;;  %v981_v31 = vmul.f32 %v295_v25, %v295_v25  ;;  %v855_v37 = vsel %vm839_vm2, %v295_v25, 0.0  ;;  %v1643_v62 = vpop.f32.mrf.mxu1  ;;  %v1056_v63 = vsel %vm839_vm2, %v983_v39, 0.0 }
  0xe6   :  { %v1049_v32 = vadd.f32 %v1048_v28, %v1047_v24  ;;  %v854_v33 = vadd.f32 %v853_v29, %v852_v23  ;;  %v1390_v34 = vpop.f32.mrf.mxu0  ;;  %811 = vst.msk [vmem:[%s2145_s2 + $0x90] sm:$0xf] %vm774_vm1, %v1316_v16 }
  0xe7   :  { %783 = vst.msk [vmem:[%s2145_s2 + $0x20] sm:$0xf] %vm774_vm1, %v1288_v30  ;;  %v1291_v38 = vpack.c.bf16 %v1390_v34, %v1390_v34  ;;  %v1052_v45 = vsel %vm839_vm2, %v981_v31, 0.0  ;;  %v984_v54 = vmul.f32 %v1390_v34, %v1390_v34  ;;  %v861_v0 = vsel %vm839_vm2, %v1390_v34, 0.0  ;;  %v1655_v7 = vpop.f32.mrf.mxu1 }
  0xe8   :  { %v856_v40 = vadd.f32 %v855_v37, %v854_v33  ;;  %v1051_v41 = vadd.f32 %v1050_v36, %v1049_v32  ;;  %v298_v42 = vpop.f32.mrf.mxu0  ;;  %v1319_v36 = vpack.c.bf16 %v1621_v44, %v1621_v44 }
  0xe9   :  { %786 = vst.msk [vmem:[%s2145_s2 + $0x2c] sm:$0xf] %vm774_vm1, %v1291_v38  ;;  %v1289_v46 = vpack.c.bf16 %v298_v42, %v298_v42  ;;  %v857_v47 = vsel %vm839_vm2, %v298_v42, 0.0  ;;  %v982_v48 = vmul.f32 %v298_v42, %v298_v42  ;;  %v1058_v8 = vsel %vm839_vm2, %v984_v54, 0.0  ;;  %v1665_v17 = vpop.f32.mrf.mxu1 }
  0xea   :  { %v1053_v49 = vadd.f32 %v1052_v45, %v1051_v41  ;;  %v858_v50 = vadd.f32 %v857_v47, %v856_v40  ;;  %v1393_v51 = vpop.f32.mrf.mxu0  ;;  %814 = vst.msk [vmem:[%s2145_s2 + $0x9c] sm:$0xf] %vm774_vm1, %v1319_v36 }
  0xeb   :  { %784 = vst.msk [vmem:[%s2145_s2 + $0x24] sm:$0xf] %vm774_vm1, %v1289_v46  ;;  %v1054_v55 = vsel %vm839_vm2, %v982_v48, 0.0  ;;  %v1294_v57 = vpack.c.bf16 %v1393_v51, %v1393_v51  ;;  %v987_v12 = vmul.f32 %v1393_v51, %v1393_v51  ;;  %v1677_v26 = vpop.f32.mrf.mxu1  ;;  %v867_v28 = vsel %vm839_vm2, %v1393_v51, 0.0 }
  0xec   :  { %v860_v58 = vadd.f32 %v859_v53, %v858_v50  ;;  %v1055_v59 = vadd.f32 %v1054_v55, %v1053_v49  ;;  %v311_v60 = vpop.f32.mrf.mxu0  ;;  %v1317_v55 = vpack.c.bf16 %v1633_v52, %v1633_v52 }
  0xed   :  { %789 = vst.msk [vmem:[%s2145_s2 + $0x38] sm:$0xf] %vm774_vm1, %v1294_v57  ;;  %v1292_v2 = vpack.c.bf16 %v311_v60, %v311_v60  ;;  %v985_v3 = vmul.f32 %v311_v60, %v311_v60  ;;  %v863_v9 = vsel %vm839_vm2, %v311_v60, 0.0  ;;  %v1687_v37 = vpop.f32.mrf.mxu1  ;;  %v1064_v38 = vsel %vm839_vm2, %v987_v12, 0.0 }
  0xee   :  { %v1057_v4 = vadd.f32 %v1056_v63, %v1055_v59  ;;  %v862_v5 = vadd.f32 %v861_v0, %v860_v58  ;;  %v1394_v6 = vpop.f32.mrf.mxu0  ;;  %812 = vst.msk [vmem:[%s2145_s2 + $0x94] sm:$0xf] %vm774_vm1, %v1317_v55 }
  0xef   :  { %787 = vst.msk [vmem:[%s2145_s2 + $0x30] sm:$0xf] %vm774_vm1, %v1292_v2  ;;  %v1295_v11 = vpack.c.bf16 %v1394_v6, %v1394_v6  ;;  %v1060_v19 = vsel %vm839_vm2, %v985_v3, 0.0  ;;  %v988_v29 = vmul.f32 %v1394_v6, %v1394_v6  ;;  %v869_v39 = vsel %vm839_vm2, %v1394_v6, 0.0  ;;  %v1699_v46 = vpop.f32.mrf.mxu1 }
  0xf0   :  { %v864_v13 = vadd.f32 %v863_v9, %v862_v5  ;;  %v1059_v14 = vadd.f32 %v1058_v8, %v1057_v4  ;;  %v314_v15 = vpop.f32.mrf.mxu0 }
  0xf1   :  { %790 = vst.msk [vmem:[%s2145_s2 + $0x3c] sm:$0xf] %vm774_vm1, %v1295_v11  ;;  %v1293_v20 = vpack.c.bf16 %v314_v15, %v314_v15  ;;  %v865_v21 = vsel %vm839_vm2, %v314_v15, 0.0  ;;  %v986_v22 = vmul.f32 %v314_v15, %v314_v15  ;;  %v1066_v47 = vsel %vm839_vm2, %v988_v29, 0.0  ;;  %v1709_v57 = vpop.f32.mrf.mxu1 }
  0xf2   :  { %v1061_v23 = vadd.f32 %v1060_v19, %v1059_v14  ;;  %v866_v24 = vadd.f32 %v865_v21, %v864_v13  ;;  %v1397_v25 = vpop.f32.mrf.mxu0  ;;  %v1322_v13 = vpack.c.bf16 %v1643_v62, %v1643_v62 }
  0xf3   :  { %788 = vst.msk [vmem:[%s2145_s2 + $0x34] sm:$0xf] %vm774_vm1, %v1293_v20  ;;  %v1062_v30 = vsel %vm839_vm2, %v986_v22, 0.0  ;;  %v1298_v31 = vpack.c.bf16 %v1397_v25, %v1397_v25  ;;  %v991_v50 = vmul.f32 %v1397_v25, %v1397_v25  ;;  %v1721_v3 = vpop.f32.mrf.mxu1  ;;  %v875_v4 = vsel %vm839_vm2, %v1397_v25, 0.0 }
  0xf4   :  { %v868_v32 = vadd.f32 %v867_v28, %v866_v24  ;;  %v1063_v33 = vadd.f32 %v1062_v30, %v1061_v23  ;;  %v327_v34 = vpop.f32.mrf.mxu0  ;;  %817 = vst.msk [vmem:[%s2145_s2 + $0xa8] sm:$0xf] %vm774_vm1, %v1322_v13 }
  0xf5   :  { %793 = vst.msk [vmem:[%s2145_s2 + $0x48] sm:$0xf] %vm774_vm1, %v1298_v31  ;;  %v1296_v40 = vpack.c.bf16 %v327_v34, %v327_v34  ;;  %v989_v41 = vmul.f32 %v327_v34, %v327_v34  ;;  %v871_v48 = vsel %vm839_vm2, %v327_v34, 0.0  ;;  %v1731_v14 = vpop.f32.mrf.mxu1  ;;  %v1072_v15 = vsel %vm839_vm2, %v991_v50, 0.0 }
  0xf6   :  { %v1065_v42 = vadd.f32 %v1064_v38, %v1063_v33  ;;  %v870_v43 = vadd.f32 %v869_v39, %v868_v32  ;;  %v1398_v45 = vpop.f32.mrf.mxu0  ;;  %v1320_v34 = vpack.c.bf16 %v1655_v7, %v1655_v7 }
  0xf7   :  { %791 = vst.msk [vmem:[%s2145_s2 + $0x40] sm:$0xf] %vm774_vm1, %v1296_v40  ;;  %v1299_v49 = vpack.c.bf16 %v1398_v45, %v1398_v45  ;;  %v1068_v58 = vsel %vm839_vm2, %v989_v41, 0.0  ;;  %v992_v5 = vmul.f32 %v1398_v45, %v1398_v45  ;;  %v877_v16 = vsel %vm839_vm2, %v1398_v45, 0.0  ;;  %v1743_v24 = vpop.f32.mrf.mxu1 }
  0xf8   :  { %v872_v51 = vadd.f32 %v871_v48, %v870_v43  ;;  %v1067_v53 = vadd.f32 %v1066_v47, %v1065_v42  ;;  %v330_v54 = vpop.f32.mrf.mxu0  ;;  %815 = vst.msk [vmem:[%s2145_s2 + $0xa0] sm:$0xf] %vm774_vm1, %v1320_v34 }
  0xf9   :  { %794 = vst.msk [vmem:[%s2145_s2 + $0x4c] sm:$0xf] %vm774_vm1, %v1299_v49  ;;  %v1297_v59 = vpack.c.bf16 %v330_v54, %v330_v54  ;;  %v873_v60 = vsel %vm839_vm2, %v330_v54, 0.0  ;;  %v990_v61 = vmul.f32 %v330_v54, %v330_v54  ;;  %v1074_v25 = vsel %vm839_vm2, %v992_v5, 0.0  ;;  %v1753_v36 = vpop.f32.mrf.mxu1 }
  0xfa   :  { %v1069_v63 = vadd.f32 %v1068_v58, %v1067_v53  ;;  %v874_v0 = vadd.f32 %v873_v60, %v872_v51  ;;  %v1401_v2 = vpop.f32.mrf.mxu0  ;;  %v1323_v58 = vpack.c.bf16 %v1665_v17, %v1665_v17 }
  0xfb   :  { %792 = vst.msk [vmem:[%s2145_s2 + $0x44] sm:$0xf] %vm774_vm1, %v1297_v59  ;;  %v1070_v6 = vsel %vm839_vm2, %v990_v61, 0.0  ;;  %v1302_v8 = vpack.c.bf16 %v1401_v2, %v1401_v2  ;;  %v995_v30 = vmul.f32 %v1401_v2, %v1401_v2  ;;  %v1765_v47 = vpop.f32.mrf.mxu1  ;;  %v883_v48 = vsel %vm839_vm2, %v1401_v2, 0.0 }
  0xfc   :  { %v876_v9 = vadd.f32 %v875_v4, %v874_v0  ;;  %v1071_v11 = vadd.f32 %v1070_v6, %v1069_v63  ;;  %v343_v12 = vpop.f32.mrf.mxu0  ;;  %818 = vst.msk [vmem:[%s2145_s2 + $0xac] sm:$0xf] %vm774_vm1, %v1323_v58 }
  0xfd   :  { %797 = vst.msk [vmem:[%s2145_s2 + $0x58] sm:$0xf] %vm774_vm1, %v1302_v8  ;;  %v1300_v19 = vpack.c.bf16 %v343_v12, %v343_v12  ;;  %v993_v20 = vmul.f32 %v343_v12, %v343_v12  ;;  %v879_v28 = vsel %vm839_vm2, %v343_v12, 0.0  ;;  %v1775_v59 = vpop.f32.mrf.mxu1  ;;  %v1080_v60 = vsel %vm839_vm2, %v995_v30, 0.0 }
  0xfe   :  { %v1073_v21 = vadd.f32 %v1072_v15, %v1071_v11  ;;  %v878_v22 = vadd.f32 %v877_v16, %v876_v9  ;;  %v1402_v23 = vpop.f32.mrf.mxu0 }
  0xff   :  { %795 = vst.msk [vmem:[%s2145_s2 + $0x50] sm:$0xf] %vm774_vm1, %v1300_v19  ;;  %v1303_v29 = vpack.c.bf16 %v1402_v23, %v1402_v23  ;;  %v1076_v38 = vsel %vm839_vm2, %v993_v20, 0.0  ;;  %v996_v49 = vmul.f32 %v1402_v23, %v1402_v23  ;;  %v885_v61 = vsel %vm839_vm2, %v1402_v23, 0.0  ;;  %v1787_v6 = vpop.f32.mrf.mxu1 }
 0x100   :  { %v880_v31 = vadd.f32 %v879_v28, %v878_v22  ;;  %v1075_v32 = vadd.f32 %v1074_v25, %v1073_v21  ;;  %v346_v33 = vpop.f32.mrf.mxu0  ;;  %v1321_v19 = vpack.c.bf16 %v1677_v26, %v1677_v26 }
 0x101   :  { %798 = vst.msk [vmem:[%s2145_s2 + $0x5c] sm:$0xf] %vm774_vm1, %v1303_v29  ;;  %v1301_v39 = vpack.c.bf16 %v346_v33, %v346_v33  ;;  %v881_v40 = vsel %vm839_vm2, %v346_v33, 0.0  ;;  %v994_v41 = vmul.f32 %v346_v33, %v346_v33  ;;  %v1082_v8 = vsel %vm839_vm2, %v996_v49, 0.0  ;;  %v1797_v20 = vpop.f32.mrf.mxu1 }
 0x102   :  { %v1077_v42 = vadd.f32 %v1076_v38, %v1075_v32  ;;  %v882_v43 = vadd.f32 %v881_v40, %v880_v31  ;;  %v1405_v45 = vpop.f32.mrf.mxu0  ;;  %816 = vst.msk [vmem:[%s2145_s2 + $0xa4] sm:$0xf] %vm774_vm1, %v1321_v19 }
 0x103   :  { %796 = vst.msk [vmem:[%s2145_s2 + $0x54] sm:$0xf] %vm774_vm1, %v1301_v39  ;;  %v1078_v50 = vsel %vm839_vm2, %v994_v41, 0.0  ;;  %v1306_v51 = vpack.c.bf16 %v1405_v45, %v1405_v45  ;;  %v999_v12 = vmul.f32 %v1405_v45, %v1405_v45  ;;  %v1809_v31 = vpop.f32.mrf.mxu1  ;;  %v891_v32 = vsel %vm839_vm2, %v1405_v45, 0.0 }
 0x104   :  { %v884_v53 = vadd.f32 %v883_v48, %v882_v43  ;;  %v1079_v54 = vadd.f32 %v1078_v50, %v1077_v42  ;;  %v359_v55 = vpop.f32.mrf.mxu0  ;;  %v1326_v42 = vpack.c.bf16 %v1687_v37, %v1687_v37 }
 0x105   :  { %801 = vst.msk [vmem:[%s2145_s2 + $0x68] sm:$0xf] %vm774_vm1, %v1306_v51  ;;  %v1304_v63 = vpack.c.bf16 %v359_v55, %v359_v55  ;;  %v997_v0 = vmul.f32 %v359_v55, %v359_v55  ;;  %v887_v9 = vsel %vm839_vm2, %v359_v55, 0.0  ;;  %v1819_v43 = vpop.f32.mrf.mxu1  ;;  %v1088_v48 = vsel %vm839_vm2, %v999_v12, 0.0 }
 0x106   :  { %v1081_v2 = vadd.f32 %v1080_v60, %v1079_v54  ;;  %v886_v4 = vadd.f32 %v885_v61, %v884_v53  ;;  %v1406_v5 = vpop.f32.mrf.mxu0  ;;  %821 = vst.msk [vmem:[%s2145_s2 + $0xb8] sm:$0xf] %vm774_vm1, %v1326_v42  ;;  %v903_v42 = vsel %vm839_vm2, %v1563_v1, 0.0 }
 0x107   :  { %799 = vst.msk [vmem:[%s2145_s2 + $0x60] sm:$0xf] %vm774_vm1, %v1304_v63  ;;  %v1307_v11 = vpack.c.bf16 %v1406_v5, %v1406_v5  ;;  %v1084_v21 = vsel %vm839_vm2, %v997_v0, 0.0  ;;  %v1000_v33 = vmul.f32 %v1406_v5, %v1406_v5  ;;  %v893_v45 = vsel %vm839_vm2, %v1406_v5, 0.0  ;;  %v1831_v55 = vpop.f32.mrf.mxu1 }
 0x108   :  { %v888_v13 = vadd.f32 %v887_v9, %v886_v4  ;;  %v1083_v15 = vadd.f32 %v1082_v8, %v1081_v2  ;;  %v362_v16 = vpop.f32.mrf.mxu0  ;;  %v1324_v5 = vpack.c.bf16 %v1699_v46, %v1699_v46 }
 0x109   :  { %802 = vst.msk [vmem:[%s2145_s2 + $0x6c] sm:$0xf] %vm774_vm1, %v1307_v11  ;;  %v1305_v22 = vpack.c.bf16 %v362_v16, %v362_v16  ;;  %v889_v23 = vsel %vm839_vm2, %v362_v16, 0.0  ;;  %v998_v25 = vmul.f32 %v362_v16, %v362_v16  ;;  %v1090_v58 = vsel %vm839_vm2, %v1000_v33, 0.0  ;;  %v1851_v16 = vpop.f32.mrf.mxu1 }
 0x10a   :  { %v1085_v28 = vadd.f32 %v1084_v21, %v1083_v15  ;;  %v890_v29 = vadd.f32 %v889_v23, %v888_v13  ;;  %v1409_v30 = vpop.f32.mrf.mxu0  ;;  %819 = vst.msk [vmem:[%s2145_s2 + $0xb0] sm:$0xf] %vm774_vm1, %v1324_v5  ;;  %v1327_v23 = vpack.c.bf16 %v1709_v57, %v1709_v57  ;;  %v1005_v33 = vmul.f32 %v1563_v1, %v1563_v1 }
 0x10b   :  { %800 = vst.msk [vmem:[%s2145_s2 + $0x64] sm:$0xf] %vm774_vm1, %v1305_v22  ;;  %v1086_v34 = vsel %vm839_vm2, %v998_v25, 0.0  ;;  %v1310_v38 = vpack.c.bf16 %v1409_v30, %v1409_v30  ;;  %v1003_v63 = vmul.f32 %v1409_v30, %v1409_v30  ;;  %v899_v19 = vsel %vm839_vm2, %v1409_v30, 0.0 }
 0x10c   :  { %v892_v39 = vadd.f32 %v891_v32, %v890_v29  ;;  %v1087_v40 = vadd.f32 %v1086_v34, %v1085_v28  ;;  %v375_v41 = vpop.f32.mrf.mxu0  ;;  %v1325_v29 = vpack.c.bf16 %v1721_v3, %v1721_v3  ;;  %822 = vst.msk [vmem:[%s2145_s2 + $0xbc] sm:$0xf] %vm774_vm1, %v1327_v23  ;;  %v1330_v34 = vpack.c.bf16 %v1731_v14, %v1731_v14 }
 0x10d   :  { %805 = vst.msk [vmem:[%s2145_s2 + $0x78] sm:$0xf] %vm774_vm1, %v1310_v38  ;;  %v1308_v49 = vpack.c.bf16 %v375_v41, %v375_v41  ;;  %v1001_v50 = vmul.f32 %v375_v41, %v375_v41  ;;  %v895_v60 = vsel %vm839_vm2, %v375_v41, 0.0  ;;  %v1096_v32 = vsel %vm839_vm2, %v1003_v63, 0.0 }
 0x10e   :  { %v1089_v51 = vadd.f32 %v1088_v48, %v1087_v40  ;;  %v894_v53 = vadd.f32 %v893_v45, %v892_v39  ;;  %v1410_v54 = vpop.f32.mrf.mxu0  ;;  %820 = vst.msk [vmem:[%s2145_s2 + $0xb4] sm:$0xf] %vm774_vm1, %v1325_v29  ;;  %v1877_v40 = vpop.f32.mrf.mxu1  ;;  %v1006_v48 = vmul.f32 %v1589_v18, %v1589_v18  ;;  %825 = vst.msk [vmem:[%s2145_s2 + $0xc8] sm:$0xf] %vm774_vm1, %v1330_v34  ;;  %v1100_v1 = vsel %vm839_vm2, %v1005_v33, 0.0 }
 0x10f   :  { %803 = vst.msk [vmem:[%s2145_s2 + $0x70] sm:$0xf] %vm774_vm1, %v1308_v49  ;;  %v1311_v61 = vpack.c.bf16 %v1410_v54, %v1410_v54  ;;  %v1092_v8 = vsel %vm839_vm2, %v1001_v50, 0.0  ;;  %v1004_v21 = vmul.f32 %v1410_v54, %v1410_v54  ;;  %v901_v30 = vsel %vm839_vm2, %v1410_v54, 0.0 }
 0x110   :  { %v896_v0 = vadd.f32 %v895_v60, %v894_v53  ;;  %v1091_v2 = vadd.f32 %v1090_v58, %v1089_v51  ;;  %v378_v4 = vpop.f32.mrf.mxu0  ;;  %v1328_v45 = vpack.c.bf16 %v1743_v24, %v1743_v24  ;;  %v1331_v51 = vpack.c.bf16 %v1753_v36, %v1753_v36  ;;  %v1907_v63 = vpop.f32.mrf.mxu1 }
 0x111   :  { %806 = vst.msk [vmem:[%s2145_s2 + $0x7c] sm:$0xf] %vm774_vm1, %v1311_v61  ;;  %v1309_v9 = vpack.c.bf16 %v378_v4, %v378_v4  ;;  %v897_v11 = vsel %vm839_vm2, %v378_v4, 0.0  ;;  %v1002_v12 = vmul.f32 %v378_v4, %v378_v4  ;;  %v1098_v41 = vsel %vm839_vm2, %v1004_v21, 0.0 }
 0x112   :  { %v1093_v13 = vadd.f32 %v1092_v8, %v1091_v2  ;;  %v898_v15 = vadd.f32 %v897_v11, %v896_v0  ;;  %v1007_v53 = vmul.f32 %v1553_v56, %v1553_v56  ;;  %v905_v54 = vsel %vm839_vm2, %v1589_v18, 0.0  ;;  %823 = vst.msk [vmem:[%s2145_s2 + $0xc0] sm:$0xf] %vm774_vm1, %v1328_v45  ;;  %826 = vst.msk [vmem:[%s2145_s2 + $0xcc] sm:$0xf] %vm774_vm1, %v1331_v51  ;;  %v1937_v21 = vpop.f32.mrf.mxu1 }
 0x113   :  { %804 = vst.msk [vmem:[%s2145_s2 + $0x74] sm:$0xf] %vm774_vm1, %v1309_v9  ;;  %v1094_v22 = vsel %vm839_vm2, %v1002_v12, 0.0  ;;  %v1329_v58 = vpack.c.bf16 %v1765_v47, %v1765_v47  ;;  %v907_v18 = vsel %vm839_vm2, %v1553_v56, 0.0  ;;  %v1008_v0 = vmul.f32 %v1577_v10, %v1577_v10 }
 0x114   :  { %v900_v25 = vadd.f32 %v899_v19, %v898_v15  ;;  %v1095_v28 = vadd.f32 %v1094_v22, %v1093_v13  ;;  %v1102_v2 = vsel %vm839_vm2, %v1006_v48, 0.0  ;;  %v1334_v4 = vpack.c.bf16 %v1775_v59, %v1775_v59 }
 0x115   :  { %824 = vst.msk [vmem:[%s2145_s2 + $0xc4] sm:$0xf] %vm774_vm1, %v1329_v58  ;;  %v1332_v9 = vpack.c.bf16 %v1787_v6, %v1787_v6  ;;  %v1104_v56 = vsel %vm839_vm2, %v1007_v53, 0.0  ;;  %v909_v11 = vsel %vm839_vm2, %v1577_v10, 0.0  ;;  %v1009_v12 = vmul.f32 %v1611_v35, %v1611_v35 }
 0x116   :  { %v902_v38 = vadd.f32 %v901_v30, %v900_v25  ;;  %v1097_v39 = vadd.f32 %v1096_v32, %v1095_v28  ;;  %829 = vst.msk [vmem:[%s2145_s2 + $0xd8] sm:$0xf] %vm774_vm1, %v1334_v4  ;;  %v1335_v13 = vpack.c.bf16 %v1797_v20, %v1797_v20  ;;  %v1106_v10 = vsel %vm839_vm2, %v1008_v0, 0.0 }
 0x117   :  { %827 = vst.msk [vmem:[%s2145_s2 + $0xd0] sm:$0xf] %vm774_vm1, %v1332_v9  ;;  %v911_v22 = vsel %vm839_vm2, %v1611_v35, 0.0  ;;  %v1010_v23 = vmul.f32 %v1633_v52, %v1633_v52  ;;  %v1333_v25 = vpack.c.bf16 %v1809_v31, %v1809_v31  ;;  %v1338_v32 = vpack.c.bf16 %v1819_v43, %v1819_v43 }
 0x118   :  { %v1099_v49 = vadd.f32 %v1098_v41, %v1097_v39  ;;  %v904_v50 = vadd.f32 %v903_v42, %v902_v38  ;;  %830 = vst.msk [vmem:[%s2145_s2 + $0xdc] sm:$0xf] %vm774_vm1, %v1335_v13  ;;  %v1011_v30 = vmul.f32 %v1599_v27, %v1599_v27  ;;  %v1108_v35 = vsel %vm839_vm2, %v1009_v12, 0.0  ;;  %v1967_v41 = vpop.f32.mrf.mxu1 }
 0x119   :  { %v913_v33 = vsel %vm839_vm2, %v1633_v52, 0.0  ;;  %828 = vst.msk [vmem:[%s2145_s2 + $0xd4] sm:$0xf] %vm774_vm1, %v1333_v25  ;;  %v1336_v34 = vpack.c.bf16 %v1831_v55, %v1831_v55  ;;  %833 = vst.msk [vmem:[%s2145_s2 + $0xe8] sm:$0xf] %vm774_vm1, %v1338_v32  ;;  %v915_v52 = vsel %vm839_vm2, %v1599_v27, 0.0  ;;  %v1012_v42 = vmul.f32 %v1621_v44, %v1621_v44 }
 0x11a   :  { %v906_v60 = vadd.f32 %v905_v54, %v904_v50  ;;  %v1101_v61 = vadd.f32 %v1100_v1, %v1099_v49  ;;  %v1110_v48 = vsel %vm839_vm2, %v1010_v23, 0.0  ;;  %v1339_v45 = vpack.c.bf16 %v1851_v16, %v1851_v16 }
 0x11b   :  { %831 = vst.msk [vmem:[%s2145_s2 + $0xe0] sm:$0xf] %vm774_vm1, %v1336_v34  ;;  %v1337_v51 = vpack.c.bf16 %v1877_v40, %v1877_v40  ;;  %v1112_v27 = vsel %vm839_vm2, %v1011_v30, 0.0  ;;  %v917_v53 = vsel %vm839_vm2, %v1621_v44, 0.0  ;;  %v1013_v1 = vmul.f32 %v1655_v7, %v1655_v7 }
 0x11c   :  { %v908_v5 = vadd.f32 %v907_v18, %v906_v60  ;;  %v1103_v8 = vadd.f32 %v1102_v2, %v1101_v61  ;;  %834 = vst.msk [vmem:[%s2145_s2 + $0xec] sm:$0xf] %vm774_vm1, %v1339_v45  ;;  %v1342_v54 = vpack.c.bf16 %v1907_v63, %v1907_v63  ;;  %v1997_v61 = vpop.f32.mrf.mxu1  ;;  %v1114_v44 = vsel %vm839_vm2, %v1012_v42, 0.0 }
 0x11d   :  { %832 = vst.msk [vmem:[%s2145_s2 + $0xe4] sm:$0xf] %vm774_vm1, %v1337_v51  ;;  %v919_v18 = vsel %vm839_vm2, %v1655_v7, 0.0  ;;  %v1014_v0 = vmul.f32 %v1677_v26, %v1677_v26  ;;  %v1340_v2 = vpack.c.bf16 %v1937_v21, %v1937_v21  ;;  %v1015_v9 = vmul.f32 %v1643_v62, %v1643_v62 }
 0x11e   :  { %v1105_v15 = vadd.f32 %v1104_v56, %v1103_v8  ;;  %v910_v19 = vadd.f32 %v909_v11, %v908_v5  ;;  %837 = vst.msk [vmem:[%s2145_s2 + $0xf8] sm:$0xf] %vm774_vm1, %v1342_v54  ;;  %v1343_v8 = vpack.c.bf16 %v1967_v41, %v1967_v41  ;;  %v1116_v7 = vsel %vm839_vm2, %v1013_v1, 0.0 }
 0x11f   :  { %v921_v56 = vsel %vm839_vm2, %v1677_v26, 0.0  ;;  %835 = vst.msk [vmem:[%s2145_s2 + $0xf0] sm:$0xf] %vm774_vm1, %v1340_v2  ;;  %v1341_v11 = vpack.c.bf16 %v1997_v61, %v1997_v61  ;;  %v1016_v26 = vmul.f32 %v1665_v17, %v1665_v17  ;;  %v1120_v23 = vsel %vm839_vm2, %v1015_v9, 0.0 }
 0x120   :  { %v912_v28 = vadd.f32 %v911_v22, %v910_v19  ;;  %v1107_v29 = vadd.f32 %v1106_v10, %v1105_v15  ;;  %838 = vst.msk [vmem:[%s2145_s2 + $0xfc] sm:$0xf] %vm774_vm1, %v1343_v8  ;;  %v923_v15 = vsel %vm839_vm2, %v1643_v62, 0.0  ;;  %v1118_v19 = vsel %vm839_vm2, %v1014_v0, 0.0 }
 0x121   :  { %836 = vst.msk [vmem:[%s2145_s2 + $0xf4] sm:$0xf] %vm774_vm1, %v1341_v11  ;;  %v925_v25 = vsel %vm839_vm2, %v1665_v17, 0.0  ;;  %v1017_v62 = vmul.f32 %v1699_v46, %v1699_v46  ;;  %v1122_v32 = vsel %vm839_vm2, %v1016_v26, 0.0  ;;  %v927_v30 = vsel %vm839_vm2, %v1699_v46, 0.0 }
 0x122   :  { %v1109_v38 = vadd.f32 %v1108_v35, %v1107_v29  ;;  %v914_v39 = vadd.f32 %v913_v33, %v912_v28  ;;  %v1018_v35 = vmul.f32 %v1721_v3, %v1721_v3  ;;  %v1020_v46 = vmul.f32 %v1709_v57, %v1709_v57 }
 0x123   :  { %v1124_v17 = vsel %vm839_vm2, %v1017_v62, 0.0  ;;  %v937_v0 = vsel %vm839_vm2, %v1765_v47, 0.0  ;;  %v941_v11 = vsel %vm839_vm2, %v1753_v36, 0.0  ;;  %v1026_v26 = vmul.f32 %v1809_v31, %v1809_v31 }
 0x124   :  { %v916_v49 = vadd.f32 %v915_v52, %v914_v39  ;;  %v1111_v50 = vadd.f32 %v1110_v48, %v1109_v38  ;;  %v1019_v38 = vmul.f32 %v1687_v37, %v1687_v37  ;;  %v929_v39 = vsel %vm839_vm2, %v1721_v3, 0.0 }
 0x125   :  { %v931_v48 = vsel %vm839_vm2, %v1687_v37, 0.0  ;;  %v1126_v45 = vsel %vm839_vm2, %v1018_v35, 0.0  ;;  %v1021_v3 = vmul.f32 %v1743_v24, %v1743_v24  ;;  %v1130_v54 = vsel %vm839_vm2, %v1020_v46, 0.0 }
 0x126   :  { %v1113_v58 = vadd.f32 %v1112_v27, %v1111_v50  ;;  %v918_v60 = vadd.f32 %v917_v53, %v916_v49  ;;  %v1128_v51 = vsel %vm839_vm2, %v1019_v38, 0.0  ;;  %v933_v27 = vsel %vm839_vm2, %v1709_v57, 0.0 }
 0x127   :  { %v935_v37 = vsel %vm839_vm2, %v1743_v24, 0.0  ;;  %v1132_v57 = vsel %vm839_vm2, %v1021_v3, 0.0  ;;  %v1024_v24 = vmul.f32 %v1753_v36, %v1753_v36  ;;  %v953_v46 = vsel %vm839_vm2, %v1877_v40, 0.0 }
 0x128   :  { %v920_v4 = vadd.f32 %v919_v18, %v918_v60  ;;  %v1115_v5 = vadd.f32 %v1114_v44, %v1113_v58  ;;  %v1022_v58 = vmul.f32 %v1765_v47, %v1765_v47  ;;  %v1023_v18 = vmul.f32 %v1731_v14, %v1731_v14 }
 0x129   :  { %v1025_v47 = vmul.f32 %v1787_v6, %v1787_v6 }
 0x12a   :  { %v1117_v12 = vadd.f32 %v1116_v7, %v1115_v5  ;;  %v922_v13 = vadd.f32 %v921_v56, %v920_v4  ;;  %v939_v5 = vsel %vm839_vm2, %v1731_v14, 0.0  ;;  %v1134_v8 = vsel %vm839_vm2, %v1022_v58, 0.0 }
 0x12b   :  { %v1136_v56 = vsel %vm839_vm2, %v1023_v18, 0.0  ;;  %v943_v14 = vsel %vm839_vm2, %v1787_v6, 0.0  ;;  %v1140_v36 = vsel %vm839_vm2, %v1025_v47, 0.0  ;;  %v1028_v6 = vmul.f32 %v1797_v20, %v1797_v20 }
 0x12c   :  { %v924_v10 = vadd.f32 %v923_v15, %v922_v13  ;;  %v1119_v22 = vadd.f32 %v1118_v19, %v1117_v12  ;;  %v1138_v15 = vsel %vm839_vm2, %v1024_v24, 0.0 }
 0x12e   :  { %v1121_v28 = vadd.f32 %v1120_v23, %v1119_v22  ;;  %v926_v29 = vadd.f32 %v925_v25, %v924_v10  ;;  %v1027_v22 = vmul.f32 %v1775_v59, %v1775_v59  ;;  %v945_v23 = vsel %vm839_vm2, %v1809_v31, 0.0 }
 0x12f   :  { %v1029_v31 = vmul.f32 %v1831_v55, %v1831_v55 }
 0x130   :  { %v928_v33 = vadd.f32 %v927_v30, %v926_v29  ;;  %v1123_v34 = vadd.f32 %v1122_v32, %v1121_v28  ;;  %v947_v28 = vsel %vm839_vm2, %v1775_v59, 0.0  ;;  %v1142_v29 = vsel %vm839_vm2, %v1026_v26, 0.0 }
 0x131   :  { %v1144_v35 = vsel %vm839_vm2, %v1027_v22, 0.0  ;;  %v951_v59 = vsel %vm839_vm2, %v1831_v55, 0.0  ;;  %v1032_v55 = vmul.f32 %v1851_v16, %v1851_v16 }
 0x132   :  { %v1125_v52 = vadd.f32 %v1124_v17, %v1123_v34  ;;  %v930_v42 = vadd.f32 %v929_v39, %v928_v33  ;;  %v949_v33 = vsel %vm839_vm2, %v1797_v20, 0.0  ;;  %v1146_v17 = vsel %vm839_vm2, %v1028_v6, 0.0 }
 0x133   :  { %v1030_v39 = vmul.f32 %v1877_v40, %v1877_v40  ;;  %v1148_v20 = vsel %vm839_vm2, %v1029_v31, 0.0  ;;  %v1033_v40 = vmul.f32 %v1937_v21, %v1937_v21  ;;  %v1154_v58 = vsel %vm839_vm2, %v1032_v55, 0.0 }
 0x134   :  { %v932_v49 = vadd.f32 %v931_v48, %v930_v42  ;;  %v1127_v50 = vadd.f32 %v1126_v45, %v1125_v52  ;;  %v1031_v48 = vmul.f32 %v1819_v43, %v1819_v43 }
 0x136   :  { %v1129_v53 = vadd.f32 %v1128_v51, %v1127_v50  ;;  %v934_v1 = vadd.f32 %v933_v27, %v932_v49  ;;  %v955_v50 = vsel %vm839_vm2, %v1819_v43, 0.0  ;;  %v1150_v51 = vsel %vm839_vm2, %v1030_v39, 0.0 }
 0x137   :  { %v959_v43 = vsel %vm839_vm2, %v1937_v21, 0.0  ;;  %v1036_v21 = vmul.f32 %v1967_v41, %v1967_v41 }
 0x138   :  { %v936_v60 = vadd.f32 %v935_v37, %v934_v1  ;;  %v1131_v44 = vadd.f32 %v1130_v54, %v1129_v53  ;;  %v1152_v53 = vsel %vm839_vm2, %v1031_v48, 0.0  ;;  %v957_v1 = vsel %vm839_vm2, %v1851_v16, 0.0 }
 0x139   :  { %v1156_v16 = vsel %vm839_vm2, %v1033_v40, 0.0 }
 0x13a   :  { %v1133_v2 = vadd.f32 %v1132_v57, %v1131_v44  ;;  %v938_v4 = vadd.f32 %v937_v0, %v936_v60  ;;  %v1034_v60 = vmul.f32 %v1997_v61, %v1997_v61  ;;  %v1035_v57 = vmul.f32 %v1907_v63, %v1907_v63 }
 0x13b   :  { %v961_v0 = vsel %vm839_vm2, %v1997_v61, 0.0  ;;  %v1162_v61 = vsel %vm839_vm2, %v1036_v21, 0.0 }
 0x13c   :  { %v940_v9 = vadd.f32 %v939_v5, %v938_v4  ;;  %v1135_v7 = vadd.f32 %v1134_v8, %v1133_v2  ;;  %v963_v5 = vsel %vm839_vm2, %v1907_v63, 0.0  ;;  %v1158_v24 = vsel %vm839_vm2, %v1034_v60, 0.0 }
 0x13e   :  { %v1137_v12 = vadd.f32 %v1136_v56, %v1135_v7  ;;  %v942_v13 = vadd.f32 %v941_v11, %v940_v9  ;;  %v1160_v7 = vsel %vm839_vm2, %v1035_v57, 0.0  ;;  %v965_v56 = vsel %vm839_vm2, %v1967_v41, 0.0 }
 0x140   :  { %v944_v19 = vadd.f32 %v943_v14, %v942_v13  ;;  %v1139_v10 = vadd.f32 %v1138_v15, %v1137_v12 }
 0x142   :  { %v1141_v25 = vadd.f32 %v1140_v36, %v1139_v10  ;;  %v946_v62 = vadd.f32 %v945_v23, %v944_v19 }
 0x144   :  { %v948_v32 = vadd.f32 %v947_v28, %v946_v62  ;;  %v1143_v30 = vadd.f32 %v1142_v29, %v1141_v25 }
 0x146   :  { %v1145_v34 = vadd.f32 %v1144_v35, %v1143_v30  ;;  %v950_v38 = vadd.f32 %v949_v33, %v948_v32 }
 0x148   :  { %v952_v52 = vadd.f32 %v951_v59, %v950_v38  ;;  %v1147_v42 = vadd.f32 %v1146_v17, %v1145_v34 }
 0x14a   :  { %v1149_v45 = vadd.f32 %v1148_v20, %v1147_v42  ;;  %v954_v49 = vadd.f32 %v953_v46, %v952_v52 }
 0x14c   :  { %v956_v27 = vadd.f32 %v955_v50, %v954_v49  ;;  %v1151_v3 = vadd.f32 %v1150_v51, %v1149_v45 }
 0x14e   :  { %v1153_v54 = vadd.f32 %v1152_v53, %v1151_v3  ;;  %v958_v37 = vadd.f32 %v957_v1, %v956_v27 }
 0x150   :  { %v960_v44 = vadd.f32 %v959_v43, %v958_v37  ;;  %v1155_v18 = vadd.f32 %v1154_v58, %v1153_v54 }
 0x152   :  { %v1157_v2 = vadd.f32 %v1156_v16, %v1155_v18  ;;  %v962_v4 = vadd.f32 %v961_v0, %v960_v44 }
 0x154   :  { %v964_v8 = vadd.f32 %v963_v5, %v962_v4  ;;  %v1159_v9 = vadd.f32 %v1158_v24, %v1157_v2 }
 0x156   :  { %v966_v11 = vadd.f32 %v965_v56, %v964_v8  ;;  %v1161_v47 = vadd.f32 %v1160_v7, %v1159_v9 }
 0x158   :  { %v967_v12 = vrot.slane %v966_v11, 4  ;;  %v1163_v13 = vadd.f32 %v1162_v61, %v1161_v47 }
 0x15a   :  { %v968_v15 = vadd.f32 %v967_v12, %v966_v11  ;;  %v1164_v63 = vrot.slane %v1163_v13, 4 }
 0x15c   :  { %v969_v14 = vrot.slane %v968_v15, 2  ;;  %v1165_v26 = vadd.f32 %v1164_v63, %v1163_v13 }
 0x15e   :  { %v970_v19 = vadd.f32 %v969_v14, %v968_v15  ;;  %v1166_v10 = vrot.slane %v1165_v26, 2 }
 0x160   :  { %v971_v22 = vrot.slane %v970_v19, 1  ;;  %v1167_v36 = vadd.f32 %v1166_v10, %v1165_v26 }
 0x162   :  { %v1168_v23 = vrot.slane %v1167_v36, 1  ;;  %v972_v25 = vadd.f32 %v971_v22, %v970_v19 }
 0x164   :  { %v1169_v62 = vadd.f32 %v1168_v23, %v1167_v36 }
 0x166   :  { %v1171_v41 = vsel %vm1170_vm3, %v972_v25, %v1169_v62 }
 0x167   :  { %1173 = vst.msk [vmem:[%s2146_s3] sm:$0x3] %vm1172_vm4, %v1171_v41 }
 0x168   :  { %1182 = vsyncpa [#allocation3], 1 }

// kernel: expansion_resblock_nhwc.6
= control target key start
LH: loop header
LB: loop body
LE: loop exit
PB: predicated region body
PF: predicated region fallthrough
CT: control target
= control target key end

     0   :  { %vm484_vm0 = vcmask 1041408   ;;  %vm387_vm1 = vcmask 31744   ;;  %vm1033_vm2 = vcmask 125952   ;;  %vm1098_vm3 = vcmask 130048   ;;  %s2809_s3 = inlined_call_operand.vmem [shape: bf16[4,16], index: 3, kind: input, shape index: {}]   ;;  %s2810_s0 = inlined_call_operand.vmem [shape: bf16[512,4], index: 0, kind: input, shape index: {}]   ;;  %s2811_s1 = inlined_call_operand.vmem [shape: f32[1,4], index: 1, kind: input, shape index: {}]   ;;  %s2812_s2 = inlined_call_operand.vmem [shape: f32[1,4], index: 2, kind: input, shape index: {}]   ;;  %s2813_s4 = inlined_call_operand.vmem [shape: bf16[512,16], index: 4, kind: output, shape index: {0}]   ;;  %s2814_s5 = inlined_call_operand.vmem [shape: f32[1,2,16], index: 5, kind: output, shape index: {1}]  }
   0x1   :  { %v386_v0 = vld [vmem:[%s2809_s3] sm:$0x3]  ;;  %v1731_v6 = vld [vmem:[%s2810_s0 + $0x8] sm:$0xff]   ;;  %v1732_v7 = vld [vmem:[%s2810_s0 + $0x10] sm:$0xff]   ;;  %vm1429_vm4 = vcmask 1040384   ;;  %vm1431_vm5 = vcmask 123904  }
   0x2   :  { %v1604_v1 = vld [vmem:[%s2810_s0] sm:$0xff]   ;;  %1863 = vmatprep.subr.msk.bf16.mxu0 %vm484_vm0, %v386_v0  ;;  %v486_v3 = vsel %vm484_vm0, %v386_v0, 0  ;;  %1864 = vmatprep.subr.msk.bf16.mxu1 %vm484_vm0, %v386_v0  ;;  %v1609_v9 = vunpack.c.l.bf16 %v1731_v6  ;;  %v1610_v10 = vunpack.c.h.bf16 %v1731_v6  ;;  %v1613_v11 = vunpack.c.l.bf16 %v1732_v7  ;;  %v1733_v13 = vld [vmem:[%s2810_s0 + $0x18] sm:$0xff]   ;;  %v1735_v35 = vld [vmem:[%s2810_s0 + $0x28] sm:$0xff]  }
   0x3   :  { %v1904_v2 = vld [vmem:[%s2811_s1] ss:$0 sm:$0xff]  ;;  %v1605_v4 = vunpack.c.l.bf16 %v1604_v1  ;;  %v1606_v5 = vunpack.c.h.bf16 %v1604_v1  ;;  %1796 = vmatpush3.bf16.msra.mxu0 %v486_v3  ;;  %v1614_v12 = vunpack.c.h.bf16 %v1732_v7  ;;  %1862 = vmatpush3.bf16.msra.mxu1 %v486_v3  ;;  %v1617_v16 = vunpack.c.l.bf16 %v1733_v13  ;;  %v1736_v40 = vld [vmem:[%s2810_s0 + $0x30] sm:$0xff]   ;;  %v1737_v51 = vld [vmem:[%s2810_s0 + $0x38] sm:$0xff]  }
   0x4   :  { %v1915_v8 = vld [vmem:[%s2812_s2] ss:$0 sm:$0xff]  ;;  %v1618_v17 = vunpack.c.h.bf16 %v1733_v13  ;;  %v157_v18 = vmul.f32 %v1609_v9, %v1904_v2  ;;  %v158_v19 = vmul.f32 %v1610_v10, %v1904_v2  ;;  %v159_v20 = vmul.f32 %v1613_v11, %v1904_v2  ;;  %v1739_v9 = vld [vmem:[%s2810_s0 + $0x48] sm:$0xff]   ;;  %v1740_v11 = vld [vmem:[%s2810_s0 + $0x50] sm:$0xff]  }
   0x5   :  { %v155_v14 = vmul.f32 %v1605_v4, %v1904_v2  ;;  %v156_v15 = vmul.f32 %v1606_v5, %v1904_v2  ;;  %v160_v21 = vmul.f32 %v1614_v12, %v1904_v2  ;;  %v161_v24 = vmul.f32 %v1617_v16, %v1904_v2  ;;  %v1734_v30 = vld [vmem:[%s2810_s0 + $0x20] sm:$0xff]  }
   0x6   :  { %v162_v25 = vmul.f32 %v1618_v17, %v1904_v2  ;;  %v228_v26 = vadd.f32 %v1915_v8, %v157_v18  ;;  %v229_v27 = vadd.f32 %v1915_v8, %v158_v19  ;;  %v230_v28 = vadd.f32 %v1915_v8, %v159_v20  ;;  %v1738_v63 = vld [vmem:[%s2810_s0 + $0x40] sm:$0xff]   ;;  %v1741_v20 = vld [vmem:[%s2810_s0 + $0x58] sm:$0xff]  }
   0x7   :  { %v226_v22 = vadd.f32 %v1915_v8, %v155_v14  ;;  %v227_v23 = vadd.f32 %v1915_v8, %v156_v15  ;;  %v231_v29 = vadd.f32 %v1915_v8, %v160_v21  ;;  %v232_v33 = vadd.f32 %v1915_v8, %v161_v24 }
   0x8   :  { %v233_v34 = vadd.f32 %v1915_v8, %v162_v25  ;;  %v292_v36 = vmax.f32 %v228_v26, 0.0  ;;  %v293_v37 = vmax.f32 %v229_v27, 0.0  ;;  %v294_v38 = vmax.f32 %v230_v28, 0.0 }
   0x9   :  { %v290_v31 = vmax.f32 %v226_v22, 0.0  ;;  %v291_v32 = vmax.f32 %v227_v23, 0.0  ;;  %v295_v39 = vmax.f32 %v231_v29, 0.0  ;;  %v1621_v42 = vunpack.c.l.bf16 %v1734_v30 }
   0xa   :  { %v355_v43 = vpack.c.bf16 %v293_v37, %v292_v36  ;;  %v1622_v45 = vunpack.c.h.bf16 %v1734_v30  ;;  %v1625_v46 = vunpack.c.l.bf16 %v1735_v35  ;;  %v296_v47 = vmax.f32 %v232_v33, 0.0 }
   0xb   :  { %v354_v41 = vpack.c.bf16 %v291_v32, %v290_v31  ;;  %v356_v44 = vpack.c.bf16 %v295_v39, %v294_v38  ;;  %v163_v48 = vmul.f32 %v1621_v42, %v1904_v2  ;;  %v1626_v49 = vunpack.c.h.bf16 %v1735_v35  ;;  %v1742_v31 = vld [vmem:[%s2810_s0 + $0x60] sm:$0xff]  }
   0xc   :  { %v1629_v50 = vunpack.c.l.bf16 %v1736_v40  ;;  %v297_v52 = vmax.f32 %v233_v34, 0.0  ;;  %v164_v53 = vmul.f32 %v1622_v45, %v1904_v2  ;;  %v165_v54 = vmul.f32 %v1625_v46, %v1904_v2 }
   0xd   :  { %1797 = vmatprep.mubr.msk.bf16.mxu0 %vm387_vm1, %v354_v41  ;;  %v1630_v55 = vunpack.c.h.bf16 %v1736_v40  ;;  %v234_v56 = vadd.f32 %v1915_v8, %v163_v48  ;;  %v166_v57 = vmul.f32 %v1626_v49, %v1904_v2  ;;  %v1633_v61 = vunpack.c.l.bf16 %v1737_v51 }
   0xe   :  { %1798 = vmatmul.mubr.msk.bf16.vlgmr.msra.gmra.mxu0 %vm387_vm1, %v355_v43  ;;  %v167_v58 = vmul.f32 %v1629_v50, %v1904_v2  ;;  %v235_v59 = vadd.f32 %v1915_v8, %v164_v53  ;;  %v1634_v62 = vunpack.c.h.bf16 %v1737_v51  ;;  %v236_v1 = vadd.f32 %v1915_v8, %v165_v54 }
   0xf   :  { %1801 = vmatprep.mubr.msk.bf16.mxu0 %vm387_vm1, %v356_v44  ;;  %v168_v60 = vmul.f32 %v1630_v55, %v1904_v2  ;;  %v298_v0 = vmax.f32 %v234_v56, 0.0  ;;  %v237_v3 = vadd.f32 %v1915_v8, %v166_v57  ;;  %v357_v5 = vpack.c.bf16 %v297_v52, %v296_v47  ;;  %v1743_v44 = vld [vmem:[%s2810_s0 + $0x68] sm:$0xff]   ;;  %v1744_v56 = vld [vmem:[%s2810_s0 + $0x70] sm:$0xff]  }
  0x10   :  { %v238_v4 = vadd.f32 %v1915_v8, %v167_v58  ;;  %v299_v6 = vmax.f32 %v235_v59, 0.0  ;;  %v1637_v10 = vunpack.c.l.bf16 %v1738_v63  ;;  %v169_v13 = vmul.f32 %v1633_v61, %v1904_v2 }
  0x11   :  { %v239_v7 = vadd.f32 %v1915_v8, %v168_v60  ;;  %v170_v14 = vmul.f32 %v1634_v62, %v1904_v2  ;;  %v1638_v15 = vunpack.c.h.bf16 %v1738_v63  ;;  %v300_v16 = vmax.f32 %v236_v1, 0.0  ;;  %v2014_v1 = vld [vmem:[%s2810_s0 + $0x78] sm:$0xff]  }
  0x12   :  { %v358_v12 = vpack.c.bf16 %v299_v6, %v298_v0  ;;  %v301_v17 = vmax.f32 %v237_v3, 0.0  ;;  %v302_v18 = vmax.f32 %v238_v4, 0.0  ;;  %v1641_v19 = vunpack.c.l.bf16 %v1739_v9  ;;  %v1746_v3 = vld [vmem:[%s2810_s0 + $0x80] sm:$0xff]  }
  0x13   :  { %v303_v21 = vmax.f32 %v239_v7, 0.0  ;;  %v171_v22 = vmul.f32 %v1637_v10, %v1904_v2  ;;  %v1642_v23 = vunpack.c.h.bf16 %v1739_v9  ;;  %v1645_v24 = vunpack.c.l.bf16 %v1740_v11 }
  0x14   :  { %v172_v25 = vmul.f32 %v1638_v15, %v1904_v2  ;;  %v173_v26 = vmul.f32 %v1641_v19, %v1904_v2  ;;  %v1646_v27 = vunpack.c.h.bf16 %v1740_v11  ;;  %v1649_v30 = vunpack.c.l.bf16 %v1741_v20  ;;  %v1747_v19 = vld [vmem:[%s2810_s0 + $0x88] sm:$0xff]  }
  0x15   :  { %v174_v28 = vmul.f32 %v1642_v23, %v1904_v2  ;;  %v175_v29 = vmul.f32 %v1645_v24, %v1904_v2  ;;  %v240_v32 = vadd.f32 %v1915_v8, %v169_v13  ;;  %v241_v33 = vadd.f32 %v1915_v8, %v170_v14  ;;  %v1748_v24 = vld [vmem:[%s2810_s0 + $0x90] sm:$0xff]  }
  0x16   :  { %1802 = vmatmul.mubr.msk.bf16.gmra.mxu0 %vm387_vm1, %v357_v5  ;;  %v176_v34 = vmul.f32 %v1646_v27, %v1904_v2  ;;  %v1650_v35 = vunpack.c.h.bf16 %v1741_v20  ;;  %v359_v36 = vpack.c.bf16 %v301_v17, %v300_v16  ;;  %v360_v37 = vpack.c.bf16 %v303_v21, %v302_v18 }
  0x17   :  { %1805 = vmatprep.mubr.msk.bf16.mxu0 %vm387_vm1, %v358_v12  ;;  %v242_v38 = vadd.f32 %v1915_v8, %v171_v22  ;;  %v177_v39 = vmul.f32 %v1649_v30, %v1904_v2  ;;  %v243_v40 = vadd.f32 %v1915_v8, %v172_v25  ;;  %v244_v41 = vadd.f32 %v1915_v8, %v173_v26 }
  0x18   :  { %v178_v42 = vmul.f32 %v1650_v35, %v1904_v2  ;;  %v1653_v43 = vunpack.c.l.bf16 %v1742_v31  ;;  %v245_v45 = vadd.f32 %v1915_v8, %v174_v28  ;;  %v246_v46 = vadd.f32 %v1915_v8, %v175_v29 }
  0x19   :  { %v247_v47 = vadd.f32 %v1915_v8, %v176_v34  ;;  %v248_v48 = vadd.f32 %v1915_v8, %v177_v39  ;;  %v1654_v50 = vunpack.c.h.bf16 %v1742_v31  ;;  %v304_v52 = vmax.f32 %v240_v32, 0.0 }
  0x1a   :  { %v249_v49 = vadd.f32 %v1915_v8, %v178_v42  ;;  %v179_v51 = vmul.f32 %v1653_v43, %v1904_v2  ;;  %v305_v53 = vmax.f32 %v241_v33, 0.0  ;;  %v1657_v54 = vunpack.c.l.bf16 %v1743_v44  ;;  %v1749_v33 = vld [vmem:[%s2810_s0 + $0x98] sm:$0xff]  }
  0x1b   :  { %v1658_v55 = vunpack.c.h.bf16 %v1743_v44  ;;  %v306_v57 = vmax.f32 %v242_v38, 0.0  ;;  %v307_v58 = vmax.f32 %v243_v40, 0.0  ;;  %v308_v59 = vmax.f32 %v244_v41, 0.0 }
  0x1c   :  { %v180_v60 = vmul.f32 %v1654_v50, %v1904_v2  ;;  %v309_v61 = vmax.f32 %v245_v45, 0.0  ;;  %v310_v62 = vmax.f32 %v246_v46, 0.0  ;;  %v311_v63 = vmax.f32 %v247_v47, 0.0  ;;  %v1750_v46 = vld [vmem:[%s2810_s0 + $0xa0] sm:$0xff]  }
  0x1d   :  { %v181_v0 = vmul.f32 %v1657_v54, %v1904_v2  ;;  %v312_v4 = vmax.f32 %v248_v48, 0.0  ;;  %v313_v5 = vmax.f32 %v249_v49, 0.0  ;;  %v2020_v6 = vadd.f32 %v1915_v8, %v179_v51 }
  0x1e   :  { %1806 = vmatmul.mubr.msk.bf16.gmra.mxu0 %vm387_vm1, %v359_v36  ;;  %v1661_v7 = vunpack.c.l.bf16 %v1744_v56  ;;  %v361_v9 = vpack.c.bf16 %v305_v53, %v304_v52  ;;  %v2023_v10 = vadd.f32 %v1915_v8, %v180_v60  ;;  %v182_v11 = vmul.f32 %v1658_v55, %v1904_v2  ;;  %v1751_v55 = vld [vmem:[%s2810_s0 + $0xa8] sm:$0xff]  }
  0x1f   :  { %1809 = vmatprep.mubr.msk.bf16.mxu0 %vm387_vm1, %v360_v37  ;;  %v1662_v12 = vunpack.c.h.bf16 %v1744_v56  ;;  %v362_v13 = vpack.c.bf16 %v307_v58, %v306_v57  ;;  %v1665_v14 = vunpack.c.l.bf16 %v2014_v1  ;;  %v1669_v15 = vunpack.c.l.bf16 %v1746_v3 }
  0x20   :  { %v363_v16 = vpack.c.bf16 %v309_v61, %v308_v59  ;;  %v364_v17 = vpack.c.bf16 %v311_v63, %v310_v62  ;;  %v2028_v18 = vadd.f32 %v1915_v8, %v181_v0  ;;  %v2033_v20 = vpack.c.bf16 %v313_v5, %v312_v4 }
  0x21   :  { %v314_v21 = vmax.f32 %v2020_v6, 0.0  ;;  %v183_v22 = vmul.f32 %v1661_v7, %v1904_v2  ;;  %v1670_v23 = vunpack.c.h.bf16 %v1746_v3  ;;  %v315_v25 = vmax.f32 %v2023_v10, 0.0  ;;  %v1752_v7 = vld [vmem:[%s2810_s0 + $0xb0] sm:$0xff]   ;;  %v1754_v6 = vld [vmem:[%s2810_s0 + $0xc0] sm:$0xff]  }
  0x22   :  { %v2043_v26 = vadd.f32 %v1915_v8, %v182_v11  ;;  %v184_v27 = vmul.f32 %v1662_v12, %v1904_v2  ;;  %v187_v28 = vmul.f32 %v1669_v15, %v1904_v2  ;;  %v1666_v29 = vunpack.c.h.bf16 %v2014_v1 }
  0x23   :  { %v2050_v30 = vmul.f32 %v1665_v14, %v1904_v2  ;;  %v188_v31 = vmul.f32 %v1670_v23, %v1904_v2  ;;  %v1673_v32 = vunpack.c.l.bf16 %v1747_v19  ;;  %v316_v34 = vmax.f32 %v2028_v18, 0.0  ;;  %v1756_v18 = vld [vmem:[%s2810_s0 + $0xd0] sm:$0xff]  }
  0x24   :  { %v258_v35 = vadd.f32 %v1915_v8, %v187_v28  ;;  %v1674_v36 = vunpack.c.h.bf16 %v1747_v19  ;;  %v1677_v37 = vunpack.c.l.bf16 %v1748_v24  ;;  %v2059_v38 = vadd.f32 %v1915_v8, %v183_v22 }
  0x25   :  { %v259_v39 = vadd.f32 %v1915_v8, %v188_v31  ;;  %v189_v40 = vmul.f32 %v1673_v32, %v1904_v2  ;;  %v1678_v41 = vunpack.c.h.bf16 %v1748_v24  ;;  %v1681_v45 = vunpack.c.l.bf16 %v1749_v33  ;;  %v1753_v24 = vld [vmem:[%s2810_s0 + $0xb8] sm:$0xff]  }
  0x26   :  { %1810 = vmatmul.mubr.msk.bf16.gmra.mxu0 %vm387_vm1, %v361_v9  ;;  %v322_v42 = vmax.f32 %v258_v35, 0.0  ;;  %v190_v43 = vmul.f32 %v1674_v36, %v1904_v2  ;;  %v191_v44 = vmul.f32 %v1677_v37, %v1904_v2  ;;  %v2069_v47 = vadd.f32 %v1915_v8, %v184_v27 }
  0x27   :  { %1813 = vmatprep.mubr.msk.bf16.mxu0 %vm387_vm1, %v362_v13  ;;  %v323_v48 = vmax.f32 %v259_v39, 0.0  ;;  %v260_v49 = vadd.f32 %v1915_v8, %v189_v40  ;;  %v192_v50 = vmul.f32 %v1678_v41, %v1904_v2  ;;  %v1682_v53 = vunpack.c.h.bf16 %v1749_v33 }
  0x28   :  { %v261_v51 = vadd.f32 %v1915_v8, %v190_v43  ;;  %v262_v52 = vadd.f32 %v1915_v8, %v191_v44  ;;  %v193_v54 = vmul.f32 %v1681_v45, %v1904_v2  ;;  %v1685_v59 = vunpack.c.l.bf16 %v1750_v46 }
  0x29   :  { %v370_v56 = vpack.c.bf16 %v323_v48, %v322_v42  ;;  %v324_v57 = vmax.f32 %v260_v49, 0.0  ;;  %v263_v58 = vadd.f32 %v1915_v8, %v192_v50  ;;  %v194_v62 = vmul.f32 %v1682_v53, %v1904_v2 }
  0x2a   :  { %v325_v60 = vmax.f32 %v261_v51, 0.0  ;;  %v326_v61 = vmax.f32 %v262_v52, 0.0  ;;  %v264_v63 = vadd.f32 %v1915_v8, %v193_v54  ;;  %v1686_v3 = vunpack.c.h.bf16 %v1750_v46  ;;  %v1755_v52 = vld [vmem:[%s2810_s0 + $0xc8] sm:$0xff]  }
  0x2b   :  { %1829 = vmatprep.mubr.msk.bf16.mxu1 %vm387_vm1, %v370_v56  ;;  %v327_v0 = vmax.f32 %v263_v58, 0.0  ;;  %v195_v4 = vmul.f32 %v1685_v59, %v1904_v2  ;;  %v1689_v5 = vunpack.c.l.bf16 %v1751_v55  ;;  %v265_v10 = vadd.f32 %v1915_v8, %v194_v62 }
  0x2c   :  { %v371_v9 = vpack.c.bf16 %v325_v60, %v324_v57  ;;  %v328_v11 = vmax.f32 %v264_v63, 0.0  ;;  %v1690_v12 = vunpack.c.h.bf16 %v1751_v55  ;;  %v196_v14 = vmul.f32 %v1686_v3, %v1904_v2 }
  0x2d   :  { %v372_v13 = vpack.c.bf16 %v327_v0, %v326_v61  ;;  %v266_v15 = vadd.f32 %v1915_v8, %v195_v4  ;;  %v1693_v22 = vunpack.c.l.bf16 %v1752_v7  ;;  %v1694_v23 = vunpack.c.h.bf16 %v1752_v7 }
  0x2e   :  { %1814 = vmatmul.mubr.msk.bf16.gmra.mxu0 %vm387_vm1, %v363_v16  ;;  %v197_v16 = vmul.f32 %v1689_v5, %v1904_v2  ;;  %1830 = vmatmul.mubr.msk.bf16.vlgmr.msra.gmra.mxu1 %vm387_vm1, %v371_v9  ;;  %v198_v19 = vmul.f32 %v1690_v12, %v1904_v2  ;;  %v366_v27 = vpack.c.bf16 %v315_v25, %v314_v21  ;;  %v317_v28 = vmax.f32 %v2043_v26, 0.0 }
  0x2f   :  { %1817 = vmatprep.mubr.msk.bf16.mxu0 %vm387_vm1, %v364_v17  ;;  %v329_v17 = vmax.f32 %v265_v10, 0.0  ;;  %1833 = vmatprep.mubr.msk.bf16.mxu1 %vm387_vm1, %v372_v13  ;;  %v267_v31 = vadd.f32 %v1915_v8, %v196_v14  ;;  %v330_v32 = vmax.f32 %v266_v15, 0.0  ;;  %v318_v33 = vmax.f32 %v2059_v38, 0.0  ;;  %v1757_v14 = vld [vmem:[%s2810_s0 + $0xd8] sm:$0xff]  }
  0x30   :  { %v186_v35 = vmul.f32 %v1666_v29, %v1904_v2  ;;  %v199_v36 = vmul.f32 %v1693_v22, %v1904_v2  ;;  %v200_v37 = vmul.f32 %v1694_v23, %v1904_v2  ;;  %v319_v21 = vmax.f32 %v2069_v47, 0.0 }
  0x31   :  { %v331_v25 = vmax.f32 %v267_v31, 0.0  ;;  %v1697_v26 = vunpack.c.l.bf16 %v1753_v24  ;;  %v1698_v39 = vunpack.c.h.bf16 %v1753_v24  ;;  %v373_v38 = vpack.c.bf16 %v329_v17, %v328_v11  ;;  %v1758_v17 = vld [vmem:[%s2810_s0 + $0xe0] sm:$0xff]  }
  0x32   :  { %v268_v1 = vadd.f32 %v1915_v8, %v197_v16  ;;  %v269_v29 = vadd.f32 %v1915_v8, %v198_v19  ;;  %v270_v40 = vadd.f32 %v1915_v8, %v199_v36  ;;  %v271_v42 = vadd.f32 %v1915_v8, %v200_v37 }
  0x33   :  { %v374_v41 = vpack.c.bf16 %v331_v25, %v330_v32  ;;  %v1701_v43 = vunpack.c.l.bf16 %v1754_v6  ;;  %v1702_v44 = vunpack.c.h.bf16 %v1754_v6  ;;  %v256_v45 = vadd.f32 %v1915_v8, %v2050_v30 }
  0x34   :  { %v257_v46 = vadd.f32 %v1915_v8, %v186_v35  ;;  %v202_v47 = vmul.f32 %v1698_v39, %v1904_v2  ;;  %v367_v48 = vpack.c.bf16 %v317_v28, %v316_v34  ;;  %v368_v49 = vpack.c.bf16 %v319_v21, %v318_v33  ;;  %v1759_v39 = vld [vmem:[%s2810_s0 + $0xe8] sm:$0xff]  }
  0x35   :  { %v332_v50 = vmax.f32 %v268_v1, 0.0  ;;  %v333_v51 = vmax.f32 %v269_v29, 0.0  ;;  %v334_v30 = vmax.f32 %v270_v40, 0.0  ;;  %v335_v53 = vmax.f32 %v271_v42, 0.0  ;;  %v1760_v29 = vld [vmem:[%s2810_s0 + $0xf0] sm:$0xff]  }
  0x36   :  { %1818 = vmatmul.mubr.msk.bf16.gmra.mxu0 %vm387_vm1, %v2033_v20  ;;  %v201_v20 = vmul.f32 %v1697_v26, %v1904_v2  ;;  %1834 = vmatmul.mubr.msk.bf16.gmra.mxu1 %vm387_vm1, %v373_v38  ;;  %v203_v54 = vmul.f32 %v1701_v43, %v1904_v2  ;;  %v204_v55 = vmul.f32 %v1702_v44, %v1904_v2  ;;  %v320_v34 = vmax.f32 %v256_v45, 0.0 }
  0x37   :  { %1821 = vmatprep.mubr.msk.bf16.mxu0 %vm387_vm1, %v366_v27  ;;  %1837 = vmatprep.mubr.msk.bf16.mxu1 %vm387_vm1, %v374_v41  ;;  %v321_v56 = vmax.f32 %v257_v46, 0.0  ;;  %v273_v58 = vadd.f32 %v1915_v8, %v202_v47  ;;  %v1705_v59 = vunpack.c.l.bf16 %v1755_v52  ;;  %v375_v60 = vpack.c.bf16 %v333_v51, %v332_v50 }
  0x38   :  { %v272_v57 = vadd.f32 %v1915_v8, %v201_v20  ;;  %v1706_v61 = vunpack.c.h.bf16 %v1755_v52  ;;  %v1709_v62 = vunpack.c.l.bf16 %v1756_v18  ;;  %v1710_v63 = vunpack.c.h.bf16 %v1756_v18  ;;  %v1761_v18 = vld [vmem:[%s2810_s0 + $0xf8] sm:$0xff]  }
  0x39   :  { %v376_v0 = vpack.c.bf16 %v335_v53, %v334_v30  ;;  %v274_v3 = vadd.f32 %v1915_v8, %v203_v54  ;;  %v275_v4 = vadd.f32 %v1915_v8, %v204_v55  ;;  %v337_v7 = vmax.f32 %v273_v58, 0.0 }
  0x3a   :  { %v336_v5 = vmax.f32 %v272_v57, 0.0  ;;  %v205_v9 = vmul.f32 %v1705_v59, %v1904_v2  ;;  %v369_v10 = vpack.c.bf16 %v321_v56, %v320_v34  ;;  %v206_v11 = vmul.f32 %v1706_v61, %v1904_v2 }
  0x3b   :  { %v207_v12 = vmul.f32 %v1709_v62, %v1904_v2  ;;  %v208_v13 = vmul.f32 %v1710_v63, %v1904_v2  ;;  %v338_v15 = vmax.f32 %v274_v3, 0.0  ;;  %v339_v16 = vmax.f32 %v275_v4, 0.0 }
  0x3c   :  { %v377_v19 = vpack.c.bf16 %v337_v7, %v336_v5  ;;  %v276_v22 = vadd.f32 %v1915_v8, %v205_v9  ;;  %v1713_v23 = vunpack.c.l.bf16 %v1757_v14  ;;  %v277_v24 = vadd.f32 %v1915_v8, %v206_v11 }
  0x3d   :  { %v278_v27 = vadd.f32 %v1915_v8, %v207_v12  ;;  %v279_v28 = vadd.f32 %v1915_v8, %v208_v13  ;;  %v1714_v31 = vunpack.c.h.bf16 %v1757_v14  ;;  %v378_v32 = vpack.c.bf16 %v339_v16, %v338_v15 }
  0x3e   :  { %1822 = vmatmul.mubr.msk.bf16.gmra.mxu0 %vm387_vm1, %v367_v48  ;;  %1838 = vmatmul.mubr.msk.bf16.gmra.mxu1 %vm387_vm1, %v375_v60  ;;  %v1717_v33 = vunpack.c.l.bf16 %v1758_v17  ;;  %v1718_v35 = vunpack.c.h.bf16 %v1758_v17  ;;  %v340_v36 = vmax.f32 %v276_v22, 0.0  ;;  %v209_v37 = vmul.f32 %v1713_v23, %v1904_v2 }
  0x3f   :  { %1825 = vmatprep.mubr.msk.bf16.mxu0 %vm387_vm1, %v368_v49  ;;  %1841 = vmatprep.mubr.msk.bf16.mxu1 %vm387_vm1, %v376_v0  ;;  %v341_v6 = vmax.f32 %v277_v24, 0.0  ;;  %v342_v21 = vmax.f32 %v278_v27, 0.0  ;;  %v343_v25 = vmax.f32 %v279_v28, 0.0  ;;  %v210_v26 = vmul.f32 %v1714_v31, %v1904_v2 }
  0x40   :  { %v211_v38 = vmul.f32 %v1717_v33, %v1904_v2  ;;  %v212_v1 = vmul.f32 %v1718_v35, %v1904_v2  ;;  %v280_v40 = vadd.f32 %v1915_v8, %v209_v37  ;;  %v1721_v41 = vunpack.c.l.bf16 %v1759_v39 }
  0x41   :  { %v379_v42 = vpack.c.bf16 %v341_v6, %v340_v36  ;;  %v380_v43 = vpack.c.bf16 %v343_v25, %v342_v21  ;;  %v281_v44 = vadd.f32 %v1915_v8, %v210_v26  ;;  %v1722_v45 = vunpack.c.h.bf16 %v1759_v39 }
  0x42   :  { %v282_v46 = vadd.f32 %v1915_v8, %v211_v38  ;;  %v283_v20 = vadd.f32 %v1915_v8, %v212_v1  ;;  %v1725_v47 = vunpack.c.l.bf16 %v1760_v29  ;;  %v1726_v48 = vunpack.c.h.bf16 %v1760_v29 }
  0x43   :  { %v213_v49 = vmul.f32 %v1721_v41, %v1904_v2  ;;  %v344_v50 = vmax.f32 %v280_v40, 0.0  ;;  %v345_v51 = vmax.f32 %v281_v44, 0.0  ;;  %v214_v52 = vmul.f32 %v1722_v45, %v1904_v2 }
  0x44   :  { %v346_v30 = vmax.f32 %v282_v46, 0.0  ;;  %v347_v53 = vmax.f32 %v283_v20, 0.0  ;;  %v215_v54 = vmul.f32 %v1725_v47, %v1904_v2  ;;  %v216_v55 = vmul.f32 %v1726_v48, %v1904_v2 }
  0x45   :  { %v284_v34 = vadd.f32 %v1915_v8, %v213_v49  ;;  %v381_v56 = vpack.c.bf16 %v345_v51, %v344_v50  ;;  %v285_v57 = vadd.f32 %v1915_v8, %v214_v52  ;;  %v1729_v58 = vunpack.c.l.bf16 %v1761_v18 }
  0x46   :  { %1826 = vmatmul.mubr.msk.bf16.gmra.mxu0 %vm387_vm1, %v369_v10  ;;  %1842 = vmatmul.mubr.msk.bf16.gmra.mxu1 %vm387_vm1, %v377_v19  ;;  %v1730_v59 = vunpack.c.h.bf16 %v1761_v18  ;;  %v382_v60 = vpack.c.bf16 %v347_v53, %v346_v30  ;;  %v286_v61 = vadd.f32 %v1915_v8, %v215_v54  ;;  %v287_v62 = vadd.f32 %v1915_v8, %v216_v55 }
  0x47   :  { %1845 = vmatprep.mubr.msk.bf16.mxu1 %vm387_vm1, %v378_v32  ;;  %v348_v63 = vmax.f32 %v284_v34, 0.0  ;;  %v349_v0 = vmax.f32 %v285_v57, 0.0  ;;  %v217_v3 = vmul.f32 %v1729_v58, %v1904_v2 }
  0x48   :  { %v218_v4 = vmul.f32 %v1730_v59, %v1904_v2  ;;  %v350_v5 = vmax.f32 %v286_v61, 0.0  ;;  %v351_v7 = vmax.f32 %v287_v62, 0.0 }
  0x49   :  { %v383_v9 = vpack.c.bf16 %v349_v0, %v348_v63  ;;  %v288_v10 = vadd.f32 %v1915_v8, %v217_v3 }
  0x4a   :  { %v289_v11 = vadd.f32 %v1915_v8, %v218_v4  ;;  %v384_v12 = vpack.c.bf16 %v351_v7, %v350_v5 }
  0x4b   :  { %v352_v13 = vmax.f32 %v288_v10, 0.0 }
  0x4c   :  { %v353_v14 = vmax.f32 %v289_v11, 0.0 }
  0x4e   :  { %1846 = vmatmul.mubr.msk.bf16.gmra.mxu1 %vm387_vm1, %v379_v42  ;;  %v385_v15 = vpack.c.bf16 %v353_v14, %v352_v13 }
  0x4f   :  { %1849 = vmatprep.mubr.msk.bf16.mxu1 %vm387_vm1, %v380_v43 }
  0x56   :  { %1850 = vmatmul.mubr.msk.bf16.gmra.mxu1 %vm387_vm1, %v381_v56 }
  0x57   :  { %1853 = vmatprep.mubr.msk.bf16.mxu1 %vm387_vm1, %v382_v60 }
  0x5e   :  { %1854 = vmatmul.mubr.msk.bf16.gmra.mxu1 %vm387_vm1, %v383_v9 }
  0x5f   :  { %1857 = vmatprep.mubr.msk.bf16.mxu1 %vm387_vm1, %v384_v12 }
  0x66   :  { %1858 = vmatmul.mubr.msk.bf16.gmra.mxu1 %vm387_vm1, %v385_v15 }
  0xce   :  { %v1799_v2 = vpop.f32.mrf.mxu0 }
  0xcf   :  { %v1541_v16 = vpack.c.bf16 %v1799_v2, %v1799_v2  ;;  %v1234_v24 = vmul.f32 %v1799_v2, %v1799_v2  ;;  %v1102_v35 = vsel %vm1098_vm3, %v1799_v2, 0.0 }
  0xd0   :  { %v522_v17 = vpop.f32.mrf.mxu0 }
  0xd1   :  { %1036 = vst.msk [vmem:[%s2813_s4 + $0x8] sm:$0xf] %vm1033_vm2, %v1541_v16  ;;  %v1539_v8 = vpack.c.bf16 %v522_v17, %v522_v17  ;;  %v1232_v22 = vmul.f32 %v522_v17, %v522_v17  ;;  %v1099_v28 = vsel %vm1098_vm3, %v522_v17, 0.0  ;;  %v1299_v29 = vsel %vm1098_vm3, %v1234_v24, 0.0 }
  0xd2   :  { %v1800_v19 = vpop.f32.mrf.mxu0 }
  0xd3   :  { %1034 = vst.msk [vmem:[%s2813_s4] sm:$0xf] %vm1033_vm2, %v1539_v8  ;;  %v1542_v23 = vpack.c.bf16 %v1800_v19, %v1800_v19  ;;  %v1296_v6 = vsel %vm1098_vm3, %v1232_v22, 0.0  ;;  %v1235_v21 = vmul.f32 %v1800_v19, %v1800_v19  ;;  %v1104_v40 = vsel %vm1098_vm3, %v1800_v19, 0.0 }
  0xd4   :  { %v525_v27 = vpop.f32.mrf.mxu0 }
  0xd5   :  { %1037 = vst.msk [vmem:[%s2813_s4 + $0xc] sm:$0xf] %vm1033_vm2, %v1542_v23  ;;  %v1540_v31 = vpack.c.bf16 %v525_v27, %v525_v27  ;;  %v1100_v32 = vsel %vm1098_vm3, %v525_v27, 0.0  ;;  %v1233_v33 = vmul.f32 %v525_v27, %v525_v27  ;;  %v1301_v46 = vsel %vm1098_vm3, %v1235_v21, 0.0 }
  0xd6   :  { %v1101_v36 = vadd.f32 %v1100_v32, %v1099_v28  ;;  %v1803_v37 = vpop.f32.mrf.mxu0 }
  0xd7   :  { %1035 = vst.msk [vmem:[%s2813_s4 + $0x4] sm:$0xf] %vm1033_vm2, %v1540_v31  ;;  %v1297_v25 = vsel %vm1098_vm3, %v1233_v33, 0.0  ;;  %v1545_v26 = vpack.c.bf16 %v1803_v37, %v1803_v37  ;;  %v1238_v48 = vmul.f32 %v1803_v37, %v1803_v37  ;;  %v1110_v56 = vsel %vm1098_vm3, %v1803_v37, 0.0 }
  0xd8   :  { %v1103_v39 = vadd.f32 %v1102_v35, %v1101_v36  ;;  %v1298_v38 = vadd.f32 %v1297_v25, %v1296_v6  ;;  %v538_v1 = vpop.f32.mrf.mxu0 }
  0xd9   :  { %1040 = vst.msk [vmem:[%s2813_s4 + $0x18] sm:$0xf] %vm1033_vm2, %v1545_v26  ;;  %v1543_v41 = vpack.c.bf16 %v538_v1, %v538_v1  ;;  %v1236_v42 = vmul.f32 %v538_v1, %v538_v1  ;;  %v1106_v20 = vsel %vm1098_vm3, %v538_v1, 0.0  ;;  %v1307_v63 = vsel %vm1098_vm3, %v1238_v48, 0.0 }
  0xda   :  { %v1300_v43 = vadd.f32 %v1299_v29, %v1298_v38  ;;  %v1105_v44 = vadd.f32 %v1104_v40, %v1103_v39  ;;  %v1804_v45 = vpop.f32.mrf.mxu0 }
  0xdb   :  { %1038 = vst.msk [vmem:[%s2813_s4 + $0x10] sm:$0xf] %vm1033_vm2, %v1543_v41  ;;  %v1546_v47 = vpack.c.bf16 %v1804_v45, %v1804_v45  ;;  %v1303_v52 = vsel %vm1098_vm3, %v1236_v42, 0.0  ;;  %v1239_v57 = vmul.f32 %v1804_v45, %v1804_v45  ;;  %v1112_v0 = vsel %vm1098_vm3, %v1804_v45, 0.0 }
  0xdc   :  { %v1107_v49 = vadd.f32 %v1106_v20, %v1105_v44  ;;  %v1302_v50 = vadd.f32 %v1301_v46, %v1300_v43  ;;  %v541_v51 = vpop.f32.mrf.mxu0 }
  0xdd   :  { %1041 = vst.msk [vmem:[%s2813_s4 + $0x1c] sm:$0xf] %vm1033_vm2, %v1546_v47  ;;  %v1544_v30 = vpack.c.bf16 %v541_v51, %v541_v51  ;;  %v1108_v53 = vsel %vm1098_vm3, %v541_v51, 0.0  ;;  %v1237_v54 = vmul.f32 %v541_v51, %v541_v51  ;;  %v1309_v10 = vsel %vm1098_vm3, %v1239_v57, 0.0 }
  0xde   :  { %v1304_v55 = vadd.f32 %v1303_v52, %v1302_v50  ;;  %v1109_v18 = vadd.f32 %v1108_v53, %v1107_v49  ;;  %v1807_v34 = vpop.f32.mrf.mxu0 }
  0xdf   :  { %1039 = vst.msk [vmem:[%s2813_s4 + $0x14] sm:$0xf] %vm1033_vm2, %v1544_v30  ;;  %v1305_v58 = vsel %vm1098_vm3, %v1237_v54, 0.0  ;;  %v1549_v59 = vpack.c.bf16 %v1807_v34, %v1807_v34  ;;  %v1242_v13 = vmul.f32 %v1807_v34, %v1807_v34  ;;  %v1118_v27 = vsel %vm1098_vm3, %v1807_v34, 0.0 }
  0xe0   :  { %v1111_v60 = vadd.f32 %v1110_v56, %v1109_v18  ;;  %v1306_v61 = vadd.f32 %v1305_v58, %v1304_v55  ;;  %v554_v62 = vpop.f32.mrf.mxu0 }
  0xe1   :  { %1044 = vst.msk [vmem:[%s2813_s4 + $0x28] sm:$0xf] %vm1033_vm2, %v1549_v59  ;;  %v1547_v3 = vpack.c.bf16 %v554_v62, %v554_v62  ;;  %v1240_v4 = vmul.f32 %v554_v62, %v554_v62  ;;  %v1114_v11 = vsel %vm1098_vm3, %v554_v62, 0.0  ;;  %v1315_v37 = vsel %vm1098_vm3, %v1242_v13, 0.0 }
  0xe2   :  { %v1308_v5 = vadd.f32 %v1307_v63, %v1306_v61  ;;  %v1113_v7 = vadd.f32 %v1112_v0, %v1111_v60  ;;  %v1808_v9 = vpop.f32.mrf.mxu0 }
  0xe3   :  { %1042 = vst.msk [vmem:[%s2813_s4 + $0x20] sm:$0xf] %vm1033_vm2, %v1547_v3  ;;  %v1550_v12 = vpack.c.bf16 %v1808_v9, %v1808_v9  ;;  %v1311_v16 = vsel %vm1098_vm3, %v1240_v4, 0.0  ;;  %v1243_v28 = vmul.f32 %v1808_v9, %v1808_v9  ;;  %v1120_v6 = vsel %vm1098_vm3, %v1808_v9, 0.0 }
  0xe4   :  { %v1115_v14 = vadd.f32 %v1114_v11, %v1113_v7  ;;  %v1310_v15 = vadd.f32 %v1309_v10, %v1308_v5  ;;  %v557_v2 = vpop.f32.mrf.mxu0 }
  0xe5   :  { %1045 = vst.msk [vmem:[%s2813_s4 + $0x2c] sm:$0xf] %vm1033_vm2, %v1550_v12  ;;  %v1548_v17 = vpack.c.bf16 %v557_v2, %v557_v2  ;;  %v1116_v8 = vsel %vm1098_vm3, %v557_v2, 0.0  ;;  %v1241_v19 = vmul.f32 %v557_v2, %v557_v2  ;;  %v1317_v1 = vsel %vm1098_vm3, %v1243_v28, 0.0 }
  0xe6   :  { %v1312_v22 = vadd.f32 %v1311_v16, %v1310_v15  ;;  %v1117_v23 = vadd.f32 %v1116_v8, %v1115_v14  ;;  %v1811_v24 = vpop.f32.mrf.mxu0 }
  0xe7   :  { %1043 = vst.msk [vmem:[%s2813_s4 + $0x24] sm:$0xf] %vm1033_vm2, %v1548_v17  ;;  %v1313_v31 = vsel %vm1098_vm3, %v1241_v19, 0.0  ;;  %v1553_v32 = vpack.c.bf16 %v1811_v24, %v1811_v24  ;;  %v1246_v41 = vmul.f32 %v1811_v24, %v1811_v24  ;;  %v1126_v51 = vsel %vm1098_vm3, %v1811_v24, 0.0 }
  0xe8   :  { %v1119_v33 = vadd.f32 %v1118_v27, %v1117_v23  ;;  %v1314_v35 = vadd.f32 %v1313_v31, %v1312_v22  ;;  %v570_v36 = vpop.f32.mrf.mxu0 }
  0xe9   :  { %1048 = vst.msk [vmem:[%s2813_s4 + $0x38] sm:$0xf] %vm1033_vm2, %v1553_v32  ;;  %v1551_v21 = vpack.c.bf16 %v570_v36, %v570_v36  ;;  %v1244_v25 = vmul.f32 %v570_v36, %v570_v36  ;;  %v1122_v29 = vsel %vm1098_vm3, %v570_v36, 0.0  ;;  %v1323_v34 = vsel %vm1098_vm3, %v1246_v41, 0.0 }
  0xea   :  { %v1316_v26 = vadd.f32 %v1315_v37, %v1314_v35  ;;  %v1121_v39 = vadd.f32 %v1120_v6, %v1119_v33  ;;  %v1812_v38 = vpop.f32.mrf.mxu0 }
  0xeb   :  { %1046 = vst.msk [vmem:[%s2813_s4 + $0x30] sm:$0xf] %vm1033_vm2, %v1551_v21  ;;  %v1554_v40 = vpack.c.bf16 %v1812_v38, %v1812_v38  ;;  %v1319_v45 = vsel %vm1098_vm3, %v1244_v25, 0.0  ;;  %v1247_v52 = vmul.f32 %v1812_v38, %v1812_v38  ;;  %v1128_v56 = vsel %vm1098_vm3, %v1812_v38, 0.0 }
  0xec   :  { %v1123_v42 = vadd.f32 %v1122_v29, %v1121_v39  ;;  %v1318_v43 = vadd.f32 %v1317_v1, %v1316_v26  ;;  %v573_v44 = vpop.f32.mrf.mxu0 }
  0xed   :  { %1049 = vst.msk [vmem:[%s2813_s4 + $0x3c] sm:$0xf] %vm1033_vm2, %v1554_v40  ;;  %v1552_v46 = vpack.c.bf16 %v573_v44, %v573_v44  ;;  %v1124_v20 = vsel %vm1098_vm3, %v573_v44, 0.0  ;;  %v1245_v47 = vmul.f32 %v573_v44, %v573_v44  ;;  %v1325_v63 = vsel %vm1098_vm3, %v1247_v52, 0.0 }
  0xee   :  { %v1320_v48 = vadd.f32 %v1319_v45, %v1318_v43  ;;  %v1125_v49 = vadd.f32 %v1124_v20, %v1123_v42  ;;  %v1815_v50 = vpop.f32.mrf.mxu0  ;;  %v2297_v62 = vpop.f32.mrf.mxu1 }
  0xef   :  { %1047 = vst.msk [vmem:[%s2813_s4 + $0x34] sm:$0xf] %vm1033_vm2, %v1552_v46  ;;  %v1321_v30 = vsel %vm1098_vm3, %v1245_v47, 0.0  ;;  %v1557_v53 = vpack.c.bf16 %v1815_v50, %v1815_v50  ;;  %v1250_v4 = vmul.f32 %v1815_v50, %v1815_v50  ;;  %v1573_v10 = vpack.c.bf16 %v2297_v62, %v2297_v62 }
  0xf0   :  { %v1127_v54 = vadd.f32 %v1126_v51, %v1125_v49  ;;  %v1322_v55 = vadd.f32 %v1321_v30, %v1320_v48  ;;  %v586_v18 = vpop.f32.mrf.mxu0  ;;  %v2307_v11 = vpop.f32.mrf.mxu1  ;;  %v1134_v22 = vsel %vm1098_vm3, %v1815_v50, 0.0 }
  0xf1   :  { %1052 = vst.msk [vmem:[%s2813_s4 + $0x48] sm:$0xf] %vm1033_vm2, %v1557_v53  ;;  %v1555_v57 = vpack.c.bf16 %v586_v18, %v586_v18  ;;  %v1248_v58 = vmul.f32 %v586_v18, %v586_v18  ;;  %v1130_v0 = vsel %vm1098_vm3, %v586_v18, 0.0  ;;  %1068 = vst.msk [vmem:[%s2813_s4 + $0x88] sm:$0xf] %vm1033_vm2, %v1573_v10  ;;  %v1571_v8 = vpack.c.bf16 %v2307_v11, %v2307_v11 }
  0xf2   :  { %v1324_v59 = vadd.f32 %v1323_v34, %v1322_v55  ;;  %v1129_v60 = vadd.f32 %v1128_v56, %v1127_v54  ;;  %v1816_v61 = vpop.f32.mrf.mxu0  ;;  %v2321_v19 = vpop.f32.mrf.mxu1  ;;  %v1331_v35 = vsel %vm1098_vm3, %v1250_v4, 0.0 }
  0xf3   :  { %1050 = vst.msk [vmem:[%s2813_s4 + $0x40] sm:$0xf] %vm1033_vm2, %v1555_v57  ;;  %v1558_v3 = vpack.c.bf16 %v1816_v61, %v1816_v61  ;;  %v1327_v12 = vsel %vm1098_vm3, %v1248_v58, 0.0  ;;  %v1251_v23 = vmul.f32 %v1816_v61, %v1816_v61  ;;  %1066 = vst.msk [vmem:[%s2813_s4 + $0x80] sm:$0xf] %vm1033_vm2, %v1571_v8  ;;  %v1136_v36 = vsel %vm1098_vm3, %v1816_v61, 0.0 }
  0xf4   :  { %v1131_v5 = vadd.f32 %v1130_v0, %v1129_v60  ;;  %v1326_v7 = vadd.f32 %v1325_v63, %v1324_v59  ;;  %v589_v9 = vpop.f32.mrf.mxu0  ;;  %v2333_v33 = vpop.f32.mrf.mxu1  ;;  %v1574_v39 = vpack.c.bf16 %v2321_v19, %v2321_v19 }
  0xf5   :  { %1053 = vst.msk [vmem:[%s2813_s4 + $0x4c] sm:$0xf] %vm1033_vm2, %v1558_v3  ;;  %v1556_v13 = vpack.c.bf16 %v589_v9, %v589_v9  ;;  %v1132_v14 = vsel %vm1098_vm3, %v589_v9, 0.0  ;;  %v1249_v15 = vmul.f32 %v589_v9, %v589_v9  ;;  %v1333_v1 = vsel %vm1098_vm3, %v1251_v23, 0.0 }
  0xf6   :  { %v1328_v2 = vadd.f32 %v1327_v12, %v1326_v7  ;;  %v1133_v16 = vadd.f32 %v1132_v14, %v1131_v5  ;;  %v1819_v17 = vpop.f32.mrf.mxu0  ;;  %v2343_v38 = vpop.f32.mrf.mxu1  ;;  %1069 = vst.msk [vmem:[%s2813_s4 + $0x8c] sm:$0xf] %vm1033_vm2, %v1574_v39  ;;  %v1572_v52 = vpack.c.bf16 %v2333_v33, %v2333_v33 }
  0xf7   :  { %1051 = vst.msk [vmem:[%s2813_s4 + $0x44] sm:$0xf] %vm1033_vm2, %v1556_v13  ;;  %v1329_v24 = vsel %vm1098_vm3, %v1249_v15, 0.0  ;;  %v1561_v27 = vpack.c.bf16 %v1819_v17, %v1819_v17  ;;  %v1254_v41 = vmul.f32 %v1819_v17, %v1819_v17  ;;  %v1142_v53 = vsel %vm1098_vm3, %v1819_v17, 0.0 }
  0xf8   :  { %v1135_v28 = vadd.f32 %v1134_v22, %v1133_v16  ;;  %v1330_v31 = vadd.f32 %v1329_v24, %v1328_v2  ;;  %v602_v32 = vpop.f32.mrf.mxu0  ;;  %v2355_v45 = vpop.f32.mrf.mxu1  ;;  %1067 = vst.msk [vmem:[%s2813_s4 + $0x84] sm:$0xf] %vm1033_vm2, %v1572_v52  ;;  %v1577_v5 = vpack.c.bf16 %v2343_v38, %v2343_v38 }
  0xf9   :  { %1056 = vst.msk [vmem:[%s2813_s4 + $0x58] sm:$0xf] %vm1033_vm2, %v1561_v27  ;;  %v1559_v37 = vpack.c.bf16 %v602_v32, %v602_v32  ;;  %v1252_v6 = vmul.f32 %v602_v32, %v602_v32  ;;  %v1138_v29 = vsel %vm1098_vm3, %v602_v32, 0.0  ;;  %v1339_v59 = vsel %vm1098_vm3, %v1254_v41, 0.0 }
  0xfa   :  { %v1332_v21 = vadd.f32 %v1331_v35, %v1330_v31  ;;  %v1137_v25 = vadd.f32 %v1136_v36, %v1135_v28  ;;  %v1820_v26 = vpop.f32.mrf.mxu0  ;;  %v2365_v30 = vpop.f32.mrf.mxu1  ;;  %1072 = vst.msk [vmem:[%s2813_s4 + $0x98] sm:$0xf] %vm1033_vm2, %v1577_v5  ;;  %v1575_v31 = vpack.c.bf16 %v2355_v45, %v2355_v45 }
  0xfb   :  { %1054 = vst.msk [vmem:[%s2813_s4 + $0x50] sm:$0xf] %vm1033_vm2, %v1559_v37  ;;  %v1562_v40 = vpack.c.bf16 %v1820_v26, %v1820_v26  ;;  %v1335_v46 = vsel %vm1098_vm3, %v1252_v6, 0.0  ;;  %v1255_v54 = vmul.f32 %v1820_v26, %v1820_v26  ;;  %v1144_v60 = vsel %vm1098_vm3, %v1820_v26, 0.0 }
  0xfc   :  { %v1139_v42 = vadd.f32 %v1138_v29, %v1137_v25  ;;  %v1334_v43 = vadd.f32 %v1333_v1, %v1332_v21  ;;  %v605_v44 = vpop.f32.mrf.mxu0  ;;  %v2377_v58 = vpop.f32.mrf.mxu1  ;;  %1070 = vst.msk [vmem:[%s2813_s4 + $0x90] sm:$0xf] %vm1033_vm2, %v1575_v31 }
  0xfd   :  { %1057 = vst.msk [vmem:[%s2813_s4 + $0x5c] sm:$0xf] %vm1033_vm2, %v1562_v40  ;;  %v1560_v20 = vpack.c.bf16 %v605_v44, %v605_v44  ;;  %v1140_v47 = vsel %vm1098_vm3, %v605_v44, 0.0  ;;  %v1253_v48 = vmul.f32 %v605_v44, %v605_v44  ;;  %v1341_v9 = vsel %vm1098_vm3, %v1255_v54, 0.0 }
  0xfe   :  { %v1336_v49 = vadd.f32 %v1335_v46, %v1334_v43  ;;  %v1141_v50 = vadd.f32 %v1140_v47, %v1139_v42  ;;  %v1823_v51 = vpop.f32.mrf.mxu0  ;;  %v2387_v7 = vpop.f32.mrf.mxu1  ;;  %v1578_v46 = vpack.c.bf16 %v2365_v30, %v2365_v30 }
  0xff   :  { %1055 = vst.msk [vmem:[%s2813_s4 + $0x54] sm:$0xf] %vm1033_vm2, %v1560_v20  ;;  %v1337_v55 = vsel %vm1098_vm3, %v1253_v48, 0.0  ;;  %v1565_v18 = vpack.c.bf16 %v1823_v51, %v1823_v51  ;;  %v1258_v13 = vmul.f32 %v1823_v51, %v1823_v51  ;;  %v1150_v35 = vsel %vm1098_vm3, %v1823_v51, 0.0 }
 0x100   :  { %v1143_v34 = vadd.f32 %v1142_v53, %v1141_v50  ;;  %v1338_v56 = vadd.f32 %v1337_v55, %v1336_v49  ;;  %v618_v57 = vpop.f32.mrf.mxu0  ;;  %v2399_v16 = vpop.f32.mrf.mxu1  ;;  %1073 = vst.msk [vmem:[%s2813_s4 + $0x9c] sm:$0xf] %vm1033_vm2, %v1578_v46 }
 0x101   :  { %1060 = vst.msk [vmem:[%s2813_s4 + $0x68] sm:$0xf] %vm1033_vm2, %v1565_v18  ;;  %v1563_v61 = vpack.c.bf16 %v618_v57, %v618_v57  ;;  %v1256_v63 = vmul.f32 %v618_v57, %v618_v57  ;;  %v1146_v10 = vsel %vm1098_vm3, %v618_v57, 0.0  ;;  %v1347_v1 = vsel %vm1098_vm3, %v1258_v13, 0.0 }
 0x102   :  { %v1340_v0 = vadd.f32 %v1339_v59, %v1338_v56  ;;  %v1145_v3 = vadd.f32 %v1144_v60, %v1143_v34  ;;  %v1824_v4 = vpop.f32.mrf.mxu0  ;;  %v2409_v32 = vpop.f32.mrf.mxu1  ;;  %v1576_v60 = vpack.c.bf16 %v2377_v58, %v2377_v58 }
 0x103   :  { %1058 = vst.msk [vmem:[%s2813_s4 + $0x60] sm:$0xf] %vm1033_vm2, %v1563_v61  ;;  %v1566_v12 = vpack.c.bf16 %v1824_v4, %v1824_v4  ;;  %v1343_v17 = vsel %vm1098_vm3, %v1256_v63, 0.0  ;;  %v1259_v36 = vmul.f32 %v1824_v4, %v1824_v4  ;;  %v1152_v29 = vsel %vm1098_vm3, %v1824_v4, 0.0 }
 0x104   :  { %v1147_v14 = vadd.f32 %v1146_v10, %v1145_v3  ;;  %v1342_v15 = vadd.f32 %v1341_v9, %v1340_v0  ;;  %v621_v2 = vpop.f32.mrf.mxu0  ;;  %v2421_v39 = vpop.f32.mrf.mxu1  ;;  %v1581_v4 = vpack.c.bf16 %v2387_v7, %v2387_v7  ;;  %1071 = vst.msk [vmem:[%s2813_s4 + $0x94] sm:$0xf] %vm1033_vm2, %v1576_v60 }
 0x105   :  { %1061 = vst.msk [vmem:[%s2813_s4 + $0x6c] sm:$0xf] %vm1033_vm2, %v1566_v12  ;;  %v1564_v8 = vpack.c.bf16 %v621_v2, %v621_v2  ;;  %v1148_v22 = vsel %vm1098_vm3, %v621_v2, 0.0  ;;  %v1257_v23 = vmul.f32 %v621_v2, %v621_v2  ;;  %v1349_v47 = vsel %vm1098_vm3, %v1259_v36, 0.0 }
 0x106   :  { %v1344_v24 = vadd.f32 %v1343_v17, %v1342_v15  ;;  %v1149_v27 = vadd.f32 %v1148_v22, %v1147_v14  ;;  %v1827_v28 = vpop.f32.mrf.mxu0  ;;  %v2431_v20 = vpop.f32.mrf.mxu1  ;;  %v1264_v14 = vmul.f32 %v2307_v11, %v2307_v11  ;;  %1076 = vst.msk [vmem:[%s2813_s4 + $0xa8] sm:$0xf] %vm1033_vm2, %v1581_v4  ;;  %v1579_v15 = vpack.c.bf16 %v2399_v16, %v2399_v16 }
 0x107   :  { %1059 = vst.msk [vmem:[%s2813_s4 + $0x64] sm:$0xf] %vm1033_vm2, %v1564_v8  ;;  %v1345_v37 = vsel %vm1098_vm3, %v1257_v23, 0.0  ;;  %v1569_v6 = vpack.c.bf16 %v1827_v28, %v1827_v28  ;;  %v1262_v50 = vmul.f32 %v1827_v28, %v1827_v28  ;;  %v1158_v63 = vsel %vm1098_vm3, %v1827_v28, 0.0 }
 0x108   :  { %v1151_v21 = vadd.f32 %v1150_v35, %v1149_v27  ;;  %v1346_v25 = vadd.f32 %v1345_v37, %v1344_v24  ;;  %v634_v26 = vpop.f32.mrf.mxu0  ;;  %v2443_v54 = vpop.f32.mrf.mxu1  ;;  %v1582_v8 = vpack.c.bf16 %v2409_v32, %v2409_v32  ;;  %v1162_v24 = vsel %vm1098_vm3, %v2307_v11, 0.0  ;;  %1074 = vst.msk [vmem:[%s2813_s4 + $0xa0] sm:$0xf] %vm1033_vm2, %v1579_v15 }
 0x109   :  { %1064 = vst.msk [vmem:[%s2813_s4 + $0x78] sm:$0xf] %vm1033_vm2, %v1569_v6  ;;  %v1567_v40 = vpack.c.bf16 %v634_v26, %v634_v26  ;;  %v1260_v41 = vmul.f32 %v634_v26, %v634_v26  ;;  %v1154_v48 = vsel %vm1098_vm3, %v634_v26, 0.0  ;;  %v1355_v12 = vsel %vm1098_vm3, %v1262_v50, 0.0 }
 0x10a   :  { %v1348_v42 = vadd.f32 %v1347_v1, %v1346_v25  ;;  %v1153_v43 = vadd.f32 %v1152_v29, %v1151_v21  ;;  %v1828_v44 = vpop.f32.mrf.mxu0  ;;  %v2453_v61 = vpop.f32.mrf.mxu1  ;;  %v1265_v27 = vmul.f32 %v2333_v33, %v2333_v33  ;;  %v1580_v28 = vpack.c.bf16 %v2421_v39, %v2421_v39  ;;  %1077 = vst.msk [vmem:[%s2813_s4 + $0xac] sm:$0xf] %vm1033_vm2, %v1582_v8 }
 0x10b   :  { %1062 = vst.msk [vmem:[%s2813_s4 + $0x70] sm:$0xf] %vm1033_vm2, %v1567_v40  ;;  %v1570_v49 = vpack.c.bf16 %v1828_v44, %v1828_v44  ;;  %v1351_v55 = vsel %vm1098_vm3, %v1260_v41, 0.0  ;;  %v1263_v0 = vmul.f32 %v1828_v44, %v1828_v44  ;;  %v1160_v13 = vsel %vm1098_vm3, %v1828_v44, 0.0 }
 0x10c   :  { %v1155_v51 = vadd.f32 %v1154_v48, %v1153_v43  ;;  %v1350_v52 = vadd.f32 %v1349_v47, %v1348_v42  ;;  %v637_v53 = vpop.f32.mrf.mxu0  ;;  %v2467_v10 = vpop.f32.mrf.mxu1  ;;  %v1266_v11 = vmul.f32 %v2297_v62, %v2297_v62  ;;  %v1359_v37 = vsel %vm1098_vm3, %v1264_v14, 0.0  ;;  %1075 = vst.msk [vmem:[%s2813_s4 + $0xa4] sm:$0xf] %vm1033_vm2, %v1580_v28 }
 0x10d   :  { %1065 = vst.msk [vmem:[%s2813_s4 + $0x7c] sm:$0xf] %vm1033_vm2, %v1570_v49  ;;  %v1568_v18 = vpack.c.bf16 %v637_v53, %v637_v53  ;;  %v1156_v34 = vsel %vm1098_vm3, %v637_v53, 0.0  ;;  %v1261_v56 = vmul.f32 %v637_v53, %v637_v53  ;;  %v1357_v23 = vsel %vm1098_vm3, %v1263_v0, 0.0 }
 0x10e   :  { %v1352_v57 = vadd.f32 %v1351_v55, %v1350_v52  ;;  %v1157_v59 = vadd.f32 %v1156_v34, %v1155_v51  ;;  %v2481_v22 = vpop.f32.mrf.mxu1  ;;  %v1164_v6 = vsel %vm1098_vm3, %v2333_v33, 0.0  ;;  %v1585_v21 = vpack.c.bf16 %v2431_v20, %v2431_v20 }
 0x10f   :  { %1063 = vst.msk [vmem:[%s2813_s4 + $0x74] sm:$0xf] %vm1033_vm2, %v1568_v18  ;;  %v1353_v3 = vsel %vm1098_vm3, %v1261_v56, 0.0  ;;  %v1583_v1 = vpack.c.bf16 %v2443_v54, %v2443_v54  ;;  %v1166_v40 = vsel %vm1098_vm3, %v2297_v62, 0.0  ;;  %v1267_v33 = vmul.f32 %v2321_v19, %v2321_v19 }
 0x110   :  { %v1159_v5 = vadd.f32 %v1158_v63, %v1157_v59  ;;  %v1354_v9 = vadd.f32 %v1353_v3, %v1352_v57  ;;  %v2498_v36 = vpop.f32.mrf.mxu1  ;;  %v1361_v41 = vsel %vm1098_vm3, %v1265_v27, 0.0  ;;  %1080 = vst.msk [vmem:[%s2813_s4 + $0xb8] sm:$0xf] %vm1033_vm2, %v1585_v21  ;;  %v1586_v42 = vpack.c.bf16 %v2453_v61, %v2453_v61 }
 0x111   :  { %1078 = vst.msk [vmem:[%s2813_s4 + $0xb0] sm:$0xf] %vm1033_vm2, %v1583_v1  ;;  %v1363_v46 = vsel %vm1098_vm3, %v1266_v11, 0.0  ;;  %v1168_v47 = vsel %vm1098_vm3, %v2321_v19, 0.0  ;;  %v1268_v48 = vmul.f32 %v2355_v45, %v2355_v45  ;;  %v1584_v49 = vpack.c.bf16 %v2467_v10, %v2467_v10 }
 0x112   :  { %v1161_v2 = vadd.f32 %v1160_v13, %v1159_v5  ;;  %v1356_v17 = vadd.f32 %v1355_v12, %v1354_v9  ;;  %v2513_v29 = vpop.f32.mrf.mxu1  ;;  %1081 = vst.msk [vmem:[%s2813_s4 + $0xbc] sm:$0xf] %vm1033_vm2, %v1586_v42  ;;  %v1589_v52 = vpack.c.bf16 %v2481_v22, %v2481_v22  ;;  %v1365_v19 = vsel %vm1098_vm3, %v1267_v33, 0.0 }
 0x113   :  { %v1170_v55 = vsel %vm1098_vm3, %v2355_v45, 0.0  ;;  %v1269_v18 = vmul.f32 %v2377_v58, %v2377_v58  ;;  %1079 = vst.msk [vmem:[%s2813_s4 + $0xb4] sm:$0xf] %vm1033_vm2, %v1584_v49  ;;  %v1587_v34 = vpack.c.bf16 %v2498_v36, %v2498_v36  ;;  %v1270_v45 = vmul.f32 %v2343_v38, %v2343_v38 }
 0x114   :  { %v1358_v31 = vadd.f32 %v1357_v23, %v1356_v17  ;;  %v1163_v35 = vadd.f32 %v1162_v24, %v1161_v2  ;;  %v2530_v62 = vpop.f32.mrf.mxu1  ;;  %1084 = vst.msk [vmem:[%s2813_s4 + $0xc8] sm:$0xf] %vm1033_vm2, %v1589_v52  ;;  %v1367_v60 = vsel %vm1098_vm3, %v1268_v48, 0.0  ;;  %v1172_v63 = vsel %vm1098_vm3, %v2377_v58, 0.0 }
 0x115   :  { %1082 = vst.msk [vmem:[%s2813_s4 + $0xc0] sm:$0xf] %vm1033_vm2, %v1587_v34  ;;  %v1590_v0 = vpack.c.bf16 %v2513_v29, %v2513_v29  ;;  %v1588_v5 = vpack.c.bf16 %v2530_v62, %v2530_v62  ;;  %v1174_v12 = vsel %vm1098_vm3, %v2343_v38, 0.0  ;;  %v1271_v58 = vmul.f32 %v2365_v30, %v2365_v30 }
 0x116   :  { %v1165_v25 = vadd.f32 %v1164_v6, %v1163_v35  ;;  %v1360_v26 = vadd.f32 %v1359_v37, %v1358_v31  ;;  %v2545_v53 = vpop.f32.mrf.mxu1  ;;  %v1369_v13 = vsel %vm1098_vm3, %v1269_v18, 0.0  ;;  %v1371_v17 = vsel %vm1098_vm3, %v1270_v45, 0.0 }
 0x117   :  { %1085 = vst.msk [vmem:[%s2813_s4 + $0xcc] sm:$0xf] %vm1033_vm2, %v1590_v0  ;;  %v1593_v14 = vpack.c.bf16 %v2545_v53, %v2545_v53  ;;  %1083 = vst.msk [vmem:[%s2813_s4 + $0xc4] sm:$0xf] %vm1033_vm2, %v1588_v5  ;;  %v1176_v8 = vsel %vm1098_vm3, %v2365_v30, 0.0  ;;  %v1272_v23 = vmul.f32 %v2399_v16, %v2399_v16  ;;  %v1373_v30 = vsel %vm1098_vm3, %v1271_v58, 0.0 }
 0x118   :  { %v1167_v43 = vadd.f32 %v1166_v40, %v1165_v25  ;;  %v1362_v44 = vadd.f32 %v1361_v41, %v1360_v26  ;;  %v2562_v59 = vpop.f32.mrf.mxu1  ;;  %v1178_v11 = vsel %vm1098_vm3, %v2399_v16, 0.0  ;;  %v1273_v37 = vmul.f32 %v2421_v39, %v2421_v39 }
 0x119   :  { %1088 = vst.msk [vmem:[%s2813_s4 + $0xd8] sm:$0xf] %vm1033_vm2, %v1593_v14  ;;  %v1591_v24 = vpack.c.bf16 %v2562_v59, %v2562_v59  ;;  %v1274_v16 = vmul.f32 %v2387_v7, %v2387_v7  ;;  %v1375_v1 = vsel %vm1098_vm3, %v1272_v23, 0.0  ;;  %v1180_v40 = vsel %vm1098_vm3, %v2421_v39, 0.0 }
 0x11a   :  { %v1364_v50 = vadd.f32 %v1363_v46, %v1362_v44  ;;  %v1169_v51 = vadd.f32 %v1168_v47, %v1167_v43  ;;  %v2577_v9 = vpop.f32.mrf.mxu1  ;;  %v1182_v46 = vsel %vm1098_vm3, %v2387_v7, 0.0  ;;  %v1275_v39 = vmul.f32 %v2409_v32, %v2409_v32 }
 0x11b   :  { %v1594_v31 = vpack.c.bf16 %v2577_v9, %v2577_v9  ;;  %1086 = vst.msk [vmem:[%s2813_s4 + $0xd0] sm:$0xf] %vm1033_vm2, %v1591_v24  ;;  %v1377_v47 = vsel %vm1098_vm3, %v1273_v37, 0.0  ;;  %v1184_v52 = vsel %vm1098_vm3, %v2409_v32, 0.0  ;;  %v1186_v32 = vsel %vm1098_vm3, %v2443_v54, 0.0 }
 0x11c   :  { %v1171_v56 = vadd.f32 %v1170_v55, %v1169_v51  ;;  %v1366_v57 = vadd.f32 %v1365_v19, %v1364_v50  ;;  %v2594_v38 = vpop.f32.mrf.mxu1  ;;  %v1379_v51 = vsel %vm1098_vm3, %v1274_v16, 0.0  ;;  %v1276_v19 = vmul.f32 %v2443_v54, %v2443_v54 }
 0x11d   :  { %v1592_v6 = vpack.c.bf16 %v2594_v38, %v2594_v38  ;;  %1089 = vst.msk [vmem:[%s2813_s4 + $0xdc] sm:$0xf] %vm1033_vm2, %v1594_v31  ;;  %v1277_v45 = vmul.f32 %v2467_v10, %v2467_v10  ;;  %v1188_v5 = vsel %vm1098_vm3, %v2467_v10, 0.0  ;;  %v1282_v16 = vmul.f32 %v2481_v22, %v2481_v22 }
 0x11e   :  { %v1368_v3 = vadd.f32 %v1367_v60, %v1366_v57  ;;  %v1173_v4 = vadd.f32 %v1172_v63, %v1171_v56  ;;  %v2609_v35 = vpop.f32.mrf.mxu1  ;;  %v1381_v57 = vsel %vm1098_vm3, %v1275_v39, 0.0  ;;  %v1383_v54 = vsel %vm1098_vm3, %v1276_v19, 0.0 }
 0x11f   :  { %1087 = vst.msk [vmem:[%s2813_s4 + $0xd4] sm:$0xf] %vm1033_vm2, %v1592_v6  ;;  %v1597_v33 = vpack.c.bf16 %v2609_v35, %v2609_v35  ;;  %v1385_v10 = vsel %vm1098_vm3, %v1277_v45, 0.0  ;;  %v1194_v6 = vsel %vm1098_vm3, %v2498_v36, 0.0  ;;  %v1206_v45 = vsel %vm1098_vm3, %v2545_v53, 0.0 }
 0x120   :  { %v1175_v15 = vadd.f32 %v1174_v12, %v1173_v4  ;;  %v1370_v2 = vadd.f32 %v1369_v13, %v1368_v3  ;;  %v2626_v26 = vpop.f32.mrf.mxu1  ;;  %v1278_v4 = vmul.f32 %v2431_v20, %v2431_v20 }
 0x121   :  { %v1595_v43 = vpack.c.bf16 %v2626_v26, %v2626_v26  ;;  %1092 = vst.msk [vmem:[%s2813_s4 + $0xe8] sm:$0xf] %vm1033_vm2, %v1597_v33 }
 0x122   :  { %v1372_v27 = vadd.f32 %v1371_v17, %v1370_v2  ;;  %v1177_v28 = vadd.f32 %v1176_v8, %v1175_v15  ;;  %v2641_v44 = vpop.f32.mrf.mxu1  ;;  %v1190_v15 = vsel %vm1098_vm3, %v2431_v20, 0.0  ;;  %v1279_v2 = vmul.f32 %v2453_v61, %v2453_v61 }
 0x123   :  { %v1598_v48 = vpack.c.bf16 %v2641_v44, %v2641_v44  ;;  %1090 = vst.msk [vmem:[%s2813_s4 + $0xe0] sm:$0xf] %vm1033_vm2, %v1595_v43  ;;  %v1192_v20 = vsel %vm1098_vm3, %v2453_v61, 0.0  ;;  %v1281_v61 = vmul.f32 %v2530_v62, %v2530_v62 }
 0x124   :  { %v1179_v21 = vadd.f32 %v1178_v11, %v1177_v28  ;;  %v1374_v25 = vadd.f32 %v1373_v30, %v1372_v27  ;;  %v2658_v7 = vpop.f32.mrf.mxu1  ;;  %v1387_v27 = vsel %vm1098_vm3, %v1278_v4, 0.0  ;;  %v1280_v28 = vmul.f32 %v2498_v36, %v2498_v36 }
 0x125   :  { %1093 = vst.msk [vmem:[%s2813_s4 + $0xec] sm:$0xf] %vm1033_vm2, %v1598_v48  ;;  %v1596_v55 = vpack.c.bf16 %v2658_v7, %v2658_v7  ;;  %v1389_v37 = vsel %vm1098_vm3, %v1279_v2, 0.0  ;;  %v1393_v43 = vsel %vm1098_vm3, %v1281_v61, 0.0  ;;  %v1200_v48 = vsel %vm1098_vm3, %v2513_v29, 0.0 }
 0x126   :  { %v1376_v41 = vadd.f32 %v1375_v1, %v1374_v25  ;;  %v1181_v42 = vadd.f32 %v1180_v40, %v1179_v21  ;;  %v2671_v56 = vpop.f32.mrf.mxu1  ;;  %v1391_v1 = vsel %vm1098_vm3, %v1280_v28, 0.0  ;;  %v1196_v40 = vsel %vm1098_vm3, %v2530_v62, 0.0 }
 0x127   :  { %1091 = vst.msk [vmem:[%s2813_s4 + $0xe4] sm:$0xf] %vm1033_vm2, %v1596_v55  ;;  %v1601_v60 = vpack.c.bf16 %v2671_v56, %v2671_v56  ;;  %v1284_v62 = vmul.f32 %v2562_v59, %v2562_v59 }
 0x128   :  { %v1183_v49 = vadd.f32 %v1182_v46, %v1181_v42  ;;  %v1378_v50 = vadd.f32 %v1377_v47, %v1376_v41  ;;  %v2684_v3 = vpop.f32.mrf.mxu1  ;;  %v1198_v41 = vsel %vm1098_vm3, %v2481_v22, 0.0  ;;  %v1283_v42 = vmul.f32 %v2513_v29, %v2513_v29 }
 0x129   :  { %1096 = vst.msk [vmem:[%s2813_s4 + $0xf8] sm:$0xf] %vm1033_vm2, %v1601_v60  ;;  %v1599_v12 = vpack.c.bf16 %v2684_v3, %v2684_v3  ;;  %v1395_v47 = vsel %vm1098_vm3, %v1282_v16, 0.0  ;;  %v1202_v22 = vsel %vm1098_vm3, %v2562_v59, 0.0  ;;  %v1399_v29 = vsel %vm1098_vm3, %v1284_v62, 0.0 }
 0x12a   :  { %v1380_v18 = vadd.f32 %v1379_v51, %v1378_v50  ;;  %v1185_v34 = vadd.f32 %v1184_v52, %v1183_v49  ;;  %v2697_v14 = vpop.f32.mrf.mxu1  ;;  %v1397_v51 = vsel %vm1098_vm3, %v1283_v42, 0.0  ;;  %v1285_v52 = vmul.f32 %v2594_v38, %v2594_v38 }
 0x12b   :  { %1094 = vst.msk [vmem:[%s2813_s4 + $0xf0] sm:$0xf] %vm1033_vm2, %v1599_v12  ;;  %v1602_v17 = vpack.c.bf16 %v2697_v14, %v2697_v14  ;;  %v1287_v59 = vmul.f32 %v2577_v9, %v2577_v9 }
 0x12c   :  { %v1187_v63 = vadd.f32 %v1186_v32, %v1185_v34  ;;  %v1382_v0 = vadd.f32 %v1381_v57, %v1380_v18  ;;  %v2710_v24 = vpop.f32.mrf.mxu1  ;;  %v1286_v18 = vmul.f32 %v2545_v53, %v2545_v53  ;;  %v1204_v34 = vsel %vm1098_vm3, %v2594_v38, 0.0 }
 0x12d   :  { %1097 = vst.msk [vmem:[%s2813_s4 + $0xfc] sm:$0xf] %vm1033_vm2, %v1602_v17  ;;  %v1600_v31 = vpack.c.bf16 %v2710_v24, %v2710_v24  ;;  %v1401_v60 = vsel %vm1098_vm3, %v1285_v52, 0.0  ;;  %v1288_v38 = vmul.f32 %v2626_v26, %v2626_v26  ;;  %v1210_v53 = vsel %vm1098_vm3, %v2626_v26, 0.0 }
 0x12e   :  { %v1384_v58 = vadd.f32 %v1383_v54, %v1382_v0  ;;  %v1189_v13 = vadd.f32 %v1188_v5, %v1187_v63  ;;  %v1403_v4 = vsel %vm1098_vm3, %v1286_v18, 0.0  ;;  %v1208_v54 = vsel %vm1098_vm3, %v2577_v9, 0.0 }
 0x12f   :  { %1095 = vst.msk [vmem:[%s2813_s4 + $0xf4] sm:$0xf] %vm1033_vm2, %v1600_v31  ;;  %v1407_v9 = vsel %vm1098_vm3, %v1288_v38, 0.0  ;;  %v1212_v17 = vsel %vm1098_vm3, %v2658_v7, 0.0  ;;  %v1291_v26 = vmul.f32 %v2641_v44, %v2641_v44 }
 0x130   :  { %v1191_v8 = vadd.f32 %v1190_v15, %v1189_v13  ;;  %v1386_v23 = vadd.f32 %v1385_v10, %v1384_v58  ;;  %v1405_v58 = vsel %vm1098_vm3, %v1287_v59, 0.0  ;;  %v1289_v13 = vmul.f32 %v2658_v7, %v2658_v7 }
 0x131   :  { %v1290_v10 = vmul.f32 %v2609_v35, %v2609_v35  ;;  %v1292_v7 = vmul.f32 %v2684_v3, %v2684_v3  ;;  %v1413_v61 = vsel %vm1098_vm3, %v1291_v26, 0.0 }
 0x132   :  { %v1388_v30 = vadd.f32 %v1387_v27, %v1386_v23  ;;  %v1193_v11 = vadd.f32 %v1192_v20, %v1191_v8  ;;  %v1214_v27 = vsel %vm1098_vm3, %v2609_v35, 0.0  ;;  %v1409_v20 = vsel %vm1098_vm3, %v1289_v13, 0.0 }
 0x133   :  { %v1218_v35 = vsel %vm1098_vm3, %v2684_v3, 0.0  ;;  %v1295_v3 = vmul.f32 %v2697_v14, %v2697_v14 }
 0x134   :  { %v1195_v21 = vadd.f32 %v1194_v6, %v1193_v11  ;;  %v1390_v25 = vadd.f32 %v1389_v37, %v1388_v30  ;;  %v1411_v30 = vsel %vm1098_vm3, %v1290_v10, 0.0  ;;  %v1216_v11 = vsel %vm1098_vm3, %v2641_v44, 0.0 }
 0x135   :  { %v1415_v44 = vsel %vm1098_vm3, %v1292_v7, 0.0 }
 0x136   :  { %v1392_v33 = vadd.f32 %v1391_v1, %v1390_v25  ;;  %v1197_v36 = vadd.f32 %v1196_v40, %v1195_v21  ;;  %v1293_v21 = vmul.f32 %v2710_v24, %v2710_v24  ;;  %v1294_v1 = vmul.f32 %v2671_v56, %v2671_v56 }
 0x137   :  { %v1220_v40 = vsel %vm1098_vm3, %v2710_v24, 0.0  ;;  %v1421_v24 = vsel %vm1098_vm3, %v1295_v3, 0.0 }
 0x138   :  { %v1199_v46 = vadd.f32 %v1198_v41, %v1197_v36  ;;  %v1394_v39 = vadd.f32 %v1393_v43, %v1392_v33  ;;  %v1222_v41 = vsel %vm1098_vm3, %v2671_v56, 0.0  ;;  %v1417_v42 = vsel %vm1098_vm3, %v1293_v21, 0.0 }
 0x13a   :  { %v1396_v49 = vadd.f32 %v1395_v47, %v1394_v39  ;;  %v1201_v50 = vadd.f32 %v1200_v48, %v1199_v46  ;;  %v1419_v39 = vsel %vm1098_vm3, %v1294_v1, 0.0  ;;  %v1224_v47 = vsel %vm1098_vm3, %v2697_v14, 0.0 }
 0x13c   :  { %v1203_v19 = vadd.f32 %v1202_v22, %v1201_v50  ;;  %v1398_v55 = vadd.f32 %v1397_v51, %v1396_v49 }
 0x13e   :  { %v1400_v57 = vadd.f32 %v1399_v29, %v1398_v55  ;;  %v1205_v32 = vadd.f32 %v1204_v34, %v1203_v19 }
 0x140   :  { %v1207_v63 = vadd.f32 %v1206_v45, %v1205_v32  ;;  %v1402_v0 = vadd.f32 %v1401_v60, %v1400_v57 }
 0x142   :  { %v1404_v5 = vadd.f32 %v1403_v4, %v1402_v0  ;;  %v1209_v12 = vadd.f32 %v1208_v54, %v1207_v63 }
 0x144   :  { %v1211_v15 = vadd.f32 %v1210_v53, %v1209_v12  ;;  %v1406_v2 = vadd.f32 %v1405_v58, %v1404_v5 }
 0x146   :  { %v1408_v8 = vadd.f32 %v1407_v9, %v1406_v2  ;;  %v1213_v23 = vadd.f32 %v1212_v17, %v1211_v15 }
 0x148   :  { %v1215_v28 = vadd.f32 %v1214_v27, %v1213_v23  ;;  %v1410_v31 = vadd.f32 %v1409_v20, %v1408_v8 }
 0x14a   :  { %v1412_v37 = vadd.f32 %v1411_v30, %v1410_v31  ;;  %v1217_v6 = vadd.f32 %v1216_v11, %v1215_v28 }
 0x14c   :  { %v1219_v25 = vadd.f32 %v1218_v35, %v1217_v6  ;;  %v1414_v16 = vadd.f32 %v1413_v61, %v1412_v37 }
 0x14e   :  { %v1416_v33 = vadd.f32 %v1415_v44, %v1414_v16  ;;  %v1221_v36 = vadd.f32 %v1220_v40, %v1219_v25 }
 0x150   :  { %v1223_v43 = vadd.f32 %v1222_v41, %v1221_v36  ;;  %v1418_v46 = vadd.f32 %v1417_v42, %v1416_v33 }
 0x152   :  { %v1225_v48 = vadd.f32 %v1224_v47, %v1223_v43  ;;  %v1420_v62 = vadd.f32 %v1419_v39, %v1418_v46 }
 0x154   :  { %v1226_v49 = vrot.slane %v1225_v48, 4  ;;  %v1422_v50 = vadd.f32 %v1421_v24, %v1420_v62 }
 0x156   :  { %v1227_v51 = vadd.f32 %v1226_v49, %v1225_v48  ;;  %v1423_v56 = vrot.slane %v1422_v50, 4 }
 0x158   :  { %v1228_v22 = vrot.slane %v1227_v51, 2  ;;  %v1424_v52 = vadd.f32 %v1423_v56, %v1422_v50 }
 0x15a   :  { %v1229_v19 = vadd.f32 %v1228_v22, %v1227_v51  ;;  %v1425_v55 = vrot.slane %v1424_v52, 2 }
 0x15c   :  { %v1230_v18 = vrot.slane %v1229_v19, 1  ;;  %v1426_v29 = vadd.f32 %v1425_v55, %v1424_v52 }
 0x15e   :  { %v1427_v34 = vrot.slane %v1426_v29, 1  ;;  %v1231_v57 = vadd.f32 %v1230_v18, %v1229_v19 }
 0x160   :  { %v1428_v32 = vadd.f32 %v1427_v34, %v1426_v29 }
 0x162   :  { %v1430_v14 = vsel %vm1429_vm4, %v1231_v57, %v1428_v32 }
 0x163   :  { %1432 = vst.msk [vmem:[%s2814_s5] sm:$0x3] %vm1431_vm5, %v1430_v14 }

// kernel: expansion_resblock_nhwc.5
= control target key start
LH: loop header
LB: loop body
LE: loop exit
PB: predicated region body
PF: predicated region fallthrough
CT: control target
= control target key end

     0   :  { %s2946_s24 = smov 0   ;;  %s2948_s25 = smov 0   ;;  %s3877_s0 = inlined_call_operand.vmem [shape: bf16[2,16,16,4], index: 0, kind: input, shape index: {}, may-alias: {0,1,2}]   ;;  %s3878_s1 = inlined_call_operand.vmem [shape: bf16[2,16,16,4], index: 1, kind: input, shape index: {}, may-alias: {0,1,2}]   ;;  %s3879_s2 = inlined_call_operand.vmem [shape: bf16[2,16,16,4], index: 2, kind: input, shape index: {}, may-alias: {0,1,2}]   ;;  %s3880_s3 = inlined_call_operand.vmem [shape: f32[1,4], index: 3, kind: input, shape index: {}]   ;;  %s3881_s4 = inlined_call_operand.vmem [shape: f32[1,4], index: 4, kind: input, shape index: {}]   ;;  %s3882_s5 = inlined_call_operand.vmem [shape: bf16[9,4,4], index: 5, kind: input, shape index: {}]   ;;  %s3883_s6 = inlined_call_operand.vmem [shape: bf16[2,256,4], index: 6, kind: output, shape index: {0}]   ;;  %s3884_s7 = inlined_call_operand.vmem [shape: f32[2,2,2,4], index: 7, kind: output, shape index: {1}]  }
   0x1   :  { %s2950_s26 = smov 0   ;;  %s2952_s27 = smov 0  }
   0x2   :  { %s2954_s28 = smov 0  }
   0x3 LB: > { %s27_s29 = sadd.s32 1, %s2896_s26  ;;  %s30_s30 = sadd.s32 1, %s2900_s27  ;;  %s2904_s28 = sphi %s2954_s28, %s18_s28   ;;  %s2900_s27 = sphi %s2952_s27, %s3927_s27   ;;  %s2896_s26 = sphi %s2950_s26, %s3926_s26   ;;  %s2892_s25 = sphi %s2948_s25, %s3925_s25   ;;  %s2888_s24 = sphi %s2946_s24, %s3924_s24  }
   0x4   : > { %p28_p0 = scmp.ge.s32.totalorder %s27_s29, 2  ;;  %p2373_p1 = scmp.ge.s32.totalorder %s2904_s28, 1 }
   0x5   : > { %p328_p2 = scmp.lt.s32.totalorder %s2904_s28, 5 }
   0x6   : > { %s3929_s29 = smov (%p28_p0, %s27_s29), 0  ;;  %s3931_s30 = smov (!%p28_p0, %s30_s30), %s2900_s27 }
   0x7   : > { %p329_p3 = pnand %p2373_p1, %p328_p2  ;;  %p32_p4 = scmp.ge.s32.totalorder %s3931_s30, 2 }
   0x9   : > { %s3933_s30 = smov (%p32_p4, %s3931_s30), 0  ;;  %332 = sbr.rel (%p329_p3) target bundleno = 422 (0x1a6), region = 44 }
   0xe   : > { %v2402_v0 = vld [vmem:[%s3882_s5 + $0x2] sm:$0x3]  ;;  %vm811_vm0 = vcmask 1041408   ;;  %s2982_s10 = sshll.u32 %s2888_s24, 3  ;;  %p407_p5 = scmp.lt.s32.totalorder %s2892_s25, 1  ;;  %vm613_vm1 = vcmask 1040384  }
   0xf   : > { %2817 = vmatprep.subr.msk.bf16.mxu1 %vm811_vm0, %v2402_v0  ;;  %v813_v1 = vsel %vm811_vm0, %v2402_v0, 0  ;;  %p423_p6 = scmp.lt.s32.totalorder %s2982_s10, 15  ;;  %2816 = vmatprep.subr.msk.bf16.mxu0 %vm811_vm0, %v2402_v0  ;;  %v2993_v2 = vld [vmem:[%s3882_s5] sm:$0x3]  ;;  %v3001_v3 = vld [vmem:[%s3882_s5 + $0x4] sm:$0x3] }
  0x10   : > { %2815 = vmatpush3.bf16.msra.mxu1 %v813_v1  ;;  %s3935_s25 = smov (!%p407_p5, %s2892_s25), 1  ;;  %2653 = vmatpush3.bf16.msra.mxu0 %v813_v1  ;;  %s3009_s18 = sadd.s32 4294967295, %s2982_s10  ;;  %v3021_v4 = vld [vmem:[%s3880_s3] ss:$0 sm:$0xff]  ;;  %vm719_vm2 = vcmask 1046528   ;;  %vm786_vm3 = vcmask 31744  }
  0x11   : > { %s424_s13 = scalar_select %p423_p6, %s2982_s10, 15  ;;  %2818 = vmatprep.subr.msk.bf16.mxu1 %vm811_vm0, %v2993_v2  ;;  %2819 = vmatprep.subr.msk.bf16.mxu0 %vm811_vm0, %v3001_v3  ;;  %v3032_v13 = vld [vmem:[%s3881_s4] ss:$0 sm:$0xff]  ;;  %v937_v45 = vsel %vm811_vm0, %v2993_v2, 0  ;;  %vm1036_vm4 = vcmask 1045504   ;;  %vm2071_vm5 = vcmask 27648  }
  0x12   : > { %s3004_s16 = sshll.u32 %s3935_s25, 5  ;;  %p405_p7 = scmp.gt.s32.totalorder %s3009_s18, 0  ;;  %vm2179_vm6 = vcmask 25600  }
  0x13   : > { %s2385_s17 = sshll.u32 %s424_s13, 1  ;;  %p2376_p8 = scmp.lt.s32.totalorder %s3009_s18, 15 }
  0x14   : > { %s427_s19 = sadd.s32 %s2385_s17, %s3004_s16  ;;  %p571_p9 = scmp.gt.s32.totalorder %s2888_s24, 0 }
  0x15   : > { %s2387_s20 = sshll.u32 %s427_s19, 2  ;;  %s2507_s14 = sadd.s32 8, %s2982_s10 }
  0x16   : > { %s3016_s23 = scalar_lea.vmem %s3878_s1, %s2387_s20  ;;  %p3062_p10 = scmp.lt.s32.totalorder %s2507_s14, 15 }
  0x17   : > { %v2566_v5 = vld [vmem:[%s3016_s23 + $0x18] sm:$0xff]   ;;  %v2567_v6 = vld [vmem:[%s3016_s23 + $0x20] sm:$0xff]   ;;  %s406_s11 = scalar_select %p405_p7, %s3009_s18, 0  ;;  %v2568_v12 = vld [vmem:[%s3016_s23 + $0x28] sm:$0xff]  }
  0x18   : > { %v2525_v7 = vld [vmem:[%s3016_s23] sm:$0xff]   ;;  %v2538_v8 = vunpack.c.l.bf16 %v2566_v5  ;;  %v2539_v9 = vunpack.c.h.bf16 %v2566_v5  ;;  %v2542_v10 = vunpack.c.l.bf16 %v2567_v6  ;;  %v2543_v11 = vunpack.c.h.bf16 %v2567_v6  ;;  %s3052_s15 = scalar_select %p571_p9, 1, 0 }
  0x19   : > { %v2526_v14 = vunpack.c.l.bf16 %v2525_v7  ;;  %v2527_v15 = vunpack.c.h.bf16 %v2525_v7  ;;  %v2546_v16 = vunpack.c.l.bf16 %v2568_v12  ;;  %v2547_v17 = vunpack.c.h.bf16 %v2568_v12  ;;  %s3937_s11 = smov (!%p2376_p8, %s406_s11), 15  ;;  %p460_p11 = scmp.lt.s32.totalorder %s2888_s24, 1 }
  0x1a   : > { %v513_v18 = vmul.f32 %v2538_v8, %v3021_v4  ;;  %v514_v19 = vmul.f32 %v2539_v9, %v3021_v4  ;;  %v515_v20 = vmul.f32 %v2542_v10, %v3021_v4  ;;  %v516_v21 = vmul.f32 %v2543_v11, %v3021_v4  ;;  %s2381_s17 = sshll.u32 %s3937_s11, 1  ;;  %s2398_s9 = sshll.u32 %s3935_s25, 1 }
  0x1b   : > { %v507_v22 = vmul.f32 %v2526_v14, %v3021_v4  ;;  %v508_v23 = vmul.f32 %v2527_v15, %v3021_v4  ;;  %v517_v24 = vmul.f32 %v2546_v16, %v3021_v4  ;;  %v518_v25 = vmul.f32 %v2547_v17, %v3021_v4  ;;  %s413_s19 = sadd.s32 %s3004_s16, %s2381_s17  ;;  %s3939_s14 = smov (!%p3062_p10, %s2507_s14), 15  ;;  %v2569_v17 = vld [vmem:[%s3016_s23 + $0x30] sm:$0xff]  }
  0x1c   : > { %v535_v26 = vadd.f32 %v3032_v13, %v513_v18  ;;  %v536_v27 = vadd.f32 %v3032_v13, %v514_v19  ;;  %v537_v28 = vadd.f32 %v3032_v13, %v515_v20  ;;  %v538_v29 = vadd.f32 %v3032_v13, %v516_v21  ;;  %s2383_s20 = sshll.u32 %s413_s19, 2  ;;  %s3941_s14 = smov (!%p3062_p10, %s3939_s14), 15  ;;  %v3144_v21 = vld [vmem:[%s3882_s5 + $0x6] sm:$0x3] }
  0x1d   : > { %v529_v30 = vadd.f32 %v3032_v13, %v507_v22  ;;  %v530_v31 = vadd.f32 %v3032_v13, %v508_v23  ;;  %v539_v32 = vadd.f32 %v3032_v13, %v517_v24  ;;  %v3058_v33 = vadd.f32 %v3032_v13, %v518_v25  ;;  %s415_s8 = scalar_lea.vmem %s3877_s0, %s2383_s20  ;;  %s573_s10 = scvt.s32.f32 %s3052_s15 }
  0x1e   : > { %v551_v34 = vmax.f32 %v535_v26, 0.0  ;;  %v552_v35 = vmax.f32 %v536_v27, 0.0  ;;  %v553_v36 = vmax.f32 %v537_v28, 0.0  ;;  %v554_v37 = vmax.f32 %v538_v29, 0.0  ;;  %v2557_v53 = vld [vmem:[%s415_s8] sm:$0xff]   ;;  %s461_s25 = scalar_select %p460_p11, %s2888_s24, 1 }
  0x1f   : > { %v545_v38 = vmax.f32 %v529_v30, 0.0  ;;  %v546_v39 = vmax.f32 %v530_v31, 0.0  ;;  %v555_v40 = vmax.f32 %v539_v32, 0.0  ;;  %v556_v48 = vmax.f32 %v3058_v33, 0.0  ;;  %s3119_s12 = sshll.u32 %s3941_s14, 1  ;;  %v2564_v32 = vld [vmem:[%s3016_s23 + $0x8] sm:$0xff]  }
  0x20   : > { %v626_v41 = vrot.slane %v551_v34, 7  ;;  %v627_v42 = vrot.slane %v552_v35, 7  ;;  %v629_v43 = vrot.slane %v553_v36, 7  ;;  %v630_v44 = vrot.slane %v554_v37, 7  ;;  %s3111_s11 = sadd.s32 %s2398_s9, %s461_s25  ;;  %s441_s13 = sadd.s32 %s3119_s12, %s3004_s16 }
  0x21   : > { %v617_v46 = vrot.slane %v545_v38, 7  ;;  %v618_v47 = vrot.slane %v546_v39, 7  ;;  %v632_v57 = vrot.slane %v555_v40, 7  ;;  %v2558_v61 = vunpack.c.l.bf16 %v2557_v53  ;;  %s2394_s19 = sshll.u32 %s441_s13, 2  ;;  %s2395_s18 = sshll.u32 %s2888_s24, 4 }
  0x22   : > { %v3076_v49 = vsel %vm613_vm1, %v626_v41, %v627_v42  ;;  %v3079_v50 = vsel %vm613_vm1, 0.0, %v626_v41  ;;  %v3082_v51 = vsel %vm613_vm1, %v627_v42, 0.0  ;;  %v3085_v52 = vsel %vm613_vm1, %v629_v43, %v630_v44  ;;  %s443_s9 = scalar_lea.vmem %s3879_s2, %s2394_s19  ;;  %p451_p12 = scmp.lt.s32.totalorder %s2395_s18, 31 }
  0x23   : > { %v740_v54 = vrot.slane %v3079_v50, 1  ;;  %v741_v55 = vrot.slane %v3076_v49, 1  ;;  %v743_v56 = vrot.slane %v3082_v51, 1  ;;  %v3098_v58 = vsel %vm613_vm1, 0.0, %v629_v43  ;;  %s3296_s25 = scalar_select %p460_p11, 1, 0 }
  0x24   : > { %v3101_v59 = vsel %vm613_vm1, %v630_v44, 0.0  ;;  %v746_v60 = vrot.slane %v3085_v52, 1  ;;  %v745_v0 = vrot.slane %v3098_v58, 1  ;;  %v2559_v5 = vunpack.c.h.bf16 %v2557_v53  ;;  %s3943_s18 = smov (!%p451_p12, %s2395_s18), 31  ;;  %s2399_s22 = sshll.u32 %s3111_s11, 1 }
  0x25   : > { %v742_v62 = vsel %vm719_vm2, %v740_v54, %v741_v55  ;;  %v744_v63 = vsel %vm719_vm2, %v741_v55, %v743_v56  ;;  %v748_v1 = vrot.slane %v3101_v59, 1  ;;  %v565_v6 = vmul.f32 %v2558_v61, %v3021_v4  ;;  %s454_s24 = sadd.s32 %s3004_s16, %s3943_s18 }
  0x26   : > { %v3113_v2 = vpack.c.bf16 %v744_v63, %v742_v62  ;;  %v3117_v7 = vsel %vm613_vm1, %v617_v46, %v618_v47  ;;  %v747_v8 = vsel %vm719_vm2, %v745_v0, %v746_v60  ;;  %v3124_v10 = vsel %vm613_vm1, 0.0, %v617_v46  ;;  %v2565_v63 = vld [vmem:[%s3016_s23 + $0x10] sm:$0xff]   ;;  %s2397_s16 = sshll.u32 %s454_s24, 2 }
  0x27   : > { %v749_v9 = vsel %vm719_vm2, %v746_v60, %v748_v1  ;;  %v3127_v11 = vsel %vm613_vm1, %v618_v47, 0.0  ;;  %v566_v14 = vmul.f32 %v2559_v5, %v3021_v4  ;;  %v567_v15 = vadd.f32 %v3032_v13, %v565_v6  ;;  %s3754_s21 = scalar_lea.vmem %s3883_s6, %s2397_s16 }
  0x28   : > { %2662 = vmatprep.mubr.msk.bf16.mxu1 %vm786_vm3, %v3113_v2  ;;  %v3133_v12 = vpack.c.bf16 %v749_v9, %v747_v8  ;;  %v725_v16 = vrot.slane %v3124_v10, 1  ;;  %v574_v18 = vstv %s573_s10  ;;  %v726_v19 = vrot.slane %v3117_v7, 1 }
  0x29   : > { %v728_v20 = vrot.slane %v3127_v11, 1  ;;  %v568_v22 = vadd.f32 %v3032_v13, %v566_v14  ;;  %v569_v23 = vmax.f32 %v567_v15, 0.0  ;;  %v633_v24 = vrot.slane %v556_v48, 7 }
  0x2a   : > { %2663 = vmatmul.mubr.msk.bf16.vlgmr.msra.gmra.mxu1 %vm786_vm3, %v3133_v12  ;;  %v727_v25 = vsel %vm719_vm2, %v725_v16, %v726_v19  ;;  %v3151_v26 = vsel %vm613_vm1, 0.0, %v632_v57  ;;  %v2550_v27 = vunpack.c.l.bf16 %v2569_v17  ;;  %v2551_v36 = vunpack.c.h.bf16 %v2569_v17 }
  0x2b   : > { %2671 = vmatpush3.bf16.msra.mxu1 %v937_v45  ;;  %v570_v28 = vmax.f32 %v568_v22, 0.0  ;;  %v575_v29 = vmul.f32 %v574_v18, %v569_v23  ;;  %v729_v30 = vsel %vm719_vm2, %v726_v19, %v728_v20  ;;  %v3155_v31 = vsel %vm613_vm1, %v632_v57, %v633_v24 }
  0x2c   : > { %2820 = vmatprep.subr.msk.bf16.mxu1 %vm811_vm0, %v3144_v21  ;;  %v3161_v33 = vsel %vm613_vm1, %v633_v24, 0.0  ;;  %v750_v34 = vrot.slane %v3151_v26, 1  ;;  %v751_v35 = vrot.slane %v3155_v31, 1  ;;  %v519_v40 = vmul.f32 %v2550_v27, %v3021_v4 }
  0x2d   : > { %v576_v37 = vmul.f32 %v574_v18, %v570_v28  ;;  %v614_v38 = vrot.slane %v575_v29, 7  ;;  %v753_v39 = vrot.slane %v3161_v33, 1  ;;  %v520_v42 = vmul.f32 %v2551_v36, %v3021_v4 }
  0x2e   : > { %v752_v41 = vsel %vm719_vm2, %v750_v34, %v751_v35  ;;  %v2530_v43 = vunpack.c.l.bf16 %v2564_v32  ;;  %v2531_v44 = vunpack.c.h.bf16 %v2564_v32  ;;  %v541_v48 = vadd.f32 %v3032_v13, %v519_v40 }
  0x2f   : > { %v615_v45 = vrot.slane %v576_v37, 7  ;;  %v3170_v46 = vsel %vm613_vm1, 0.0, %v614_v38  ;;  %v754_v47 = vsel %vm719_vm2, %v751_v35, %v753_v39  ;;  %v1128_v54 = vsel %vm811_vm0, %v3001_v3, 0  ;;  %v3214_v35 = vld [vmem:[%s3882_s5 + $0x8] sm:$0x3] }
  0x30   : > { %v720_v53 = vrot.slane %v3170_v46, 1  ;;  %v3177_v55 = vpack.c.bf16 %v754_v47, %v752_v41  ;;  %v542_v56 = vadd.f32 %v3032_v13, %v520_v42  ;;  %v557_v61 = vmax.f32 %v541_v48, 0.0 }
  0x31   : > { %v3181_v57 = vsel %vm613_vm1, %v614_v38, %v615_v45  ;;  %v684_v60 = vsel %vm613_vm1, %v615_v45, 0.0  ;;  %v509_v62 = vmul.f32 %v2530_v43, %v3021_v4  ;;  %v1037_v5 = vrot.slane %v3170_v46, 2 }
  0x32   : > { %v721_v0 = vrot.slane %v3181_v57, 1  ;;  %v723_v1 = vrot.slane %v684_v60, 1  ;;  %v3188_v6 = vpack.c.bf16 %v729_v30, %v727_v25  ;;  %2666 = vmatprep.mubr.msk.bf16.mxu1 %vm786_vm3, %v3177_v55  ;;  %v558_v3 = vmax.f32 %v542_v56, 0.0 }
  0x33   : > { %v635_v8 = vrot.slane %v557_v61, 7  ;;  %v510_v9 = vmul.f32 %v2531_v44, %v3021_v4  ;;  %v531_v14 = vadd.f32 %v3032_v13, %v509_v62  ;;  %v2534_v17 = vunpack.c.l.bf16 %v2565_v63 }
  0x34   : > { %v722_v15 = vsel %vm719_vm2, %v720_v53, %v721_v0  ;;  %v724_v16 = vsel %vm719_vm2, %v721_v0, %v723_v1  ;;  %v2535_v18 = vunpack.c.h.bf16 %v2565_v63  ;;  %v636_v20 = vrot.slane %v558_v3, 7 }
  0x35   : > { %v776_v19 = vpack.c.bf16 %v724_v16, %v722_v15  ;;  %v3197_v22 = vsel %vm613_vm1, 0.0, %v635_v8  ;;  %v532_v23 = vadd.f32 %v3032_v13, %v510_v9  ;;  %v547_v25 = vmax.f32 %v531_v14, 0.0 }
  0x36   : > { %v755_v24 = vrot.slane %v3197_v22, 1  ;;  %v511_v27 = vmul.f32 %v2534_v17, %v3021_v4  ;;  %v512_v28 = vmul.f32 %v2535_v18, %v3021_v4  ;;  %v1038_v29 = vrot.slane %v3181_v57, 2 }
  0x37   : > { %2654 = vmatprep.mubr.msk.bf16.mxu0 %vm786_vm3, %v776_v19  ;;  %v3206_v30 = vsel %vm613_vm1, %v635_v8, %v636_v20  ;;  %v3209_v32 = vsel %vm613_vm1, %v636_v20, 0.0  ;;  %v548_v34 = vmax.f32 %v532_v23, 0.0  ;;  %v620_v38 = vrot.slane %v547_v25, 7 }
  0x38   : > { %2655 = vmatmul.mubr.msk.bf16.vlgmr.msra.gmra.mxu0 %vm786_vm3, %v3188_v6  ;;  %v756_v36 = vrot.slane %v3206_v30, 1  ;;  %v758_v37 = vrot.slane %v3209_v32, 1  ;;  %v533_v39 = vadd.f32 %v3032_v13, %v511_v27  ;;  %v1040_v40 = vrot.slane %v684_v60, 2 }
  0x39   : > { %2689 = vmatpush3.bf16.msra.mxu0 %v1128_v54  ;;  %v621_v41 = vrot.slane %v548_v34, 7  ;;  %v534_v42 = vadd.f32 %v3032_v13, %v512_v28  ;;  %v694_v43 = vpack.c.bf16 %v3181_v57, %v3170_v46  ;;  %v676_v47 = vsel %vm613_vm1, 0.0, %v620_v38 }
  0x3a   : > { %v757_v44 = vsel %vm719_vm2, %v755_v24, %v756_v36  ;;  %v759_v45 = vsel %vm719_vm2, %v756_v36, %v758_v37  ;;  %v549_v48 = vmax.f32 %v533_v39, 0.0  ;;  %2821 = vmatprep.subr.msk.bf16.mxu0 %vm811_vm0, %v3214_v35  ;;  %v730_v60 = vrot.slane %v676_v47, 1 }
  0x3b   : > { %v3229_v53 = vpack.c.bf16 %v759_v45, %v757_v44  ;;  %v622_v54 = vsel %vm613_vm1, %v620_v38, %v621_v41  ;;  %v686_v56 = vsel %vm613_vm1, %v621_v41, 0.0  ;;  %v550_v46 = vmax.f32 %v534_v42, 0.0  ;;  %v3272_v41 = vld [vmem:[%s3882_s5 + $0xa] sm:$0x3] }
  0x3c   : > { %v731_v61 = vrot.slane %v622_v54, 1  ;;  %v733_v62 = vrot.slane %v686_v56, 1  ;;  %v623_v57 = vrot.slane %v549_v48, 7  ;;  %v1250_v63 = vsel %vm811_vm0, %v3144_v21, 0 }
  0x3d   : > { %2667 = vmatmul.mubr.msk.bf16.gmra.mxu1 %vm786_vm3, %v3229_v53  ;;  %v1039_v0 = vsel %vm1036_vm4, %v1037_v5, %v1038_v29  ;;  %v1041_v1 = vsel %vm1036_vm4, %v1038_v29, %v1040_v40  ;;  %v624_v9 = vrot.slane %v550_v46, 7  ;;  %v1042_v15 = vrot.slane %v3124_v10, 2 }
  0x3e   : > { %v732_v3 = vsel %vm719_vm2, %v730_v60, %v731_v61  ;;  %v734_v8 = vsel %vm719_vm2, %v731_v61, %v733_v62  ;;  %v677_v14 = vsel %vm613_vm1, 0.0, %v623_v57  ;;  %2672 = vmatprep.mubr.msk.bf16.mxu1 %vm786_vm3, %v694_v43  ;;  %v1043_v16 = vrot.slane %v3117_v7, 2  ;;  %v2561_v60 = vld [vmem:[%s443_s9] sm:$0xff]  }
  0x3f   : > { %v3245_v21 = vpack.c.bf16 %v734_v8, %v732_v3  ;;  %v735_v5 = vrot.slane %v677_v14, 1  ;;  %v1045_v17 = vrot.slane %v3127_v11, 2  ;;  %v625_v18 = vsel %vm613_vm1, %v623_v57, %v624_v9 }
  0x40   : > { %v687_v19 = vsel %vm613_vm1, %v624_v9, 0.0  ;;  %v3252_v20 = vpack.c.bf16 %v3117_v7, %v3124_v10  ;;  %v736_v23 = vrot.slane %v625_v18, 1  ;;  %v1093_v25 = vpack.c.bf16 %v1041_v1, %v1039_v0 }
  0x41   : > { %2658 = vmatprep.mubr.msk.bf16.mxu0 %vm786_vm3, %v3245_v21  ;;  %v738_v24 = vrot.slane %v687_v19, 1  ;;  %v3256_v27 = vpack.c.bf16 %v622_v54, %v676_v47  ;;  %v1047_v28 = vrot.slane %v676_v47, 2  ;;  %v1048_v29 = vrot.slane %v622_v54, 2  ;;  %v2570_v47 = vld [vmem:[%s3016_s23 + $0x38] sm:$0xff]   ;;  %s589_s23 = scvt.s32.f32 %s3296_s25  ;;  %s465_s25 = scalar_lea.vmem %s3884_s7, %s2399_s22 }
  0x42   : > { %v1050_v34 = vrot.slane %v686_v56, 2  ;;  %v1052_v11 = vrot.slane %v677_v14, 2  ;;  %v737_v36 = vsel %vm719_vm2, %v735_v5, %v736_v23  ;;  %v1053_v7 = vrot.slane %v625_v18, 2 }
  0x43   : > { %v739_v37 = vsel %vm719_vm2, %v736_v23, %v738_v24  ;;  %v1055_v10 = vrot.slane %v687_v19, 2  ;;  %v1044_v39 = vsel %vm1036_vm4, %v1042_v15, %v1043_v16  ;;  %v1046_v40 = vsel %vm1036_vm4, %v1043_v16, %v1045_v17 }
  0x44   : > { %v3263_v38 = vpack.c.bf16 %v739_v37, %v737_v36  ;;  %v1049_v42 = vsel %vm1036_vm4, %v1047_v28, %v1048_v29  ;;  %v1051_v43 = vsel %vm1036_vm4, %v1048_v29, %v1050_v34  ;;  %v1054_v44 = vsel %vm1036_vm4, %v1052_v11, %v1053_v7 }
  0x45   : > { %2673 = vmatmul.mubr.msk.bf16.vlgmr.msra.gmra.mxu1 %vm786_vm3, %v3252_v20  ;;  %v1056_v45 = vsel %vm1036_vm4, %v1053_v7, %v1055_v10  ;;  %v1060_v48 = vrot.slane %v3082_v51, 2  ;;  %v3288_v54 = vpack.c.bf16 %v1046_v40, %v1044_v39  ;;  %v1381_v56 = vsel %vm811_vm0, %v3214_v35, 0 }
  0x46   : > { %2659 = vmatmul.mubr.msk.bf16.gmra.mxu0 %vm786_vm3, %v3263_v38  ;;  %2707 = vmatpush3.bf16.msra.mxu1 %v1250_v63  ;;  %v3298_v61 = vpack.c.bf16 %v625_v18, %v677_v14  ;;  %v3302_v62 = vpack.c.bf16 %v3076_v49, %v3079_v50  ;;  %v1057_v51 = vrot.slane %v3079_v50, 2  ;;  %v1058_v46 = vrot.slane %v3076_v49, 2 }
  0x47   : > { %2690 = vmatprep.mubr.msk.bf16.mxu0 %vm786_vm3, %v1093_v25  ;;  %2676 = vmatprep.mubr.msk.bf16.mxu1 %vm786_vm3, %v3256_v27  ;;  %v3306_v57 = vpack.c.bf16 %v1051_v43, %v1049_v42  ;;  %v3308_v35 = vpack.c.bf16 %v1056_v45, %v1054_v44  ;;  %v2554_v63 = vunpack.c.l.bf16 %v2570_v47  ;;  %v2555_v0 = vunpack.c.h.bf16 %v2570_v47 }
  0x48   : > { %2822 = vmatprep.subr.msk.bf16.mxu1 %vm811_vm0, %v3272_v41  ;;  %v1062_v1 = vrot.slane %v3098_v58, 2  ;;  %v1063_v3 = vrot.slane %v3085_v52, 2  ;;  %v2562_v8 = vunpack.c.l.bf16 %v2561_v60  ;;  %v2563_v9 = vunpack.c.h.bf16 %v2561_v60 }
  0x49   : > { %v3314_v14 = vpack.c.bf16 %v3085_v52, %v3098_v58  ;;  %v1065_v50 = vrot.slane %v3101_v59, 2  ;;  %v521_v49 = vmul.f32 %v2554_v63, %v3021_v4  ;;  %v522_v15 = vmul.f32 %v2555_v0, %v3021_v4  ;;  %v3330_v52 = vld [vmem:[%s3882_s5 + $0xc] sm:$0x3] }
  0x4a   : > { %v1059_v16 = vsel %vm1036_vm4, %v1057_v51, %v1058_v46  ;;  %v3325_v5 = vpack.c.bf16 %v3155_v31, %v3151_v26  ;;  %v581_v58 = vmul.f32 %v2562_v8, %v3021_v4  ;;  %v582_v59 = vmul.f32 %v2563_v9, %v3021_v4 }
  0x4b   : > { %v1061_v17 = vsel %vm1036_vm4, %v1058_v46, %v1060_v48  ;;  %v543_v18 = vadd.f32 %v3032_v13, %v521_v49  ;;  %v544_v19 = vadd.f32 %v3032_v13, %v522_v15  ;;  %v1064_v23 = vsel %vm1036_vm4, %v1062_v1, %v1063_v3 }
  0x4c   : > { %v583_v4 = vadd.f32 %v3032_v13, %v581_v58  ;;  %v584_v24 = vadd.f32 %v3032_v13, %v582_v59  ;;  %v1066_v25 = vsel %vm1036_vm4, %v1063_v3, %v1065_v50  ;;  %v590_v34 = vstv %s589_s23 }
  0x4d   : > { %2677 = vmatmul.mubr.msk.bf16.gmra.mxu1 %vm786_vm3, %v3298_v61  ;;  %v559_v28 = vmax.f32 %v543_v18, 0.0  ;;  %v560_v29 = vmax.f32 %v544_v19, 0.0  ;;  %v3351_v11 = vpack.c.bf16 %v3206_v30, %v3197_v22  ;;  %v1067_v36 = vrot.slane %v3151_v26, 2 }
  0x4e   : > { %2691 = vmatmul.mubr.msk.bf16.vlgmr.msra.gmra.mxu0 %vm786_vm3, %v3288_v54  ;;  %2680 = vmatprep.mubr.msk.bf16.mxu1 %vm786_vm3, %v3302_v62  ;;  %v585_v37 = vmax.f32 %v583_v4, 0.0  ;;  %v586_v7 = vmax.f32 %v584_v24, 0.0  ;;  %v3354_v10 = vpack.c.bf16 %v1061_v17, %v1059_v16  ;;  %v1068_v13 = vrot.slane %v3155_v31, 2 }
  0x4f   : > { %2725 = vmatpush3.bf16.msra.mxu0 %v1381_v56  ;;  %2694 = vmatprep.mubr.msk.bf16.mxu0 %vm786_vm3, %v3306_v57  ;;  %v638_v39 = vrot.slane %v559_v28, 7  ;;  %v639_v40 = vrot.slane %v560_v29, 7  ;;  %v3357_v42 = vpack.c.bf16 %v1066_v25, %v1064_v23  ;;  %v1070_v43 = vrot.slane %v3161_v33, 2 }
  0x50   : > { %2823 = vmatprep.subr.msk.bf16.mxu0 %vm811_vm0, %v3330_v52  ;;  %v591_v44 = vmul.f32 %v590_v34, %v585_v37  ;;  %v592_v45 = vmul.f32 %v590_v34, %v586_v7  ;;  %v1072_v47 = vrot.slane %v3197_v22, 2  ;;  %v1069_v1 = vsel %vm1036_vm4, %v1067_v36, %v1068_v13 }
  0x51   : > { %v640_v48 = vsel %vm613_vm1, %v638_v39, %v639_v40  ;;  %v682_v26 = vsel %vm613_vm1, 0.0, %v638_v39  ;;  %v692_v56 = vsel %vm613_vm1, %v639_v40, 0.0  ;;  %v1071_v3 = vsel %vm1036_vm4, %v1068_v13, %v1070_v43 }
  0x52   : > { %v3366_v31 = vpack.c.bf16 %v640_v48, %v682_v26  ;;  %v1367_v60 = vrot.slane %v682_v26, 1  ;;  %v1368_v51 = vrot.slane %v640_v48, 1  ;;  %v1496_v46 = vrot.slane %v682_v26, 2 }
  0x53   : > { %v1497_v33 = vrot.slane %v640_v48, 2  ;;  %v1370_v22 = vrot.slane %v692_v56, 1  ;;  %v1499_v63 = vrot.slane %v692_v56, 2  ;;  %v641_v0 = vrot.slane %v591_v44, 7  ;;  %v2464_v48 = vld [vmem:[%s3882_s5 + $0xe] sm:$0x3] }
  0x54   : > { %v1369_v8 = vsel %vm719_vm2, %v1367_v60, %v1368_v51  ;;  %v642_v9 = vrot.slane %v592_v45, 7  ;;  %v3396_v25 = vpack.c.bf16 %v1071_v3, %v1069_v1  ;;  %v1073_v28 = vrot.slane %v3206_v30, 2 }
  0x55   : > { %2681 = vmatmul.mubr.msk.bf16.gmra.mxu1 %vm786_vm3, %v3314_v14  ;;  %v1371_v50 = vsel %vm719_vm2, %v1368_v51, %v1370_v22  ;;  %v1498_v49 = vsel %vm1036_vm4, %v1496_v46, %v1497_v33  ;;  %v1500_v15 = vsel %vm1036_vm4, %v1497_v33, %v1499_v63  ;;  %v3381_v16 = vsel %vm613_vm1, 0.0, %v641_v0 }
  0x56   : > { %2695 = vmatmul.mubr.msk.bf16.gmra.mxu0 %vm786_vm3, %v3308_v35  ;;  %2684 = vmatprep.mubr.msk.bf16.mxu1 %vm786_vm3, %v3325_v5  ;;  %v3383_v58 = vpack.c.bf16 %v1371_v50, %v1369_v8  ;;  %v3385_v59 = vpack.c.bf16 %v1500_v15, %v1498_v49  ;;  %v3388_v17 = vsel %vm613_vm1, %v641_v0, %v642_v9  ;;  %v1749_v18 = vrot.slane %v3381_v16, 1 }
  0x57   : > { %2698 = vmatprep.mubr.msk.bf16.mxu0 %vm786_vm3, %v3354_v10  ;;  %v1625_v19 = vpack.c.bf16 %v3388_v17, %v3381_v16  ;;  %v1750_v23 = vrot.slane %v3388_v17, 1  ;;  %v1878_v4 = vrot.slane %v3381_v16, 2  ;;  %v1879_v24 = vrot.slane %v3388_v17, 2 }
  0x58   : > { %v1075_v29 = vrot.slane %v3209_v32, 2  ;;  %v693_v34 = vsel %vm613_vm1, %v642_v9, 0.0  ;;  %v1074_v39 = vsel %vm1036_vm4, %v1072_v47, %v1073_v28  ;;  %v1510_v45 = vsel %vm811_vm0, %v3272_v41, 0  ;;  %v2473_v47 = vld [vmem:[%s3882_s5 + $0x10] sm:$0x3] }
  0x59   : > { %v3402_v36 = vsel %vm719_vm2, %v1749_v18, %v1750_v23  ;;  %v1752_v37 = vrot.slane %v693_v34, 1  ;;  %v3405_v7 = vsel %vm1036_vm4, %v1878_v4, %v1879_v24  ;;  %v1881_v13 = vrot.slane %v693_v34, 2 }
  0x5a   : > { %v1076_v40 = vsel %vm1036_vm4, %v1073_v28, %v1075_v29  ;;  %v1632_v41 = vsel %vm811_vm0, %v3330_v52, 0 }
  0x5b   : > { %v3414_v30 = vsel %vm719_vm2, %v1750_v23, %v1752_v37  ;;  %v3417_v32 = vsel %vm1036_vm4, %v1879_v24, %v1881_v13 }
  0x5c   : > { %v1756_v43 = vpack.c.bf16 %v3414_v30, %v3402_v36  ;;  %v1885_v44 = vpack.c.bf16 %v3417_v32, %v3405_v7 }
  0x5d   : > { %2685 = vmatmul.mubr.msk.bf16.gmra.mxu1 %vm786_vm3, %v3351_v11 }
  0x5e   : > { %2699 = vmatmul.mubr.msk.bf16.gmra.mxu0 %vm786_vm3, %v3357_v42  ;;  %2708 = vmatprep.mubr.msk.bf16.mxu1 %vm786_vm3, %v3252_v20  ;;  %v1100_v20 = vpack.c.bf16 %v1076_v40, %v1074_v39 }
  0x5f   : > { %2702 = vmatprep.mubr.msk.bf16.mxu0 %vm786_vm3, %v3396_v25 }
  0x65   : > { %2709 = vmatmul.mubr.msk.bf16.vlgmr.msra.gmra.mxu1 %vm786_vm3, %v3256_v27 }
  0x66   : > { %2703 = vmatmul.mubr.msk.bf16.gmra.mxu0 %vm786_vm3, %v1100_v20  ;;  %2743 = vmatpush3.bf16.msra.mxu1 %v1510_v45 }
  0x67   : > { %2726 = vmatprep.mubr.msk.bf16.mxu0 %vm786_vm3, %v3188_v6  ;;  %2712 = vmatprep.mubr.msk.bf16.mxu1 %vm786_vm3, %v3298_v61  ;;  %v1763_v6 = vsel %vm811_vm0, %v2464_v48, 0 }
  0x68   : > { %2824 = vmatprep.subr.msk.bf16.mxu1 %vm811_vm0, %v2464_v48 }
  0x6d   : > { %2713 = vmatmul.mubr.msk.bf16.gmra.mxu1 %vm786_vm3, %v3302_v62 }
  0x6e   : > { %2727 = vmatmul.mubr.msk.bf16.vlgmr.msra.gmra.mxu0 %vm786_vm3, %v3245_v21  ;;  %2716 = vmatprep.mubr.msk.bf16.mxu1 %vm786_vm3, %v3314_v14 }
  0x6f   : > { %2761 = vmatpush3.bf16.msra.mxu0 %v1632_v41  ;;  %2730 = vmatprep.mubr.msk.bf16.mxu0 %vm786_vm3, %v3263_v38 }
  0x70   : > { %2825 = vmatprep.subr.msk.bf16.mxu0 %vm811_vm0, %v2473_v47 }
  0x75   : > { %2717 = vmatmul.mubr.msk.bf16.gmra.mxu1 %vm786_vm3, %v3325_v5 }
  0x76   : > { %2731 = vmatmul.mubr.msk.bf16.gmra.mxu0 %vm786_vm3, %v3113_v2  ;;  %2720 = vmatprep.mubr.msk.bf16.mxu1 %vm786_vm3, %v3351_v11 }
  0x77   : > { %2734 = vmatprep.mubr.msk.bf16.mxu0 %vm786_vm3, %v3133_v12 }
  0x7d   : > { %2721 = vmatmul.mubr.msk.bf16.gmra.mxu1 %vm786_vm3, %v3366_v31 }
  0x7e   : > { %2735 = vmatmul.mubr.msk.bf16.gmra.mxu0 %vm786_vm3, %v3177_v55  ;;  %2744 = vmatprep.mubr.msk.bf16.mxu1 %vm786_vm3, %v3288_v54  ;;  %v1892_v54 = vsel %vm811_vm0, %v2473_v47, 0 }
  0x7f   : > { %2738 = vmatprep.mubr.msk.bf16.mxu0 %vm786_vm3, %v3229_v53 }
  0x85   : > { %2745 = vmatmul.mubr.msk.bf16.vlgmr.msra.gmra.mxu1 %vm786_vm3, %v3306_v57 }
  0x86   : > { %2739 = vmatmul.mubr.msk.bf16.gmra.mxu0 %vm786_vm3, %v3383_v58  ;;  %2779 = vmatpush3.bf16.msra.mxu1 %v1763_v6 }
  0x87   : > { %2762 = vmatprep.mubr.msk.bf16.mxu0 %vm786_vm3, %v3256_v27  ;;  %2748 = vmatprep.mubr.msk.bf16.mxu1 %vm786_vm3, %v3308_v35 }
  0x8d   : > { %2749 = vmatmul.mubr.msk.bf16.gmra.mxu1 %vm786_vm3, %v3354_v10 }
  0x8e   : > { %2763 = vmatmul.mubr.msk.bf16.vlgmr.msra.gmra.mxu0 %vm786_vm3, %v3298_v61  ;;  %2752 = vmatprep.mubr.msk.bf16.mxu1 %vm786_vm3, %v3357_v42 }
  0x8f   : > { %2797 = vmatpush3.bf16.msra.mxu0 %v1892_v54  ;;  %2766 = vmatprep.mubr.msk.bf16.mxu0 %vm786_vm3, %v3302_v62 }
  0x95   : > { %2753 = vmatmul.mubr.msk.bf16.gmra.mxu1 %vm786_vm3, %v3396_v25 }
  0x96   : > { %2767 = vmatmul.mubr.msk.bf16.gmra.mxu0 %vm786_vm3, %v3314_v14  ;;  %2756 = vmatprep.mubr.msk.bf16.mxu1 %vm786_vm3, %v1100_v20 }
  0x97   : > { %2770 = vmatprep.mubr.msk.bf16.mxu0 %vm786_vm3, %v3325_v5 }
  0x9d   : > { %2757 = vmatmul.mubr.msk.bf16.gmra.mxu1 %vm786_vm3, %v3385_v59 }
  0x9e   : > { %2771 = vmatmul.mubr.msk.bf16.gmra.mxu0 %vm786_vm3, %v3351_v11  ;;  %2780 = vmatprep.mubr.msk.bf16.mxu1 %vm786_vm3, %v3245_v21 }
  0x9f   : > { %2774 = vmatprep.mubr.msk.bf16.mxu0 %vm786_vm3, %v3366_v31 }
  0xa5   : > { %2781 = vmatmul.mubr.msk.bf16.vlgmr.msra.gmra.mxu1 %vm786_vm3, %v3263_v38 }
  0xa6   : > { %2775 = vmatmul.mubr.msk.bf16.gmra.mxu0 %vm786_vm3, %v1625_v19  ;;  %2784 = vmatprep.mubr.msk.bf16.mxu1 %vm786_vm3, %v3113_v2 }
  0xa7   : > { %2798 = vmatprep.mubr.msk.bf16.mxu0 %vm786_vm3, %v3306_v57 }
  0xad   : > { %2785 = vmatmul.mubr.msk.bf16.gmra.mxu1 %vm786_vm3, %v3133_v12 }
  0xae   : > { %2799 = vmatmul.mubr.msk.bf16.vlgmr.msra.gmra.mxu0 %vm786_vm3, %v3308_v35  ;;  %2788 = vmatprep.mubr.msk.bf16.mxu1 %vm786_vm3, %v3177_v55 }
  0xaf   : > { %2802 = vmatprep.mubr.msk.bf16.mxu0 %vm786_vm3, %v3354_v10 }
  0xb5   : > { %2789 = vmatmul.mubr.msk.bf16.gmra.mxu1 %vm786_vm3, %v3229_v53 }
  0xb6   : > { %2803 = vmatmul.mubr.msk.bf16.gmra.mxu0 %vm786_vm3, %v3357_v42  ;;  %2792 = vmatprep.mubr.msk.bf16.mxu1 %vm786_vm3, %v3383_v58 }
  0xb7   : > { %2806 = vmatprep.mubr.msk.bf16.mxu0 %vm786_vm3, %v3396_v25 }
  0xbd   : > { %2793 = vmatmul.mubr.msk.bf16.gmra.mxu1 %vm786_vm3, %v1756_v43 }
  0xbe   : > { %2807 = vmatmul.mubr.msk.bf16.gmra.mxu0 %vm786_vm3, %v1100_v20 }
  0xbf   : > { %2810 = vmatprep.mubr.msk.bf16.mxu0 %vm786_vm3, %v3385_v59 }
  0xc6   : > { %2811 = vmatmul.mubr.msk.bf16.gmra.mxu0 %vm786_vm3, %v1885_v44 }
  0xea   : > { %v2664_v2 = vpop.f32.mrf.mxu1 }
  0xec   : > { %v881_v12 = vpop.f32.mrf.mxu1 }
  0xee   : > { %v2665_v55 = vpop.f32.mrf.mxu1 }
  0xf0   : > { %v884_v21 = vpop.f32.mrf.mxu1 }
  0xf8   : > { %v2656_v53 = vpop.f32.mrf.mxu0 }
  0xfa   : > { %v849_v27 = vpop.f32.mrf.mxu0 }
  0xfc   : > { %v2657_v61 = vpop.f32.mrf.mxu0 }
  0xfd   : > { %v2668_v38 = vpop.f32.mrf.mxu1 }
  0xfe   : > { %v852_v35 = vpop.f32.mrf.mxu0 }
  0xff   : > { %v897_v62 = vpop.f32.mrf.mxu1 }
 0x101   : > { %v2669_v57 = vpop.f32.mrf.mxu1 }
 0x103   : > { %v900_v14 = vpop.f32.mrf.mxu1 }
 0x105   : > { %v2674_v5 = vpop.f32.mrf.mxu1 }
 0x106   : > { %v2660_v52 = vpop.f32.mrf.mxu0  ;;  %v982_v11 = vadd.f32 %v2674_v5, %v2656_v53 }
 0x107   : > { %v973_v10 = vpop.f32.mrf.mxu1 }
 0x108   : > { %v865_v42 = vpop.f32.mrf.mxu0  ;;  %v974_v26 = vadd.f32 %v973_v10, %v849_v27 }
 0x109   : > { %v2675_v56 = vpop.f32.mrf.mxu1 }
 0x10a   : > { %v2661_v31 = vpop.f32.mrf.mxu0  ;;  %v985_v60 = vadd.f32 %v2675_v56, %v2657_v61 }
 0x10b   : > { %v976_v51 = vpop.f32.mrf.mxu1 }
 0x10c   : > { %v868_v46 = vpop.f32.mrf.mxu0  ;;  %v977_v33 = vadd.f32 %v976_v51, %v852_v35 }
 0x10d   : > { %v2678_v22 = vpop.f32.mrf.mxu1 }
 0x10e   : > { %v2692_v63 = vpop.f32.mrf.mxu0  ;;  %v998_v0 = vadd.f32 %v2678_v22, %v2660_v52 }
 0x10f   : > { %v3534_v1 = vadd.f32 %v2692_v63, %v982_v11  ;;  %v989_v3 = vpop.f32.mrf.mxu1 }
 0x110   : > { %v1164_v8 = vpop.f32.mrf.mxu0  ;;  %v990_v9 = vadd.f32 %v989_v3, %v865_v42 }
 0x111   : > { %v3536_v50 = vadd.f32 %v1164_v8, %v974_v26  ;;  %v2679_v49 = vpop.f32.mrf.mxu1 }
 0x112   : > { %v2693_v15 = vpop.f32.mrf.mxu0  ;;  %v1001_v16 = vadd.f32 %v2679_v49, %v2661_v31 }
 0x113   : > { %v3538_v58 = vadd.f32 %v2693_v15, %v985_v60  ;;  %v992_v59 = vpop.f32.mrf.mxu1 }
 0x114   : > { %v1167_v17 = vpop.f32.mrf.mxu0  ;;  %v993_v18 = vadd.f32 %v992_v59, %v868_v46 }
 0x115   : > { %v3540_v19 = vadd.f32 %v1167_v17, %v977_v33  ;;  %v2682_v23 = vpop.f32.mrf.mxu1 }
 0x116   : > { %v2696_v4 = vpop.f32.mrf.mxu0  ;;  %v1014_v24 = vadd.f32 %v2682_v23, %v2664_v2 }
 0x117   : > { %v3542_v25 = vadd.f32 %v2696_v4, %v998_v0  ;;  %v1005_v28 = vpop.f32.mrf.mxu1 }
 0x118   : > { %v1180_v29 = vpop.f32.mrf.mxu0  ;;  %v1006_v34 = vadd.f32 %v1005_v28, %v881_v12 }
 0x119   : > { %v3544_v36 = vadd.f32 %v1180_v29, %v990_v9  ;;  %v2683_v37 = vpop.f32.mrf.mxu1 }
 0x11a   : > { %v2697_v7 = vpop.f32.mrf.mxu0  ;;  %v1017_v13 = vadd.f32 %v2683_v37, %v2665_v55 }
 0x11b   : > { %v3546_v30 = vadd.f32 %v2697_v7, %v1001_v16  ;;  %v1008_v32 = vpop.f32.mrf.mxu1 }
 0x11c   : > { %v1183_v39 = vpop.f32.mrf.mxu0  ;;  %v1009_v40 = vadd.f32 %v1008_v32, %v884_v21 }
 0x11d   : > { %v3548_v43 = vadd.f32 %v1183_v39, %v993_v18  ;;  %v2686_v44 = vpop.f32.mrf.mxu1 }
 0x11e   : > { %v2700_v20 = vpop.f32.mrf.mxu0  ;;  %v1030_v45 = vadd.f32 %v2686_v44, %v2668_v38 }
 0x11f   : > { %v3550_v48 = vadd.f32 %v2700_v20, %v1014_v24  ;;  %v1021_v41 = vpop.f32.mrf.mxu1 }
 0x120   : > { %v1196_v47 = vpop.f32.mrf.mxu0  ;;  %v1022_v6 = vadd.f32 %v1021_v41, %v897_v62 }
 0x121   : > { %v3552_v54 = vadd.f32 %v1196_v47, %v1006_v34  ;;  %v2687_v2 = vpop.f32.mrf.mxu1 }
 0x122   : > { %v2701_v12 = vpop.f32.mrf.mxu0  ;;  %v1033_v55 = vadd.f32 %v2687_v2, %v2669_v57 }
 0x123   : > { %v3554_v53 = vadd.f32 %v2701_v12, %v1017_v13  ;;  %v1024_v27 = vpop.f32.mrf.mxu1 }
 0x124   : > { %v1199_v61 = vpop.f32.mrf.mxu0  ;;  %v1025_v21 = vadd.f32 %v1024_v27, %v900_v14 }
 0x125   : > { %v3556_v35 = vadd.f32 %v1199_v61, %v1009_v40  ;;  %v3558_v5 = vpop.f32.mrf.mxu1 }
 0x126   : > { %v2704_v38 = vpop.f32.mrf.mxu0 }
 0x127   : > { %v3560_v52 = vadd.f32 %v2704_v38, %v1030_v45  ;;  %v3562_v11 = vpop.f32.mrf.mxu1 }
 0x128   : > { %v1212_v62 = vpop.f32.mrf.mxu0 }
 0x129   : > { %v3564_v10 = vadd.f32 %v1212_v62, %v1022_v6  ;;  %v3566_v42 = vpop.f32.mrf.mxu1 }
 0x12a   : > { %v2705_v57 = vpop.f32.mrf.mxu0 }
 0x12b   : > { %v3568_v26 = vadd.f32 %v2705_v57, %v1033_v55  ;;  %v3570_v56 = vpop.f32.mrf.mxu1 }
 0x12c   : > { %v1215_v14 = vpop.f32.mrf.mxu0 }
 0x12d   : > { %v3572_v31 = vadd.f32 %v1215_v14, %v1025_v21  ;;  %v3574_v60 = vpop.f32.mrf.mxu1 }
 0x12e   : > { %v2728_v51 = vpop.f32.mrf.mxu0 }
 0x12f   : > { %v3576_v46 = vpop.f32.mrf.mxu1 }
 0x130   : > { %v1417_v33 = vpop.f32.mrf.mxu0 }
 0x131   : > { %v3578_v22 = vpop.f32.mrf.mxu1 }
 0x132   : > { %v3580_v63 = vpop.f32.mrf.mxu0 }
 0x133   : > { %v3582_v0 = vpop.f32.mrf.mxu1 }
 0x134   : > { %v1420_v3 = vpop.f32.mrf.mxu0 }
 0x135   : > { %v3584_v8 = vpop.f32.mrf.mxu1 }
 0x136   : > { %v3586_v9 = vpop.f32.mrf.mxu0 }
 0x137   : > { %v3588_v49 = vpop.f32.mrf.mxu1 }
 0x138   : > { %v3590_v15 = vpop.f32.mrf.mxu0 }
 0x139   : > { %v3592_v16 = vpop.f32.mrf.mxu1 }
 0x13a   : > { %v3594_v59 = vpop.f32.mrf.mxu0 }
 0x13b   : > { %v3596_v17 = vpop.f32.mrf.mxu1 }
 0x13c   : > { %v3598_v18 = vpop.f32.mrf.mxu0 }
 0x13d   : > { %v3600_v23 = vpop.f32.mrf.mxu1 }
 0x13e   : > { %v3602_v4 = vpop.f32.mrf.mxu0 }
 0x13f   : > { %v3604_v24 = vpop.f32.mrf.mxu1 }
 0x140   : > { %v3606_v28 = vpop.f32.mrf.mxu0 }
 0x141   : > { %v3608_v29 = vpop.f32.mrf.mxu1 }
 0x142   : > { %v3610_v34 = vpop.f32.mrf.mxu0 }
 0x143   : > { %v3612_v37 = vpop.f32.mrf.mxu1 }
 0x144   : > { %v3614_v7 = vpop.f32.mrf.mxu0 }
 0x145   : > { %v3616_v13 = vpop.f32.mrf.mxu1 }
 0x146   : > { %v3618_v32 = vpop.f32.mrf.mxu0 }
 0x147   : > { %v3620_v39 = vpop.f32.mrf.mxu1 }
 0x148   : > { %v3622_v40 = vpop.f32.mrf.mxu0 }
 0x149   : > { %v3624_v44 = vpop.f32.mrf.mxu1 }
 0x14a   : > { %v3626_v20 = vpop.f32.mrf.mxu0 }
 0x14b   : > { %v3628_v45 = vpop.f32.mrf.mxu1 }
 0x14c   : > { %v3630_v41 = vpop.f32.mrf.mxu0 }
 0x14d   : > { %v3632_v47 = vpop.f32.mrf.mxu1 }
 0x14e   : > { %3886 = vst [vmem:[#allocation2_spill] sm:$0xff] %v3632_v47  ;;  %v3634_v6 = vpop.f32.mrf.mxu0 }
 0x14f   : > { %v3636_v2 = vpop.f32.mrf.mxu1 }
 0x150   : > { %3887 = vst [vmem:[#allocation3_spill] sm:$0xff] %v3636_v2  ;;  %v3638_v12 = vpop.f32.mrf.mxu0 }
 0x151   : > { %3888 = vst [vmem:[#allocation4_spill] sm:$0xff] %v3638_v12  ;;  %v3640_v55 = vpop.f32.mrf.mxu1 }
 0x152   : > { %3889 = vst [vmem:[#allocation5_spill] sm:$0xff] %v3640_v55  ;;  %v3642_v27 = vpop.f32.mrf.mxu0 }
 0x153   : > { %3890 = vst [vmem:[#allocation6_spill] sm:$0xff] %v3642_v27  ;;  %v3644_v61 = vpop.f32.mrf.mxu1 }
 0x154   : > { %3891 = vst [vmem:[#allocation7_spill] sm:$0xff] %v3644_v61  ;;  %v3646_v21 = vpop.f32.mrf.mxu0 }
 0x155   : > { %v3648_v38 = vpop.f32.mrf.mxu1 }
 0x156   : > { %3892 = vst [vmem:[#allocation8_spill] sm:$0xff] %v3648_v38  ;;  %v3650_v62 = vpop.f32.mrf.mxu0 }
 0x157   : > { %3893 = vst [vmem:[#allocation9_spill] sm:$0xff] %v3650_v62  ;;  %v3652_v57 = vpop.f32.mrf.mxu1 }
 0x158   : > { %3894 = vst [vmem:[#allocation10_spill] sm:$0xff] %v3652_v57  ;;  %v3654_v14 = vpop.f32.mrf.mxu0 }
 0x159   : > { %3895 = vst [vmem:[#allocation11_spill] sm:$0xff] %v3654_v14  ;;  %v3656_v2 = vpop.f32.mrf.mxu1 }
 0x15a   : > { %v3658_v47 = vpop.f32.mrf.mxu0 }
 0x15b   : > { %3896 = vst [vmem:[#allocation12_spill] sm:$0xff] %v3658_v47  ;;  %v3660_v12 = vpop.f32.mrf.mxu1  ;;  %v1351_v47 = vadd.f32 %v3558_v5, %v3534_v1  ;;  %v1353_v1 = vadd.f32 %v3576_v46, %v3544_v36  ;;  %v1359_v36 = vadd.f32 %v3584_v8, %v3550_v48  ;;  %v1363_v48 = vadd.f32 %v3600_v23, %v3560_v52 }
 0x15c   : > { %3897 = vst [vmem:[#allocation13_spill] sm:$0xff] %v3660_v12  ;;  %v3662_v55 = vpop.f32.mrf.mxu0 }
 0x15d   : > { %3898 = vst [vmem:[#allocation14_spill] sm:$0xff] %v3662_v55  ;;  %v3664_v27 = vpop.f32.mrf.mxu1  ;;  %v1349_v55 = vadd.f32 %v3562_v11, %v3536_v50 }
 0x15e   : > { %3899 = vst [vmem:[#allocation15_spill] sm:$0xff] %v3664_v27  ;;  %v3666_v61 = vpop.f32.mrf.mxu0  ;;  %v1352_v27 = vadd.f32 %v3566_v42, %v3538_v58  ;;  %v1356_v58 = vadd.f32 %v3578_v22, %v3546_v30 }
 0x15f   : > { %3900 = vst [vmem:[#allocation16_spill] sm:$0xff] %v3666_v61  ;;  %v3669_v38 = vpop.f32.mrf.mxu1  ;;  %v1480_v61 = vadd.f32 %v1417_v33, %v1349_v55  ;;  %v1358_v33 = vadd.f32 %v3596_v17, %v3556_v35  ;;  %v1364_v35 = vadd.f32 %v3608_v29, %v3568_v26  ;;  %v3906_v29 = vld [vmem:[#allocation2_spill] sm:$0xff] }
 0x160   : > { %3901 = vst [vmem:[#allocation17_spill] sm:$0xff] %v3669_v38  ;;  %v3671_v62 = vpop.f32.mrf.mxu0  ;;  %v1350_v38 = vadd.f32 %v3570_v56, %v3540_v19  ;;  %v1483_v50 = vadd.f32 %v3580_v63, %v1352_v27  ;;  %v1354_v19 = vadd.f32 %v3582_v0, %v3548_v43  ;;  %v1487_v30 = vadd.f32 %v3594_v59, %v1356_v58  ;;  %v3911_v27 = vld [vmem:[#allocation8_spill] sm:$0xff] }
 0x161   : > { %3902 = vst [vmem:[#allocation18_spill] sm:$0xff] %v3671_v62  ;;  %v3673_v57 = vpop.f32.mrf.mxu1  ;;  %v1360_v43 = vadd.f32 %v3592_v16, %v3554_v53  ;;  %v1490_v63 = vadd.f32 %v3602_v4, %v1359_v36  ;;  %v1489_v52 = vadd.f32 %v3614_v7, %v1358_v33 }
 0x162   : > { %3903 = vst [vmem:[#allocation19_spill] sm:$0xff] %v3673_v57  ;;  %v3675_v14 = vpop.f32.mrf.mxu0  ;;  %v1482_v57 = vadd.f32 %v2728_v51, %v1351_v47  ;;  %v1481_v11 = vadd.f32 %v1420_v3, %v1350_v38  ;;  %v1485_v46 = vadd.f32 %v3598_v18, %v1354_v19  ;;  %v1495_v18 = vadd.f32 %v3626_v20, %v1364_v35  ;;  %v3909_v20 = vld [vmem:[#allocation5_spill] sm:$0xff] }
 0x163   : > { %3904 = vst [vmem:[#allocation20_spill] sm:$0xff] %v3675_v14  ;;  %v3681_v12 = vpop.f32.mrf.mxu1  ;;  %v1355_v14 = vadd.f32 %v3574_v60, %v3542_v25  ;;  %v1484_v25 = vadd.f32 %v3590_v15, %v1353_v1  ;;  %v1357_v60 = vadd.f32 %v3588_v49, %v3552_v54  ;;  %v1361_v54 = vadd.f32 %v3604_v24, %v3564_v10  ;;  %v3905_v24 = vld [vmem:[#allocation4_spill] sm:$0xff]  ;;  %v3916_v36 = vld [vmem:[#allocation13_spill] sm:$0xff] }
 0x164   : > { %v3687_v62 = vpop.f32.mrf.mxu0  ;;  %v1611_v0 = vadd.f32 %v3616_v13, %v1482_v57  ;;  %v1491_v8 = vadd.f32 %v3610_v34, %v1360_v43  ;;  %v1494_v10 = vadd.f32 %v3618_v32, %v1363_v48  ;;  %v1609_v15 = vadd.f32 %v3620_v39, %v1480_v61  ;;  %v3907_v13 = vld [vmem:[#allocation6_spill] sm:$0xff]  ;;  %v3908_v39 = vld [vmem:[#allocation3_spill] sm:$0xff] }
 0x165   : > { %v2782_v5 = vpop.f32.mrf.mxu1  ;;  %v1486_v56 = vadd.f32 %v3586_v9, %v1355_v14  ;;  %v1488_v53 = vadd.f32 %v3606_v28, %v1357_v60  ;;  %v1362_v9 = vadd.f32 %v3612_v37, %v3572_v31  ;;  %v1492_v17 = vadd.f32 %v3622_v40, %v1361_v54  ;;  %v3912_v14 = vld [vmem:[#allocation9_spill] sm:$0xff]  ;;  %v3917_v43 = vld [vmem:[#allocation14_spill] sm:$0xff]  ;;  %v3919_v54 = vld [vmem:[#allocation15_spill] sm:$0xff] }
 0x166   : > { %v3700_v42 = vpop.f32.mrf.mxu0  ;;  %v1733_v16 = vadd.f32 %v3634_v6, %v1611_v0  ;;  %v1612_v26 = vadd.f32 %v3624_v44, %v1483_v50  ;;  %v1610_v23 = vadd.f32 %v3628_v45, %v1481_v11  ;;  %v1731_v28 = vadd.f32 %v3905_v24, %v1609_v15  ;;  %v3910_v44 = vld [vmem:[#allocation7_spill] sm:$0xff]  ;;  %v3914_v11 = vld [vmem:[#allocation10_spill] sm:$0xff] }
 0x167   : > { %v1799_v51 = vpop.f32.mrf.mxu1  ;;  %v1493_v4 = vadd.f32 %v3630_v41, %v1362_v9  ;;  %v1615_v34 = vadd.f32 %v3906_v29, %v1486_v56  ;;  %v1613_v40 = vadd.f32 %v3908_v39, %v1484_v25  ;;  %v1616_v47 = vadd.f32 %v3909_v20, %v1487_v30  ;;  %v3915_v56 = vld [vmem:[#allocation12_spill] sm:$0xff] }
 0x168   : > { %v3714_v22 = vpop.f32.mrf.mxu0  ;;  %v1864_v37 = vadd.f32 %v2782_v5, %v1733_v16  ;;  %v1734_v32 = vadd.f32 %v3907_v13, %v1612_v26  ;;  %v1614_v6 = vadd.f32 %v3910_v44, %v1485_v46  ;;  %v1732_v55 = vadd.f32 %v3646_v21, %v1610_v23  ;;  %v3913_v5 = vld [vmem:[#allocation11_spill] sm:$0xff] }
 0x169   : > { %v2783_v3 = vpop.f32.mrf.mxu1  ;;  %v1619_v61 = vadd.f32 %v3911_v27, %v1490_v63  ;;  %v1862_v41 = vadd.f32 %v1799_v51, %v1731_v28  ;;  %v1737_v1 = vadd.f32 %v3912_v14, %v1615_v34  ;;  %v1735_v50 = vadd.f32 %v3913_v5, %v1613_v40  ;;  %v3918_v63 = vld [vmem:[#allocation16_spill] sm:$0xff]  ;;  %v3923_v28 = vld [vmem:[#allocation19_spill] sm:$0xff] }
 0x16a   : > { %v3730_v49 = vpop.f32.mrf.mxu0  ;;  %v1617_v58 = vadd.f32 %v3914_v11, %v1488_v53  ;;  %v1620_v19 = vadd.f32 %v3656_v2, %v1491_v8  ;;  %v1738_v25 = vadd.f32 %v3915_v56, %v1616_v47  ;;  %v1618_v60 = vadd.f32 %v3916_v36, %v1489_v52  ;;  %v3920_v53 = vld [vmem:[#allocation18_spill] sm:$0xff]  ;;  %v3921_v2 = vld [vmem:[#allocation17_spill] sm:$0xff]  ;;  %v3922_v23 = vld [vmem:[#allocation20_spill] sm:$0xff] }
 0x16b   : > { %v1802_v59 = vpop.f32.mrf.mxu1  ;;  %v1736_v33 = vadd.f32 %v3917_v43, %v1614_v6  ;;  %v1741_v48 = vadd.f32 %v3918_v63, %v1619_v61  ;;  %v1623_v0 = vadd.f32 %v3919_v54, %v1494_v10  ;;  %v1865_v35 = vadd.f32 %v2783_v3, %v1734_v32 }
 0x16c   : > { %v3740_v31 = vpop.f32.mrf.mxu0  ;;  %v3766_v15 = vadd.f32 %v3920_v53, %v1617_v58  ;;  %v1621_v8 = vadd.f32 %v3921_v2, %v1492_v17  ;;  %v1863_v52 = vadd.f32 %v1802_v59, %v1732_v55  ;;  %v3772_v24 = vadd.f32 %v3922_v23, %v1620_v19 }
 0x16d   : > { %v2786_v7 = vpop.f32.mrf.mxu1  ;;  %v1624_v29 = vadd.f32 %v3923_v28, %v1495_v18  ;;  %v3776_v34 = vadd.f32 %v3681_v12, %v1493_v4  ;;  %v3784_v39 = vadd.f32 %v3700_v42, %v1623_v0 }
 0x16e   : > { %v2800_v45 = vpop.f32.mrf.mxu0  ;;  %v1868_v59 = vadd.f32 %v2786_v7, %v1737_v1  ;;  %v3796_v11 = vadd.f32 %v3714_v22, %v1621_v8 }
 0x16f   : > { %v1993_v38 = vadd.f32 %v2800_v45, %v1864_v37  ;;  %v1815_v57 = vpop.f32.mrf.mxu1  ;;  %v3779_v37 = vadd.f32 %v3687_v62, %v1618_v60 }
 0x170   : > { %v1928_v21 = vpop.f32.mrf.mxu0  ;;  %v1866_v7 = vadd.f32 %v1815_v57, %v1735_v50 }
 0x171   : > { %v2510_v51 = vpack.c.bf16 %v1993_v38, %v1993_v38  ;;  %v1991_v30 = vadd.f32 %v1928_v21, %v1862_v41  ;;  %v2787_v46 = vpop.f32.mrf.mxu1  ;;  %v2127_v40 = vmul.f32 %v1993_v38, %v1993_v38  ;;  %v2091_v45 = vsel %vm786_vm3, %v1993_v38, 0.0 }
 0x172   : > { %v2801_v9 = vpop.f32.mrf.mxu0  ;;  %v1869_v42 = vadd.f32 %v2787_v46, %v1738_v25 }
 0x173   : > { %2074 = vst.msk [vmem:[%s3754_s21 + $0x8] sm:$0xf] %vm2071_vm5, %v2510_v51  ;;  %v2508_v16 = vpack.c.bf16 %v1991_v30, %v1991_v30  ;;  %v1818_v26 = vpop.f32.mrf.mxu1  ;;  %v1994_v3 = vadd.f32 %v2801_v9, %v1865_v35  ;;  %v2125_v17 = vmul.f32 %v1991_v30, %v1991_v30  ;;  %v2088_v18 = vsel %vm786_vm3, %v1991_v30, 0.0 }
 0x174   : > { %v1931_v10 = vpop.f32.mrf.mxu0  ;;  %v2144_v50 = vsel %vm786_vm3, %v2127_v40, 0.0  ;;  %v1867_v56 = vadd.f32 %v1818_v26, %v1736_v33  ;;  %v1746_v9 = vadd.f32 %v3730_v49, %v1624_v29 }
 0x175   : > { %2072 = vst.msk [vmem:[%s3754_s21] sm:$0xf] %vm2071_vm5, %v2508_v16  ;;  %v1992_v13 = vadd.f32 %v1931_v10, %v1863_v52  ;;  %v2790_v32 = vpop.f32.mrf.mxu1  ;;  %v2511_v12 = vpack.c.bf16 %v1994_v3, %v1994_v3  ;;  %v2141_v61 = vsel %vm786_vm3, %v2125_v17, 0.0  ;;  %v2128_v41 = vmul.f32 %v1994_v3, %v1994_v3 }
 0x176   : > { %v2804_v4 = vpop.f32.mrf.mxu0  ;;  %v2093_v21 = vsel %vm786_vm3, %v1994_v3, 0.0  ;;  %v1872_v22 = vadd.f32 %v2790_v32, %v1741_v48  ;;  %v1744_v10 = vadd.f32 %v3740_v31, %v3776_v34 }
 0x177   : > { %v2509_v20 = vpack.c.bf16 %v1992_v13, %v1992_v13  ;;  %v2089_v62 = vsel %vm786_vm3, %v1992_v13, 0.0  ;;  %v2126_v47 = vmul.f32 %v1992_v13, %v1992_v13  ;;  %v1997_v44 = vadd.f32 %v2804_v4, %v1868_v59  ;;  %v1831_v6 = vpop.f32.mrf.mxu1  ;;  %2075 = vst.msk [vmem:[%s3754_s21 + $0xc] sm:$0xf] %vm2071_vm5, %v2511_v12 }
 0x178   : > { %v2090_v55 = vadd.f32 %v2089_v62, %v2088_v18  ;;  %v1944_v27 = vpop.f32.mrf.mxu0  ;;  %v2146_v43 = vsel %vm786_vm3, %v2128_v41, 0.0  ;;  %v1870_v48 = vadd.f32 %v1831_v6, %v3766_v15 }
 0x179   : > { %2073 = vst.msk [vmem:[%s3754_s21 + $0x4] sm:$0xf] %vm2071_vm5, %v2509_v20  ;;  %v2142_v14 = vsel %vm786_vm3, %v2126_v47, 0.0  ;;  %v2514_v1 = vpack.c.bf16 %v1997_v44, %v1997_v44  ;;  %v2791_v5 = vpop.f32.mrf.mxu1  ;;  %v1995_v19 = vadd.f32 %v1944_v27, %v1866_v7  ;;  %v2131_v52 = vmul.f32 %v1997_v44, %v1997_v44 }
 0x17a   : > { %v2092_v38 = vadd.f32 %v2091_v45, %v2090_v55  ;;  %v2143_v58 = vadd.f32 %v2142_v14, %v2141_v61  ;;  %v2805_v57 = vpop.f32.mrf.mxu0  ;;  %v1873_v59 = vadd.f32 %v2791_v5, %v3772_v24  ;;  %v2099_v40 = vsel %vm786_vm3, %v1997_v44, 0.0 }
 0x17b   : > { %2078 = vst.msk [vmem:[%s3754_s21 + $0x18] sm:$0xf] %vm2071_vm5, %v2514_v1  ;;  %v1998_v25 = vadd.f32 %v2805_v57, %v1869_v42  ;;  %v1834_v36 = vpop.f32.mrf.mxu1  ;;  %v2512_v51 = vpack.c.bf16 %v1995_v19, %v1995_v19  ;;  %v2095_v63 = vsel %vm786_vm3, %v1995_v19, 0.0  ;;  %v2129_v54 = vmul.f32 %v1995_v19, %v1995_v19 }
 0x17c   : > { %v2145_v60 = vadd.f32 %v2144_v50, %v2143_v58  ;;  %v2094_v30 = vadd.f32 %v2093_v21, %v2092_v38  ;;  %v1947_v46 = vpop.f32.mrf.mxu0  ;;  %v2152_v20 = vsel %vm786_vm3, %v2131_v52, 0.0  ;;  %v1871_v34 = vadd.f32 %v1834_v36, %v3779_v37 }
 0x17d   : > { %v2515_v0 = vpack.c.bf16 %v1998_v25, %v1998_v25  ;;  %v2794_v35 = vpop.f32.mrf.mxu1  ;;  %2076 = vst.msk [vmem:[%s3754_s21 + $0x10] sm:$0xf] %vm2071_vm5, %v2512_v51  ;;  %v1996_v2 = vadd.f32 %v1947_v46, %v1867_v56  ;;  %v2148_v16 = vsel %vm786_vm3, %v2129_v54, 0.0  ;;  %v2132_v18 = vmul.f32 %v1998_v25, %v1998_v25 }
 0x17e   : > { %v2096_v33 = vadd.f32 %v2095_v63, %v2094_v30  ;;  %v2147_v53 = vadd.f32 %v2146_v43, %v2145_v60  ;;  %v2808_v8 = vpop.f32.mrf.mxu0  ;;  %v2101_v24 = vsel %vm786_vm3, %v1998_v25, 0.0  ;;  %v1876_v42 = vadd.f32 %v2794_v35, %v3784_v39 }
 0x17f   : > { %2079 = vst.msk [vmem:[%s3754_s21 + $0x1c] sm:$0xf] %vm2071_vm5, %v2515_v0  ;;  %v2001_v26 = vadd.f32 %v2808_v8, %v1872_v22  ;;  %v2513_v28 = vpack.c.bf16 %v1996_v2, %v1996_v2  ;;  %v2097_v3 = vsel %vm786_vm3, %v1996_v2, 0.0  ;;  %v2130_v49 = vmul.f32 %v1996_v2, %v1996_v2  ;;  %v1847_v32 = vpop.f32.mrf.mxu1 }
 0x180   : > { %v2149_v23 = vadd.f32 %v2148_v16, %v2147_v53  ;;  %v1960_v29 = vpop.f32.mrf.mxu0  ;;  %v2098_v17 = vadd.f32 %v2097_v3, %v2096_v33  ;;  %v2154_v41 = vsel %vm786_vm3, %v2132_v18, 0.0  ;;  %v1874_v19 = vadd.f32 %v1847_v32, %v3796_v11 }
 0x181   : > { %v2518_v13 = vpack.c.bf16 %v2001_v26, %v2001_v26  ;;  %2077 = vst.msk [vmem:[%s3754_s21 + $0x14] sm:$0xf] %vm2071_vm5, %v2513_v28  ;;  %v2150_v15 = vsel %vm786_vm3, %v2130_v49, 0.0  ;;  %v1999_v12 = vadd.f32 %v1960_v29, %v1870_v48  ;;  %v2795_v61 = vpop.f32.mrf.mxu1  ;;  %v2135_v14 = vmul.f32 %v2001_v26, %v2001_v26 }
 0x182   : > { %v2809_v4 = vpop.f32.mrf.mxu0  ;;  %v2100_v62 = vadd.f32 %v2099_v40, %v2098_v17  ;;  %v2151_v47 = vadd.f32 %v2150_v15, %v2149_v23  ;;  %v1877_v51 = vadd.f32 %v2795_v61, %v1746_v9  ;;  %v2107_v46 = vsel %vm786_vm3, %v2001_v26, 0.0 }
 0x183   : > { %2082 = vst.msk [vmem:[%s3754_s21 + $0x28] sm:$0xf] %vm2071_vm5, %v2518_v13  ;;  %v2002_v31 = vadd.f32 %v2809_v4, %v1873_v59  ;;  %v2516_v44 = vpack.c.bf16 %v1999_v12, %v1999_v12  ;;  %v2133_v6 = vmul.f32 %v1999_v12, %v1999_v12  ;;  %v2103_v1 = vsel %vm786_vm3, %v1999_v12, 0.0  ;;  %v1850_v22 = vpop.f32.mrf.mxu1 }
 0x184   : > { %v1963_v45 = vpop.f32.mrf.mxu0  ;;  %v2153_v7 = vadd.f32 %v2152_v20, %v2151_v47  ;;  %v2102_v55 = vadd.f32 %v2101_v24, %v2100_v62  ;;  %v2160_v0 = vsel %vm786_vm3, %v2135_v14, 0.0  ;;  %v1875_v2 = vadd.f32 %v1850_v22, %v1744_v10 }
 0x185   : > { %v2519_v27 = vpack.c.bf16 %v2002_v31, %v2002_v31  ;;  %2080 = vst.msk [vmem:[%s3754_s21 + $0x20] sm:$0xf] %vm2071_vm5, %v2516_v44  ;;  %v2000_v5 = vadd.f32 %v1963_v45, %v1871_v34  ;;  %v2156_v39 = vsel %vm786_vm3, %v2133_v6, 0.0  ;;  %v2136_v43 = vmul.f32 %v2002_v31, %v2002_v31 }
 0x186   : > { %v2812_v38 = vpop.f32.mrf.mxu0  ;;  %v2104_v37 = vadd.f32 %v2103_v1, %v2102_v55  ;;  %v2155_v58 = vadd.f32 %v2154_v41, %v2153_v7  ;;  %v2109_v9 = vsel %vm786_vm3, %v2002_v31, 0.0 }
 0x187   : > { %2083 = vst.msk [vmem:[%s3754_s21 + $0x2c] sm:$0xf] %vm2071_vm5, %v2519_v27  ;;  %v2005_v57 = vadd.f32 %v2812_v38, %v1876_v42  ;;  %v2517_v50 = vpack.c.bf16 %v2000_v5, %v2000_v5  ;;  %v2105_v21 = vsel %vm786_vm3, %v2000_v5, 0.0  ;;  %v2134_v56 = vmul.f32 %v2000_v5, %v2000_v5 }
 0x188   : > { %v1976_v25 = vpop.f32.mrf.mxu0  ;;  %v2157_v36 = vadd.f32 %v2156_v39, %v2155_v58  ;;  %v2106_v60 = vadd.f32 %v2105_v21, %v2104_v37  ;;  %v2162_v28 = vsel %vm786_vm3, %v2136_v43, 0.0 }
 0x189   : > { %v2522_v30 = vpack.c.bf16 %v2005_v57, %v2005_v57  ;;  %2081 = vst.msk [vmem:[%s3754_s21 + $0x24] sm:$0xf] %vm2071_vm5, %v2517_v50  ;;  %v2158_v11 = vsel %vm786_vm3, %v2134_v56, 0.0  ;;  %v2003_v63 = vadd.f32 %v1976_v25, %v1874_v19  ;;  %v2139_v29 = vmul.f32 %v2005_v57, %v2005_v57 }
 0x18a   : > { %v2813_v54 = vpop.f32.mrf.mxu0  ;;  %v2108_v35 = vadd.f32 %v2107_v46, %v2106_v60  ;;  %v2159_v33 = vadd.f32 %v2158_v11, %v2157_v36  ;;  %v2115_v12 = vsel %vm786_vm3, %v2005_v57, 0.0 }
 0x18b   : > { %2086 = vst.msk [vmem:[%s3754_s21 + $0x38] sm:$0xf] %vm2071_vm5, %v2522_v30  ;;  %v2006_v53 = vadd.f32 %v2813_v54, %v1877_v51  ;;  %v2520_v8 = vpack.c.bf16 %v2003_v63, %v2003_v63  ;;  %v2137_v52 = vmul.f32 %v2003_v63, %v2003_v63  ;;  %v2111_v3 = vsel %vm786_vm3, %v2003_v63, 0.0 }
 0x18c   : > { %v1979_v16 = vpop.f32.mrf.mxu0  ;;  %v2161_v48 = vadd.f32 %v2160_v0, %v2159_v33  ;;  %v2110_v26 = vadd.f32 %v2109_v9, %v2108_v35  ;;  %v2168_v31 = vsel %vm786_vm3, %v2139_v29, 0.0 }
 0x18d   : > { %v2523_v23 = vpack.c.bf16 %v2006_v53, %v2006_v53  ;;  %2084 = vst.msk [vmem:[%s3754_s21 + $0x30] sm:$0xf] %vm2071_vm5, %v2520_v8  ;;  %v2004_v49 = vadd.f32 %v1979_v16, %v1875_v2  ;;  %v2164_v10 = vsel %vm786_vm3, %v2137_v52, 0.0  ;;  %v2140_v4 = vmul.f32 %v2006_v53, %v2006_v53 }
 0x18e   : > { %v2112_v17 = vadd.f32 %v2111_v3, %v2110_v26  ;;  %v2163_v59 = vadd.f32 %v2162_v28, %v2161_v48  ;;  %v2117_v24 = vsel %vm786_vm3, %v2006_v53, 0.0 }
 0x18f   : > { %2087 = vst.msk [vmem:[%s3754_s21 + $0x3c] sm:$0xf] %vm2071_vm5, %v2523_v23  ;;  %v2521_v13 = vpack.c.bf16 %v2004_v49, %v2004_v49  ;;  %v2113_v32 = vsel %vm786_vm3, %v2004_v49, 0.0  ;;  %v2138_v40 = vmul.f32 %v2004_v49, %v2004_v49  ;;  %v2170_v6 = vsel %vm786_vm3, %v2140_v4, 0.0 }
 0x190   : > { %v2165_v18 = vadd.f32 %v2164_v10, %v2163_v59  ;;  %v2114_v15 = vadd.f32 %v2113_v32, %v2112_v17 }
 0x191   : > { %2085 = vst.msk [vmem:[%s3754_s21 + $0x34] sm:$0xf] %vm2071_vm5, %v2521_v13  ;;  %v2166_v20 = vsel %vm786_vm3, %v2138_v40, 0.0 }
 0x192   : > { %v2116_v62 = vadd.f32 %v2115_v12, %v2114_v15  ;;  %v2167_v47 = vadd.f32 %v2166_v20, %v2165_v18 }
 0x194   : > { %v2118_v34 = vadd.f32 %v2117_v24, %v2116_v62  ;;  %v2169_v44 = vadd.f32 %v2168_v31, %v2167_v47 }
 0x196   : > { %v2119_v45 = vrot.slane %v2118_v34, 4  ;;  %v2171_v7 = vadd.f32 %v2170_v6, %v2169_v44 }
 0x198   : > { %v2120_v55 = vadd.f32 %v2119_v45, %v2118_v34  ;;  %v2172_v42 = vrot.slane %v2171_v7, 4 }
 0x19a   : > { %v2121_v27 = vrot.slane %v2120_v55, 2  ;;  %v2173_v61 = vadd.f32 %v2172_v42, %v2171_v7 }
 0x19c   : > { %v2122_v41 = vadd.f32 %v2121_v27, %v2120_v55  ;;  %v2174_v14 = vrot.slane %v2173_v61, 2 }
 0x19e   : > { %v2123_v1 = vrot.slane %v2122_v41, 1  ;;  %v2175_v5 = vadd.f32 %v2174_v14, %v2173_v61 }
 0x1a0   : > { %v2176_v38 = vrot.slane %v2175_v5, 1  ;;  %v2124_v37 = vadd.f32 %v2123_v1, %v2122_v41 }
 0x1a2   : > { %v2177_v58 = vadd.f32 %v2176_v38, %v2175_v5 }
 0x1a4   : > { %v2178_v19 = vsel %vm613_vm1, %v2124_v37, %v2177_v58 }
 0x1a5   : > { %2180 = vst.msk [vmem:[%s465_s25] sm:$0x3] %vm2179_vm6, %v2178_v19 }
 0x1a6 PF: > { %s18_s28 = sadd.s32 1, %s2904_s28   ;;  %s3924_s24 = smov %s2896_s26 }
 0x1a7   : > { %p15_p13 = scmp.ge.s32.totalorder %s18_s28, 6   ;;  %s3925_s25 = smov %s2900_s27 }
 0x1a8   : > { %s3926_s26 = smov %s3929_s29  ;;  %s3927_s27 = smov %s3933_s30 }
 0x1a9   :  { %17 = sbr.rel (!%p15_p13) target bundleno = 3 (0x3), region = 100 }

// kernel: expansion_resblock_nhwc.7
= control target key start
LH: loop header
LB: loop body
LE: loop exit
PB: predicated region body
PF: predicated region fallthrough
CT: control target
= control target key end

     0   :  { %v31_v0 = vlaneseq  ;;  %s196_s0 = inlined_call_operand.vmem [shape: bf16[32,256], index: 0, kind: input, shape index: {}]   ;;  %s197_s2 = inlined_call_operand.vmem [shape: f32[1,256], index: 2, kind: input, shape index: {}]   ;;  %s198_s3 = inlined_call_operand.vmem [shape: f32[1,256], index: 3, kind: input, shape index: {}]   ;;  %s199_s1 = inlined_call_operand.vmem [shape: f32[32,256], index: 1, kind: input, shape index: {}]   ;;  %s200_s4 = inlined_call_operand.vmem [shape: f32[32,256], index: 4, kind: output, shape index: {}]  }
   0x1   :  { %v17_v1 = vld [vmem:[%s196_s0] sm:$0xff]  ;;  %v18_v3 = vld [vmem:[%s196_s0 + $0x8] sm:$0xff]  ;;  %v19_v8 = vld [vmem:[%s196_s0 + $0x10] sm:$0xff] }
   0x2   :  { %v32_v2 = vshrl.u32 %v31_v0, 7  ;;  %v21_v4 = vunpack.c.l.bf16 %v17_v1  ;;  %v29_v5 = vld [vmem:[%s197_s2] sm:$0x3]  ;;  %v22_v7 = vunpack.c.h.bf16 %v17_v1  ;;  %v23_v11 = vunpack.c.l.bf16 %v18_v3  ;;  %v20_v13 = vld [vmem:[%s196_s0 + $0x18] sm:$0xff]  ;;  %v70_v25 = vld [vmem:[%s199_s1 + $0x8] sm:$0xff] }
   0x3   :  { %v49_v6 = vld [vmem:[%s198_s3] sm:$0x3]  ;;  %v24_v12 = vunpack.c.h.bf16 %v18_v3  ;;  %v25_v14 = vunpack.c.l.bf16 %v19_v8  ;;  %v26_v15 = vunpack.c.h.bf16 %v19_v8  ;;  %v27_v16 = vunpack.c.l.bf16 %v20_v13  ;;  %v71_v28 = vld [vmem:[%s199_s1 + $0x10] sm:$0xff]  ;;  %v72_v29 = vld [vmem:[%s199_s1 + $0x18] sm:$0xff] }
   0x4   :  { %v33_v9 = vsub.s32 0, %v32_v2  ;;  %v37_v10 = vsub.s32 1, %v32_v2  ;;  %v28_v17 = vunpack.c.h.bf16 %v20_v13  ;;  %v69_v23 = vld [vmem:[%s199_s1] sm:$0xff]  ;;  %v74_v39 = vld [vmem:[%s199_s1 + $0x28] sm:$0xff]  ;;  %v75_v40 = vld [vmem:[%s199_s1 + $0x30] sm:$0xff] }
   0x5   :  { %v73_v31 = vld [vmem:[%s199_s1 + $0x20] sm:$0xff]  ;;  %v76_v41 = vld [vmem:[%s199_s1 + $0x38] sm:$0xff] }
   0x6   :  { %v34_v18 = vrot.slane %v29_v5, %v33_v9  ;;  %v54_v19 = vrot.slane %v49_v6, %v33_v9  ;;  %v38_v20 = vrot.slane %v29_v5, %v37_v10  ;;  %v58_v21 = vrot.slane %v49_v6, %v37_v10 }
   0x8   :  { %v41_v22 = vmul.f32 %v34_v18, %v21_v4  ;;  %v42_v24 = vmul.f32 %v38_v20, %v22_v7  ;;  %v43_v26 = vmul.f32 %v34_v18, %v23_v11  ;;  %v44_v27 = vmul.f32 %v38_v20, %v24_v12 }
   0x9   :  { %v45_v30 = vmul.f32 %v34_v18, %v25_v14  ;;  %v46_v32 = vmul.f32 %v38_v20, %v26_v15  ;;  %v47_v33 = vmul.f32 %v34_v18, %v27_v16  ;;  %v48_v34 = vmul.f32 %v38_v20, %v28_v17 }
   0xa   :  { %v61_v35 = vadd.f32 %v54_v19, %v41_v22  ;;  %v62_v36 = vadd.f32 %v58_v21, %v42_v24  ;;  %v63_v37 = vadd.f32 %v54_v19, %v43_v26  ;;  %v64_v38 = vadd.f32 %v58_v21, %v44_v27 }
   0xb   :  { %v65_v42 = vadd.f32 %v54_v19, %v45_v30  ;;  %v66_v43 = vadd.f32 %v58_v21, %v46_v32  ;;  %v67_v44 = vadd.f32 %v54_v19, %v47_v33  ;;  %v68_v45 = vadd.f32 %v58_v21, %v48_v34 }
   0xc   :  { %v77_v46 = vadd.f32 %v69_v23, %v61_v35  ;;  %v78_v47 = vadd.f32 %v70_v25, %v62_v36  ;;  %v79_v48 = vadd.f32 %v71_v28, %v63_v37  ;;  %v80_v49 = vadd.f32 %v72_v29, %v64_v38 }
   0xd   :  { %v81_v50 = vadd.f32 %v73_v31, %v65_v42  ;;  %v82_v51 = vadd.f32 %v74_v39, %v66_v43  ;;  %v83_v52 = vadd.f32 %v75_v40, %v67_v44  ;;  %v84_v53 = vadd.f32 %v76_v41, %v68_v45 }
   0xe   :  { %v85_v54 = vmax.f32 %v77_v46, 0.0  ;;  %v86_v55 = vmax.f32 %v78_v47, 0.0  ;;  %v87_v56 = vmax.f32 %v79_v48, 0.0  ;;  %v88_v57 = vmax.f32 %v80_v49, 0.0 }
   0xf   :  { %v89_v58 = vmax.f32 %v81_v50, 0.0  ;;  %v90_v59 = vmax.f32 %v82_v51, 0.0  ;;  %v91_v60 = vmax.f32 %v83_v52, 0.0  ;;  %v92_v61 = vmax.f32 %v84_v53, 0.0 }
  0x10   :  { %93 = vst [vmem:[%s200_s4] sm:$0xff] %v85_v54  ;;  %94 = vst [vmem:[%s200_s4 + $0x8] sm:$0xff] %v86_v55 }
  0x11   :  { %95 = vst [vmem:[%s200_s4 + $0x10] sm:$0xff] %v87_v56  ;;  %96 = vst [vmem:[%s200_s4 + $0x18] sm:$0xff] %v88_v57 }
  0x12   :  { %97 = vst [vmem:[%s200_s4 + $0x20] sm:$0xff] %v89_v58  ;;  %98 = vst [vmem:[%s200_s4 + $0x28] sm:$0xff] %v90_v59 }
  0x13   :  { %99 = vst [vmem:[%s200_s4 + $0x30] sm:$0xff] %v91_v60  ;;  %100 = vst [vmem:[%s200_s4 + $0x38] sm:$0xff] %v92_v61 }

</bundles_post_ra>
